<compile_context>
chip_gen: v7x
topology: tpu7x:2x2x1
jax: 0.10.0
libtpu: 0.0.40
codegen_flags: <defaults>
</compile_context>

<pallas_src>
import functools

import jax
import jax.numpy as jnp
import numpy as np
from jax import lax
from jax.experimental import pallas as pl
from jax.experimental.pallas import tpu as pltpu


# ------------------------------ small helpers ---------------------------------

def _round_up(x, m):
    return (x + m - 1) // m * m


def _pad_to(a, shape):
    pads = [(0, s - d) for d, s in zip(a.shape, shape)]
    if any(p[1] for p in pads):
        return jnp.pad(a, pads)
    return a


def _vmem_limit_bytes():
    cap = 64 * 1024 * 1024
    try:
        cap = int(getattr(pltpu.get_tpu_info(), "vmem_capacity_bytes", cap))
    except Exception:
        pass
    # ~75% of physical VMEM: 96 MiB on v5e/v6e (128 MiB), 48 MiB on v7x (64 MiB).
    return max(32 * 1024 * 1024, (cap * 3) // 4)


_VMEM_LIMIT = _vmem_limit_bytes()


def _compiler_params(dim_sem):
    return pltpu.CompilerParams(dimension_semantics=dim_sem,
                                vmem_limit_bytes=_VMEM_LIMIT)


# ----------------------- fused down conv (LeakyReLU -> conv -> ReLU) -----------------------

def _down_kernel(xs_ref, wd_ref, o_ref, *, OW, L):
    """One batch element: LeakyReLU(0.2) + Conv2d(4,2,1,bias=False) + fused up-path ReLU.

    xs_ref : ((OH+2)*(OW+1), 4*Cin) bf16 -- space-to-depth'd zero-padded input, flat rows
    wd_ref : (4, 4*Cin, inner_p)   bf16 -- per-(dh,dw) tap weights (resident)
    o_ref  : (OH*(OW+1), inner_p)  bf16 -- conv output in "wide row" layout (wrap col junk)
    """
    W1 = OW + 1
    acc = jnp.zeros(o_ref.shape, jnp.float32)
    for dh in (0, 1):
        for dw in (0, 1):
            off = dh * W1 + dw
            xa = xs_ref[off:off + L, :]
            xa = jnp.where(xa >= 0, xa, 0.2 * xa)            # LeakyReLU(0.2), fused
            acc = acc + jnp.dot(xa, wd_ref[dh * 2 + dw, :, :],
                                preferred_element_type=jnp.float32)
    # up-path ReLU fused into the epilogue; bf16 writeback halves HBM traffic on y.
    o_ref[...] = jnp.maximum(acc, 0.0).astype(o_ref.dtype)


# ---------------- fused transposed conv (4 phases x 4 taps) + BN statistics ----------------

def _up_kernel(ypad_ref, wu_ref, mask_ref, t_ref, stats_ref, *, L2, W2):
    """One batch element: ConvTranspose2d(4,2,1,bias=False) + partial BatchNorm stats.

    ypad_ref  : ((OH+4)*(OW+2), inner_p) bf16 -- zero-padded compact down output, flat rows
    wu_ref    : (4, 4, inner_p, outer_p) bf16 -- per-(phase, tap) weights (resident)
    mask_ref  : (L2, 1) f32                   -- 1 for valid rows, 0 for wrap rows
    t_ref     : (4, L2, outer_p) f32          -- phase-blocked conv-T output
    stats_ref : (2, outer_p) f32              -- [sum, sum-of-squares] over valid rows
    """
    mask = mask_ref[...]
    C = stats_ref.shape[-1]
    s1 = jnp.zeros((1, C), jnp.float32)
    s2 = jnp.zeros((1, C), jnp.float32)
    for a in (0, 1):
        for b in (0, 1):
            ph = a * 2 + b
            acc = jnp.zeros((L2, C), jnp.float32)
            for di in (0, 1):
                for dj in (0, 1):
                    off = (a + di) * W2 + (b + dj)
                    acc = acc + jnp.dot(ypad_ref[off:off + L2, :],
                                        wu_ref[ph, di * 2 + dj, :, :],
                                        preferred_element_type=jnp.float32)
            t_ref[ph, :, :] = acc
            m_acc = acc * mask
            s1 = s1 + jnp.sum(m_acc, axis=0, keepdims=True)
            s2 = s2 + jnp.sum(m_acc * acc, axis=0, keepdims=True)
    row = lax.broadcasted_iota(jnp.int32, stats_ref.shape, 0)
    stats_ref[...] = jnp.where(row == 0, s1, s2)


# ------------------------------ BN normalize (row-tiled) -----------------------------------

def _bn_norm_kernel(t_ref, sc_ref, sh_ref, o_ref):
    o_ref[...] = t_ref[...] * sc_ref[...] + sh_ref[...]


def pallas_bn_normalize(y, scale, shift, *, tm=1024):
    """y: (M, C) f32, scale/shift: (1, C) f32 -> y * scale + shift, lane-dense tiles."""
    M, C = y.shape
    TM = min(tm, _round_up(M, 8))
    Mp = _round_up(M, TM)
    yp = _pad_to(y, (Mp, C))
    out = pl.pallas_call(
        _bn_norm_kernel,
        out_shape=jax.ShapeDtypeStruct((Mp, C), jnp.float32),
        grid=(Mp // TM,),
        in_specs=[pl.BlockSpec((TM, C), lambda i: (i, 0)),
                  pl.BlockSpec((1, C), lambda i: (0, 0)),
                  pl.BlockSpec((1, C), lambda i: (0, 0))],
        out_specs=pl.BlockSpec((TM, C), lambda i: (i, 0)),
        compiler_params=_compiler_params(("parallel",)),
    )(yp, scale, shift)
    return out[:M]


# ------------------------------------ forward ----------------------------------------------

def unet_innermost_forward(x, params, *, eps=1e-5):
    """x: (N, input_nc, H, W) NCHW f32 -> (N, input_nc + outer_nc, H, W)."""
    N, Cin, H, W = x.shape
    OH, OW = H // 2, W // 2
    w_down = params["w_down"]                    # (inner, Cin, 4, 4)
    w_up = params["w_up"]                        # (inner, outer, 4, 4)
    inner, outer = w_down.shape[0], w_up.shape[1]
    inner_p = _round_up(inner, 128)
    outer_p = _round_up(outer, 128)
    K4 = 4 * Cin
    W1, W2 = OW + 1, OW + 2
    L1, L2 = OH * W1, OH * W2

    # ---- down: LeakyReLU -> Conv2d(4,2,1) -> ReLU, one fused kernel (no im2col) ----
    x_nhwc = jnp.transpose(x, (0, 2, 3, 1))
    # (1,1) conv padding; 2 extra zero rows keep the flattened tap windows in bounds.
    xp = jnp.pad(x_nhwc, ((0, 0), (1, 3), (1, 1), (0, 0))).astype(jnp.bfloat16)
    # space-to-depth: stride-2 4x4 conv -> 4 stride-1 taps over xs (N, OH+2, OW+1, 4*Cin)
    xs = xp.reshape(N, OH + 2, 2, W1, 2, Cin).transpose(0, 1, 3, 2, 4, 5)
    xs = xs.reshape(N, (OH + 2) * W1, K4)
    # Wd[dh*2+dw, (p,q,c), o] = w_down[o, c, 2*dh+p, 2*dw+q]
    wd = w_down.reshape(inner, Cin, 2, 2, 2, 2).transpose(2, 4, 3, 5, 1, 0)
    wd = _pad_to(wd.reshape(4, K4, inner), (4, K4, inner_p)).astype(jnp.bfloat16)

    y = pl.pallas_call(
        functools.partial(_down_kernel, OW=OW, L=L1),
        out_shape=jax.ShapeDtypeStruct((N, L1, inner_p), jnp.bfloat16),
        grid=(N,),
        in_specs=[
            pl.BlockSpec((None, (OH + 2) * W1, K4), lambda n: (n, 0, 0)),
            pl.BlockSpec((4, K4, inner_p), lambda n: (0, 0, 0)),      # resident weights
        ],
        out_specs=pl.BlockSpec((None, L1, inner_p), lambda n: (n, 0, 0)),
        compiler_params=_compiler_params(("parallel",)),
    )(xs, wd)

    # ---- up: ConvTranspose2d(4,2,1) as 4 phases x 4 taps + fused BN stats -----------
    y4 = y.reshape(N, OH, W1, inner_p)[:, :, :OW, :]           # drop wrap column (compact)
    ypad = jnp.pad(y4, ((0, 0), (1, 3), (1, 1), (0, 0)))       # conv-T halo + 2 spare rows
    ypad = ypad.reshape(N, (OH + 4) * W2, inner_p)
    # Wu[a*2+b, di*2+dj] = w_up[:, :, 3-a-2*di, 3-b-2*dj]
    wu = jnp.stack([jnp.stack([w_up[:, :, 3 - a - 2 * di, 3 - b - 2 * dj]
                               for di in (0, 1) for dj in (0, 1)], axis=0)
                    for a in (0, 1) for b in (0, 1)], axis=0)  # (4, 4, inner, outer)
    wu = _pad_to(wu, (4, 4, inner_p, outer_p)).astype(jnp.bfloat16)
    mask = (jnp.arange(L2) % W2 < OW).astype(jnp.float32).reshape(L2, 1)

    t, stats_p = pl.pallas_call(
        functools.partial(_up_kernel, L2=L2, W2=W2),
        out_shape=(jax.ShapeDtypeStruct((N, 4, L2, outer_p), jnp.float32),
                   jax.ShapeDtypeStruct((N, 2, outer_p), jnp.float32)),
        grid=(N,),
        in_specs=[
            pl.BlockSpec((None, (OH + 4) * W2, inner_p), lambda n: (n, 0, 0)),
            pl.BlockSpec((4, 4, inner_p, outer_p), lambda n: (0, 0, 0, 0)),
            pl.BlockSpec((L2, 1), lambda n: (0, 0)),
        ],
        out_specs=(
            pl.BlockSpec((None, 4, L2, outer_p), lambda n: (n, 0, 0, 0)),
            pl.BlockSpec((None, 2, outer_p), lambda n: (n, 0, 0)),
        ),
        compiler_params=_compiler_params(("parallel",)),
    )(ypad, wu, mask)

    # ---- BatchNorm2d(outer): batch statistics from the fused kernel output ----------
    stats = jnp.sum(stats_p, axis=0)                           # (2, outer_p)
    m_tot = float(N * H * W)
    mean = stats[0] / m_tot
    var = jnp.maximum(stats[1] / m_tot - mean * mean, 0.0)     # biased var, like PyTorch
    inv = lax.rsqrt(var + eps)
    gamma_p = _pad_to(params["gamma"].astype(jnp.float32), (outer_p,))
    beta_p = _pad_to(params["beta"].astype(jnp.float32), (outer_p,))
    scale = (gamma_p * inv).reshape(1, outer_p)
    shift = (beta_p - mean * gamma_p * inv).reshape(1, outer_p)

    # Normalize on the phase-blocked slab directly (BN is row-order invariant); the
    # phase->spatial interleave is folded into the single final layout pass below.
    t2 = pallas_bn_normalize(t.reshape(N * 4 * L2, outer_p), scale, shift)

    # ---- skip connection: cat([x, model(x)], dim=1) at the NCHW module boundary -----
    # TODO(synk): fuse this layout pass + concat into a Pallas kernel writing NCHW.
    t2 = t2.reshape(N, 2, 2, OH, W2, outer_p)[:, :, :, :, :OW, :outer]
    t_nchw = jnp.transpose(t2, (0, 5, 3, 1, 4, 2)).reshape(N, outer, H, W)
    return jnp.concatenate([x, t_nchw], axis=1)


# ---------------------------- pure-JAX f32 reference ----------------------------

def _reference_forward(x, params, eps=1e-5):
    dn = ("NCHW", "OIHW", "NCHW")
    xl = jnp.where(x >= 0, x, 0.2 * x)
    y = lax.conv_general_dilated(xl, params["w_down"], window_strides=(2, 2),
                                 padding=[(1, 1), (1, 1)], dimension_numbers=dn)
    r = jnp.maximum(y, 0.0)
    w_equiv = jnp.flip(params["w_up"], axis=(2, 3)).transpose(1, 0, 2, 3)
    t = lax.conv_general_dilated(r, w_equiv, window_strides=(1, 1),
                                 padding=[(2, 2), (2, 2)], lhs_dilation=(2, 2),
                                 dimension_numbers=dn)
    mean = t.mean(axis=(0, 2, 3), keepdims=True)
    var = ((t - mean) ** 2).mean(axis=(0, 2, 3), keepdims=True)
    g = params["gamma"].reshape(1, -1, 1, 1)
    b = params["beta"].reshape(1, -1, 1, 1)
    tn = (t - mean) * lax.rsqrt(var + eps) * g + b
    return jnp.concatenate([x, tn], axis=1)


# ------------------------------------ main ---------------------------------------

if __name__ == "__main__":
    key = jax.random.PRNGKey(0)
    k0, k1, k2 = jax.random.split(key, 3)

    # innermost block with input_nc = outer_nc = 4, inner_nc = 8
    N, input_nc, H, W = 2, 4, 16, 16
    outer_nc, inner_nc = 4, 8

    x = jax.random.normal(k0, (N, input_nc, H, W), dtype=jnp.float32)
    params = {
        # Conv2d(input_nc, inner_nc, 4, 2, 1, bias=False): weight (out, in, kh, kw)
        "w_down": 0.1 * jax.random.normal(k1, (inner_nc, input_nc, 4, 4), jnp.float32),
        # ConvTranspose2d(inner_nc, outer_nc, 4, 2, 1, bias=False): weight (in, out, kh, kw)
        "w_up": 0.1 * jax.random.normal(k2, (inner_nc, outer_nc, 4, 4), jnp.float32),
        # BatchNorm2d(outer_nc) default init
        "gamma": jnp.ones((outer_nc,), jnp.float32),
        "beta": jnp.zeros((outer_nc,), jnp.float32),
    }

    fwd = jax.jit(unet_innermost_forward)
    out = jax.block_until_ready(fwd(x, params))
    assert out.shape == (N, input_nc + outer_nc, H, W), out.shape

    ref = jax.block_until_ready(_reference_forward(x, params))
    # bf16 MXU operands (f32 accumulation) => tolerance loosened vs the f32 reference.
    np.testing.assert_allclose(np.asarray(out), np.asarray(ref), rtol=5e-2, atol=5e-2)

    print("KERNEL_OK")
</pallas_src>

<mosaic_0001>
module attributes {stable_mosaic.version = 11 : i64} {
  func.func @_down_kernel(%arg0: i32, %arg1: memref<1x90x16xbf16, #tpu.memory_space<vmem>>, %arg2: memref<4x16x128xbf16, #tpu.memory_space<vmem>>, %arg3: memref<1x72x128xbf16, #tpu.memory_space<vmem>>) attributes {dimension_semantics = [#tpu.dimension_semantics<parallel>], iteration_bounds = array<i64: 2>, scalar_prefetch = 0 : i64, scratch_operands = 0 : i64, tpu.core_type = #tpu.core_type<tc>, window_params = [{transform_indices = @transform_0, window_bounds = array<i64: 1, 90, 16>}, {pipeline_mode = #tpu.pipeline_mode<synchronous>, transform_indices = @transform_1, window_bounds = array<i64: 4, 16, 128>}, {transform_indices = @transform_2, window_bounds = array<i64: 1, 72, 128>}]} {
    %cst = arith.constant 0.000000e+00 : f32
    %0 = vector.broadcast %cst : f32 to vector<72x128xf32>
    %c0 = arith.constant 0 : index
    %c0_0 = arith.constant 0 : index
    %c0_1 = arith.constant 0 : index
    %1 = vector.load %arg1[%c0, %c0_0, %c0_1] : memref<1x90x16xbf16, #tpu.memory_space<vmem>>, vector<1x72x16xbf16>
    %2 = vector.shape_cast %1 : vector<1x72x16xbf16> to vector<72x16xbf16>
    %cst_2 = arith.constant 0.000000e+00 : bf16
    %3 = vector.broadcast %cst_2 : bf16 to vector<72x16xbf16>
    %4 = arith.cmpf oge, %2, %3 : vector<72x16xbf16>
    %cst_3 = arith.constant 2.001950e-01 : bf16
    %5 = vector.broadcast %cst_3 : bf16 to vector<72x16xbf16>
    %6 = arith.mulf %5, %2 : vector<72x16xbf16>
    %7 = arith.select %4, %2, %6 : vector<72x16xi1>, vector<72x16xbf16>
    %c0_4 = arith.constant 0 : index
    %c0_5 = arith.constant 0 : index
    %c0_6 = arith.constant 0 : index
    %8 = vector.load %arg2[%c0_4, %c0_5, %c0_6] : memref<4x16x128xbf16, #tpu.memory_space<vmem>>, vector<1x16x128xbf16>
    %9 = vector.shape_cast %8 : vector<1x16x128xbf16> to vector<16x128xbf16>
    %cst_7 = arith.constant dense<0.000000e+00> : vector<72x128xf32>
    %10 = tpu.matmul %7, %9, %cst_7 {dimension_numbers = #tpu.dot_dimension_numbers<[1], [0], [0], [1], [0, 0, 1, 1], [], []>} : vector<72x16xbf16>, vector<16x128xbf16>, vector<72x128xf32> -> vector<72x128xf32>
    %11 = arith.addf %0, %10 : vector<72x128xf32>
    %c0_8 = arith.constant 0 : index
    %c1 = arith.constant 1 : index
    %c0_9 = arith.constant 0 : index
    %12 = vector.load %arg1[%c0_8, %c1, %c0_9] : memref<1x90x16xbf16, #tpu.memory_space<vmem>>, vector<1x72x16xbf16>
    %13 = vector.shape_cast %12 : vector<1x72x16xbf16> to vector<72x16xbf16>
    %cst_10 = arith.constant 0.000000e+00 : bf16
    %14 = vector.broadcast %cst_10 : bf16 to vector<72x16xbf16>
    %15 = arith.cmpf oge, %13, %14 : vector<72x16xbf16>
    %cst_11 = arith.constant 2.001950e-01 : bf16
    %16 = vector.broadcast %cst_11 : bf16 to vector<72x16xbf16>
    %17 = arith.mulf %16, %13 : vector<72x16xbf16>
    %18 = arith.select %15, %13, %17 : vector<72x16xi1>, vector<72x16xbf16>
    %c1_12 = arith.constant 1 : index
    %c0_13 = arith.constant 0 : index
    %c0_14 = arith.constant 0 : index
    %19 = vector.load %arg2[%c1_12, %c0_13, %c0_14] : memref<4x16x128xbf16, #tpu.memory_space<vmem>>, vector<1x16x128xbf16>
    %20 = vector.shape_cast %19 : vector<1x16x128xbf16> to vector<16x128xbf16>
    %cst_15 = arith.constant dense<0.000000e+00> : vector<72x128xf32>
    %21 = tpu.matmul %18, %20, %cst_15 {dimension_numbers = #tpu.dot_dimension_numbers<[1], [0], [0], [1], [0, 0, 1, 1], [], []>} : vector<72x16xbf16>, vector<16x128xbf16>, vector<72x128xf32> -> vector<72x128xf32>
    %22 = arith.addf %11, %21 : vector<72x128xf32>
    %c0_16 = arith.constant 0 : index
    %c9 = arith.constant 9 : index
    %c0_17 = arith.constant 0 : index
    %23 = vector.load %arg1[%c0_16, %c9, %c0_17] : memref<1x90x16xbf16, #tpu.memory_space<vmem>>, vector<1x72x16xbf16>
    %24 = vector.shape_cast %23 : vector<1x72x16xbf16> to vector<72x16xbf16>
    %cst_18 = arith.constant 0.000000e+00 : bf16
    %25 = vector.broadcast %cst_18 : bf16 to vector<72x16xbf16>
    %26 = arith.cmpf oge, %24, %25 : vector<72x16xbf16>
    %cst_19 = arith.constant 2.001950e-01 : bf16
    %27 = vector.broadcast %cst_19 : bf16 to vector<72x16xbf16>
    %28 = arith.mulf %27, %24 : vector<72x16xbf16>
    %29 = arith.select %26, %24, %28 : vector<72x16xi1>, vector<72x16xbf16>
    %c2 = arith.constant 2 : index
    %c0_20 = arith.constant 0 : index
    %c0_21 = arith.constant 0 : index
    %30 = vector.load %arg2[%c2, %c0_20, %c0_21] : memref<4x16x128xbf16, #tpu.memory_space<vmem>>, vector<1x16x128xbf16>
    %31 = vector.shape_cast %30 : vector<1x16x128xbf16> to vector<16x128xbf16>
    %cst_22 = arith.constant dense<0.000000e+00> : vector<72x128xf32>
    %32 = tpu.matmul %29, %31, %cst_22 {dimension_numbers = #tpu.dot_dimension_numbers<[1], [0], [0], [1], [0, 0, 1, 1], [], []>} : vector<72x16xbf16>, vector<16x128xbf16>, vector<72x128xf32> -> vector<72x128xf32>
    %33 = arith.addf %22, %32 : vector<72x128xf32>
    %c0_23 = arith.constant 0 : index
    %c10 = arith.constant 10 : index
    %c0_24 = arith.constant 0 : index
    %34 = vector.load %arg1[%c0_23, %c10, %c0_24] : memref<1x90x16xbf16, #tpu.memory_space<vmem>>, vector<1x72x16xbf16>
    %35 = vector.shape_cast %34 : vector<1x72x16xbf16> to vector<72x16xbf16>
    %cst_25 = arith.constant 0.000000e+00 : bf16
    %36 = vector.broadcast %cst_25 : bf16 to vector<72x16xbf16>
    %37 = arith.cmpf oge, %35, %36 : vector<72x16xbf16>
    %cst_26 = arith.constant 2.001950e-01 : bf16
    %38 = vector.broadcast %cst_26 : bf16 to vector<72x16xbf16>
    %39 = arith.mulf %38, %35 : vector<72x16xbf16>
    %40 = arith.select %37, %35, %39 : vector<72x16xi1>, vector<72x16xbf16>
    %c3 = arith.constant 3 : index
    %c0_27 = arith.constant 0 : index
    %c0_28 = arith.constant 0 : index
    %41 = vector.load %arg2[%c3, %c0_27, %c0_28] : memref<4x16x128xbf16, #tpu.memory_space<vmem>>, vector<1x16x128xbf16>
    %42 = vector.shape_cast %41 : vector<1x16x128xbf16> to vector<16x128xbf16>
    %cst_29 = arith.constant dense<0.000000e+00> : vector<72x128xf32>
    %43 = tpu.matmul %40, %42, %cst_29 {dimension_numbers = #tpu.dot_dimension_numbers<[1], [0], [0], [1], [0, 0, 1, 1], [], []>} : vector<72x16xbf16>, vector<16x128xbf16>, vector<72x128xf32> -> vector<72x128xf32>
    %44 = arith.addf %33, %43 : vector<72x128xf32>
    %cst_30 = arith.constant 0.000000e+00 : f32
    %45 = vector.broadcast %cst_30 : f32 to vector<72x128xf32>
    %46 = arith.maximumf %44, %45 : vector<72x128xf32>
    %47 = arith.truncf %46 : vector<72x128xf32> to vector<72x128xbf16>
    %c0_31 = arith.constant 0 : index
    %c0_32 = arith.constant 0 : index
    %c0_33 = arith.constant 0 : index
    %48 = vector.load %arg3[%c0_31, %c0_32, %c0_33] : memref<1x72x128xbf16, #tpu.memory_space<vmem>>, vector<1x72x128xbf16>
    %49 = vector.shape_cast %48 : vector<1x72x128xbf16> to vector<72x128xbf16>
    %50 = vector.shape_cast %47 : vector<72x128xbf16> to vector<1x72x128xbf16>
    tpu.vector_store %arg3[%c0_31, %c0_32, %c0_33], %50 {strides = array<i32>} : memref<1x72x128xbf16, #tpu.memory_space<vmem>>, vector<1x72x128xbf16>,
    return
  }
  func.func @transform_0(%arg0: i32) -> (i32, i32, i32) {
    %c0_i32 = arith.constant 0 : i32
    %c0_i32_0 = arith.constant 0 : i32
    %c0_i32_1 = arith.constant 0 : i32
    return %arg0, %c0_i32, %c0_i32_0 : i32, i32, i32
  }
  func.func @transform_1(%arg0: i32) -> (i32, i32, i32) {
    %c0_i32 = arith.constant 0 : i32
    %c0_i32_0 = arith.constant 0 : i32
    %c0_i32_1 = arith.constant 0 : i32
    %c0_i32_2 = arith.constant 0 : i32
    return %c0_i32, %c0_i32_0, %c0_i32_1 : i32, i32, i32
  }
  func.func @transform_2(%arg0: i32) -> (i32, i32, i32) {
    %c0_i32 = arith.constant 0 : i32
    %c0_i32_0 = arith.constant 0 : i32
    %c0_i32_1 = arith.constant 0 : i32
    return %arg0, %c0_i32, %c0_i32_0 : i32, i32, i32
  }
}

module attributes {stable_mosaic.version = 11 : i64} {
  func.func @_up_kernel(%arg0: i32, %arg1: memref<1x120x128xbf16, #tpu.memory_space<vmem>>, %arg2: memref<4x4x128x128xbf16, #tpu.memory_space<vmem>>, %arg3: memref<80x1xf32, #tpu.memory_space<vmem>>, %arg4: memref<1x4x80x128xf32, #tpu.memory_space<vmem>>, %arg5: memref<1x2x128xf32, #tpu.memory_space<vmem>>) attributes {dimension_semantics = [#tpu.dimension_semantics<parallel>], iteration_bounds = array<i64: 2>, scalar_prefetch = 0 : i64, scratch_operands = 0 : i64, tpu.core_type = #tpu.core_type<tc>, window_params = [{transform_indices = @transform_0, window_bounds = array<i64: 1, 120, 128>}, {pipeline_mode = #tpu.pipeline_mode<synchronous>, transform_indices = @transform_1, window_bounds = array<i64: 4, 4, 128, 128>}, {pipeline_mode = #tpu.pipeline_mode<synchronous>, transform_indices = @transform_2, window_bounds = array<i64: 80, 1>}, {transform_indices = @transform_3, window_bounds = array<i64: 1, 4, 80, 128>}, {transform_indices = @transform_4, window_bounds = array<i64: 1, 2, 128>}]} {
    %c0 = arith.constant 0 : index
    %c0_0 = arith.constant 0 : index
    %0 = vector.load %arg3[%c0, %c0_0] : memref<80x1xf32, #tpu.memory_space<vmem>>, vector<80x1xf32>
    %cst = arith.constant 0.000000e+00 : f32
    %1 = vector.broadcast %cst : f32 to vector<1x128xf32>
    %cst_1 = arith.constant 0.000000e+00 : f32
    %2 = vector.broadcast %cst_1 : f32 to vector<1x128xf32>
    %cst_2 = arith.constant 0.000000e+00 : f32
    %3 = vector.broadcast %cst_2 : f32 to vector<80x128xf32>
    %c0_3 = arith.constant 0 : index
    %c0_4 = arith.constant 0 : index
    %c0_5 = arith.constant 0 : index
    %4 = vector.load %arg1[%c0_3, %c0_4, %c0_5] : memref<1x120x128xbf16, #tpu.memory_space<vmem>>, vector<1x80x128xbf16>
    %5 = vector.shape_cast %4 : vector<1x80x128xbf16> to vector<80x128xbf16>
    %c0_6 = arith.constant 0 : index
    %c0_7 = arith.constant 0 : index
    %c0_8 = arith.constant 0 : index
    %c0_9 = arith.constant 0 : index
    %6 = vector.load %arg2[%c0_6, %c0_7, %c0_8, %c0_9] : memref<4x4x128x128xbf16, #tpu.memory_space<vmem>>, vector<1x1x128x128xbf16>
    %7 = vector.shape_cast %6 : vector<1x1x128x128xbf16> to vector<128x128xbf16>
    %cst_10 = arith.constant dense<0.000000e+00> : vector<80x128xf32>
    %8 = tpu.matmul %5, %7, %cst_10 {dimension_numbers = #tpu.dot_dimension_numbers<[1], [0], [0], [1], [0, 0, 1, 1], [], []>} : vector<80x128xbf16>, vector<128x128xbf16>, vector<80x128xf32> -> vector<80x128xf32>
    %9 = arith.addf %3, %8 : vector<80x128xf32>
    %c0_11 = arith.constant 0 : index
    %c1 = arith.constant 1 : index
    %c0_12 = arith.constant 0 : index
    %10 = vector.load %arg1[%c0_11, %c1, %c0_12] : memref<1x120x128xbf16, #tpu.memory_space<vmem>>, vector<1x80x128xbf16>
    %11 = vector.shape_cast %10 : vector<1x80x128xbf16> to vector<80x128xbf16>
    %c0_13 = arith.constant 0 : index
    %c1_14 = arith.constant 1 : index
    %c0_15 = arith.constant 0 : index
    %c0_16 = arith.constant 0 : index
    %12 = vector.load %arg2[%c0_13, %c1_14, %c0_15, %c0_16] : memref<4x4x128x128xbf16, #tpu.memory_space<vmem>>, vector<1x1x128x128xbf16>
    %13 = vector.shape_cast %12 : vector<1x1x128x128xbf16> to vector<128x128xbf16>
    %cst_17 = arith.constant dense<0.000000e+00> : vector<80x128xf32>
    %14 = tpu.matmul %11, %13, %cst_17 {dimension_numbers = #tpu.dot_dimension_numbers<[1], [0], [0], [1], [0, 0, 1, 1], [], []>} : vector<80x128xbf16>, vector<128x128xbf16>, vector<80x128xf32> -> vector<80x128xf32>
    %15 = arith.addf %9, %14 : vector<80x128xf32>
    %c0_18 = arith.constant 0 : index
    %c10 = arith.constant 10 : index
    %c0_19 = arith.constant 0 : index
    %16 = vector.load %arg1[%c0_18, %c10, %c0_19] : memref<1x120x128xbf16, #tpu.memory_space<vmem>>, vector<1x80x128xbf16>
    %17 = vector.shape_cast %16 : vector<1x80x128xbf16> to vector<80x128xbf16>
    %c0_20 = arith.constant 0 : index
    %c2 = arith.constant 2 : index
    %c0_21 = arith.constant 0 : index
    %c0_22 = arith.constant 0 : index
    %18 = vector.load %arg2[%c0_20, %c2, %c0_21, %c0_22] : memref<4x4x128x128xbf16, #tpu.memory_space<vmem>>, vector<1x1x128x128xbf16>
    %19 = vector.shape_cast %18 : vector<1x1x128x128xbf16> to vector<128x128xbf16>
    %cst_23 = arith.constant dense<0.000000e+00> : vector<80x128xf32>
    %20 = tpu.matmul %17, %19, %cst_23 {dimension_numbers = #tpu.dot_dimension_numbers<[1], [0], [0], [1], [0, 0, 1, 1], [], []>} : vector<80x128xbf16>, vector<128x128xbf16>, vector<80x128xf32> -> vector<80x128xf32>
    %21 = arith.addf %15, %20 : vector<80x128xf32>
    %c0_24 = arith.constant 0 : index
    %c11 = arith.constant 11 : index
    %c0_25 = arith.constant 0 : index
    %22 = vector.load %arg1[%c0_24, %c11, %c0_25] : memref<1x120x128xbf16, #tpu.memory_space<vmem>>, vector<1x80x128xbf16>
    %23 = vector.shape_cast %22 : vector<1x80x128xbf16> to vector<80x128xbf16>
    %c0_26 = arith.constant 0 : index
    %c3 = arith.constant 3 : index
    %c0_27 = arith.constant 0 : index
    %c0_28 = arith.constant 0 : index
    %24 = vector.load %arg2[%c0_26, %c3, %c0_27, %c0_28] : memref<4x4x128x128xbf16, #tpu.memory_space<vmem>>, vector<1x1x128x128xbf16>
    %25 = vector.shape_cast %24 : vector<1x1x128x128xbf16> to vector<128x128xbf16>
    %cst_29 = arith.constant dense<0.000000e+00> : vector<80x128xf32>
    %26 = tpu.matmul %23, %25, %cst_29 {dimension_numbers = #tpu.dot_dimension_numbers<[1], [0], [0], [1], [0, 0, 1, 1], [], []>} : vector<80x128xbf16>, vector<128x128xbf16>, vector<80x128xf32> -> vector<80x128xf32>
    %27 = arith.addf %21, %26 : vector<80x128xf32>
    %c0_30 = arith.constant 0 : index
    %c0_31 = arith.constant 0 : index
    %c0_32 = arith.constant 0 : index
    %c0_33 = arith.constant 0 : index
    %28 = vector.load %arg4[%c0_30, %c0_31, %c0_32, %c0_33] : memref<1x4x80x128xf32, #tpu.memory_space<vmem>>, vector<1x1x80x128xf32>
    %29 = vector.shape_cast %28 : vector<1x1x80x128xf32> to vector<80x128xf32>
    %30 = vector.shape_cast %27 : vector<80x128xf32> to vector<1x1x80x128xf32>
    tpu.vector_store %arg4[%c0_30, %c0_31, %c0_32, %c0_33], %30 {strides = array<i32>} : memref<1x4x80x128xf32, #tpu.memory_space<vmem>>, vector<1x1x80x128xf32>,
    %31 = vector.broadcast %0 : vector<80x1xf32> to vector<80x128xf32>
    %32 = arith.mulf %27, %31 : vector<80x128xf32>
    %cst_34 = arith.constant dense<0.000000e+00> : vector<128xf32>
    %33 = vector.multi_reduction <add>, %32, %cst_34 [0] : vector<80x128xf32> to vector<128xf32>
    %34 = vector.shape_cast %33 : vector<128xf32> to vector<1x128xf32>
    %35 = arith.addf %1, %34 : vector<1x128xf32>
    %36 = arith.mulf %32, %27 : vector<80x128xf32>
    %cst_35 = arith.constant dense<0.000000e+00> : vector<128xf32>
    %37 = vector.multi_reduction <add>, %36, %cst_35 [0] : vector<80x128xf32> to vector<128xf32>
    %38 = vector.shape_cast %37 : vector<128xf32> to vector<1x128xf32>
    %39 = arith.addf %2, %38 : vector<1x128xf32>
    %cst_36 = arith.constant 0.000000e+00 : f32
    %40 = vector.broadcast %cst_36 : f32 to vector<80x128xf32>
    %c0_37 = arith.constant 0 : index
    %c1_38 = arith.constant 1 : index
    %c0_39 = arith.constant 0 : index
    %41 = vector.load %arg1[%c0_37, %c1_38, %c0_39] : memref<1x120x128xbf16, #tpu.memory_space<vmem>>, vector<1x80x128xbf16>
    %42 = vector.shape_cast %41 : vector<1x80x128xbf16> to vector<80x128xbf16>
    %c1_40 = arith.constant 1 : index
    %c0_41 = arith.constant 0 : index
    %c0_42 = arith.constant 0 : index
    %c0_43 = arith.constant 0 : index
    %43 = vector.load %arg2[%c1_40, %c0_41, %c0_42, %c0_43] : memref<4x4x128x128xbf16, #tpu.memory_space<vmem>>, vector<1x1x128x128xbf16>
    %44 = vector.shape_cast %43 : vector<1x1x128x128xbf16> to vector<128x128xbf16>
    %cst_44 = arith.constant dense<0.000000e+00> : vector<80x128xf32>
    %45 = tpu.matmul %42, %44, %cst_44 {dimension_numbers = #tpu.dot_dimension_numbers<[1], [0], [0], [1], [0, 0, 1, 1], [], []>} : vector<80x128xbf16>, vector<128x128xbf16>, vector<80x128xf32> -> vector<80x128xf32>
    %46 = arith.addf %40, %45 : vector<80x128xf32>
    %c0_45 = arith.constant 0 : index
    %c2_46 = arith.constant 2 : index
    %c0_47 = arith.constant 0 : index
    %47 = vector.load %arg1[%c0_45, %c2_46, %c0_47] : memref<1x120x128xbf16, #tpu.memory_space<vmem>>, vector<1x80x128xbf16>
    %48 = vector.shape_cast %47 : vector<1x80x128xbf16> to vector<80x128xbf16>
    %c1_48 = arith.constant 1 : index
    %c1_49 = arith.constant 1 : index
    %c0_50 = arith.constant 0 : index
    %c0_51 = arith.constant 0 : index
    %49 = vector.load %arg2[%c1_48, %c1_49, %c0_50, %c0_51] : memref<4x4x128x128xbf16, #tpu.memory_space<vmem>>, vector<1x1x128x128xbf16>
    %50 = vector.shape_cast %49 : vector<1x1x128x128xbf16> to vector<128x128xbf16>
    %cst_52 = arith.constant dense<0.000000e+00> : vector<80x128xf32>
    %51 = tpu.matmul %48, %50, %cst_52 {dimension_numbers = #tpu.dot_dimension_numbers<[1], [0], [0], [1], [0, 0, 1, 1], [], []>} : vector<80x128xbf16>, vector<128x128xbf16>, vector<80x128xf32> -> vector<80x128xf32>
    %52 = arith.addf %46, %51 : vector<80x128xf32>
    %c0_53 = arith.constant 0 : index
    %c11_54 = arith.constant 11 : index
    %c0_55 = arith.constant 0 : index
    %53 = vector.load %arg1[%c0_53, %c11_54, %c0_55] : memref<1x120x128xbf16, #tpu.memory_space<vmem>>, vector<1x80x128xbf16>
    %54 = vector.shape_cast %53 : vector<1x80x128xbf16> to vector<80x128xbf16>
    %c1_56 = arith.constant 1 : index
    %c2_57 = arith.constant 2 : index
    %c0_58 = arith.constant 0 : index
    %c0_59 = arith.constant 0 : index
    %55 = vector.load %arg2[%c1_56, %c2_57, %c0_58, %c0_59] : memref<4x4x128x128xbf16, #tpu.memory_space<vmem>>, vector<1x1x128x128xbf16>
    %56 = vector.shape_cast %55 : vector<1x1x128x128xbf16> to vector<128x128xbf16>
    %cst_60 = arith.constant dense<0.000000e+00> : vector<80x128xf32>
    %57 = tpu.matmul %54, %56, %cst_60 {dimension_numbers = #tpu.dot_dimension_numbers<[1], [0], [0], [1], [0, 0, 1, 1], [], []>} : vector<80x128xbf16>, vector<128x128xbf16>, vector<80x128xf32> -> vector<80x128xf32>
    %58 = arith.addf %52, %57 : vector<80x128xf32>
    %c0_61 = arith.constant 0 : index
    %c12 = arith.constant 12 : index
    %c0_62 = arith.constant 0 : index
    %59 = vector.load %arg1[%c0_61, %c12, %c0_62] : memref<1x120x128xbf16, #tpu.memory_space<vmem>>, vector<1x80x128xbf16>
    %60 = vector.shape_cast %59 : vector<1x80x128xbf16> to vector<80x128xbf16>
    %c1_63 = arith.constant 1 : index
    %c3_64 = arith.constant 3 : index
    %c0_65 = arith.constant 0 : index
    %c0_66 = arith.constant 0 : index
    %61 = vector.load %arg2[%c1_63, %c3_64, %c0_65, %c0_66] : memref<4x4x128x128xbf16, #tpu.memory_space<vmem>>, vector<1x1x128x128xbf16>
    %62 = vector.shape_cast %61 : vector<1x1x128x128xbf16> to vector<128x128xbf16>
    %cst_67 = arith.constant dense<0.000000e+00> : vector<80x128xf32>
    %63 = tpu.matmul %60, %62, %cst_67 {dimension_numbers = #tpu.dot_dimension_numbers<[1], [0], [0], [1], [0, 0, 1, 1], [], []>} : vector<80x128xbf16>, vector<128x128xbf16>, vector<80x128xf32> -> vector<80x128xf32>
    %64 = arith.addf %58, %63 : vector<80x128xf32>
    %c0_68 = arith.constant 0 : index
    %c1_69 = arith.constant 1 : index
    %c0_70 = arith.constant 0 : index
    %c0_71 = arith.constant 0 : index
    %65 = vector.load %arg4[%c0_68, %c1_69, %c0_70, %c0_71] : memref<1x4x80x128xf32, #tpu.memory_space<vmem>>, vector<1x1x80x128xf32>
    %66 = vector.shape_cast %65 : vector<1x1x80x128xf32> to vector<80x128xf32>
    %67 = vector.shape_cast %64 : vector<80x128xf32> to vector<1x1x80x128xf32>
    tpu.vector_store %arg4[%c0_68, %c1_69, %c0_70, %c0_71], %67 {strides = array<i32>} : memref<1x4x80x128xf32, #tpu.memory_space<vmem>>, vector<1x1x80x128xf32>,
    %68 = vector.broadcast %0 : vector<80x1xf32> to vector<80x128xf32>
    %69 = arith.mulf %64, %68 : vector<80x128xf32>
    %cst_72 = arith.constant dense<0.000000e+00> : vector<128xf32>
    %70 = vector.multi_reduction <add>, %69, %cst_72 [0] : vector<80x128xf32> to vector<128xf32>
    %71 = vector.shape_cast %70 : vector<128xf32> to vector<1x128xf32>
    %72 = arith.addf %35, %71 : vector<1x128xf32>
    %73 = arith.mulf %69, %64 : vector<80x128xf32>
    %cst_73 = arith.constant dense<0.000000e+00> : vector<128xf32>
    %74 = vector.multi_reduction <add>, %73, %cst_73 [0] : vector<80x128xf32> to vector<128xf32>
    %75 = vector.shape_cast %74 : vector<128xf32> to vector<1x128xf32>
    %76 = arith.addf %39, %75 : vector<1x128xf32>
    %cst_74 = arith.constant 0.000000e+00 : f32
    %77 = vector.broadcast %cst_74 : f32 to vector<80x128xf32>
    %c0_75 = arith.constant 0 : index
    %c10_76 = arith.constant 10 : index
    %c0_77 = arith.constant 0 : index
    %78 = vector.load %arg1[%c0_75, %c10_76, %c0_77] : memref<1x120x128xbf16, #tpu.memory_space<vmem>>, vector<1x80x128xbf16>
    %79 = vector.shape_cast %78 : vector<1x80x128xbf16> to vector<80x128xbf16>
    %c2_78 = arith.constant 2 : index
    %c0_79 = arith.constant 0 : index
    %c0_80 = arith.constant 0 : index
    %c0_81 = arith.constant 0 : index
    %80 = vector.load %arg2[%c2_78, %c0_79, %c0_80, %c0_81] : memref<4x4x128x128xbf16, #tpu.memory_space<vmem>>, vector<1x1x128x128xbf16>
    %81 = vector.shape_cast %80 : vector<1x1x128x128xbf16> to vector<128x128xbf16>
    %cst_82 = arith.constant dense<0.000000e+00> : vector<80x128xf32>
    %82 = tpu.matmul %79, %81, %cst_82 {dimension_numbers = #tpu.dot_dimension_numbers<[1], [0], [0], [1], [0, 0, 1, 1], [], []>} : vector<80x128xbf16>, vector<128x128xbf16>, vector<80x128xf32> -> vector<80x128xf32>
    %83 = arith.addf %77, %82 : vector<80x128xf32>
    %c0_83 = arith.constant 0 : index
    %c11_84 = arith.constant 11 : index
    %c0_85 = arith.constant 0 : index
    %84 = vector.load %arg1[%c0_83, %c11_84, %c0_85] : memref<1x120x128xbf16, #tpu.memory_space<vmem>>, vector<1x80x128xbf16>
    %85 = vector.shape_cast %84 : vector<1x80x128xbf16> to vector<80x128xbf16>
    %c2_86 = arith.constant 2 : index
    %c1_87 = arith.constant 1 : index
    %c0_88 = arith.constant 0 : index
    %c0_89 = arith.constant 0 : index
    %86 = vector.load %arg2[%c2_86, %c1_87, %c0_88, %c0_89] : memref<4x4x128x128xbf16, #tpu.memory_space<vmem>>, vector<1x1x128x128xbf16>
    %87 = vector.shape_cast %86 : vector<1x1x128x128xbf16> to vector<128x128xbf16>
    %cst_90 = arith.constant dense<0.000000e+00> : vector<80x128xf32>
    %88 = tpu.matmul %85, %87, %cst_90 {dimension_numbers = #tpu.dot_dimension_numbers<[1], [0], [0], [1], [0, 0, 1, 1], [], []>} : vector<80x128xbf16>, vector<128x128xbf16>, vector<80x128xf32> -> vector<80x128xf32>
    %89 = arith.addf %83, %88 : vector<80x128xf32>
    %c0_91 = arith.constant 0 : index
    %c20 = arith.constant 20 : index
    %c0_92 = arith.constant 0 : index
    %90 = vector.load %arg1[%c0_91, %c20, %c0_92] : memref<1x120x128xbf16, #tpu.memory_space<vmem>>, vector<1x80x128xbf16>
    %91 = vector.shape_cast %90 : vector<1x80x128xbf16> to vector<80x128xbf16>
    %c2_93 = arith.constant 2 : index
    %c2_94 = arith.constant 2 : index
    %c0_95 = arith.constant 0 : index
    %c0_96 = arith.constant 0 : index
    %92 = vector.load %arg2[%c2_93, %c2_94, %c0_95, %c0_96] : memref<4x4x128x128xbf16, #tpu.memory_space<vmem>>, vector<1x1x128x128xbf16>
    %93 = vector.shape_cast %92 : vector<1x1x128x128xbf16> to vector<128x128xbf16>
    %cst_97 = arith.constant dense<0.000000e+00> : vector<80x128xf32>
    %94 = tpu.matmul %91, %93, %cst_97 {dimension_numbers = #tpu.dot_dimension_numbers<[1], [0], [0], [1], [0, 0, 1, 1], [], []>} : vector<80x128xbf16>, vector<128x128xbf16>, vector<80x128xf32> -> vector<80x128xf32>
    %95 = arith.addf %89, %94 : vector<80x128xf32>
    %c0_98 = arith.constant 0 : index
    %c21 = arith.constant 21 : index
    %c0_99 = arith.constant 0 : index
    %96 = vector.load %arg1[%c0_98, %c21, %c0_99] : memref<1x120x128xbf16, #tpu.memory_space<vmem>>, vector<1x80x128xbf16>
    %97 = vector.shape_cast %96 : vector<1x80x128xbf16> to vector<80x128xbf16>
    %c2_100 = arith.constant 2 : index
    %c3_101 = arith.constant 3 : index
    %c0_102 = arith.constant 0 : index
    %c0_103 = arith.constant 0 : index
    %98 = vector.load %arg2[%c2_100, %c3_101, %c0_102, %c0_103] : memref<4x4x128x128xbf16, #tpu.memory_space<vmem>>, vector<1x1x128x128xbf16>
    %99 = vector.shape_cast %98 : vector<1x1x128x128xbf16> to vector<128x128xbf16>
    %cst_104 = arith.constant dense<0.000000e+00> : vector<80x128xf32>
    %100 = tpu.matmul %97, %99, %cst_104 {dimension_numbers = #tpu.dot_dimension_numbers<[1], [0], [0], [1], [0, 0, 1, 1], [], []>} : vector<80x128xbf16>, vector<128x128xbf16>, vector<80x128xf32> -> vector<80x128xf32>
    %101 = arith.addf %95, %100 : vector<80x128xf32>
    %c0_105 = arith.constant 0 : index
    %c2_106 = arith.constant 2 : index
    %c0_107 = arith.constant 0 : index
    %c0_108 = arith.constant 0 : index
    %102 = vector.load %arg4[%c0_105, %c2_106, %c0_107, %c0_108] : memref<1x4x80x128xf32, #tpu.memory_space<vmem>>, vector<1x1x80x128xf32>
    %103 = vector.shape_cast %102 : vector<1x1x80x128xf32> to vector<80x128xf32>
    %104 = vector.shape_cast %101 : vector<80x128xf32> to vector<1x1x80x128xf32>
    tpu.vector_store %arg4[%c0_105, %c2_106, %c0_107, %c0_108], %104 {strides = array<i32>} : memref<1x4x80x128xf32, #tpu.memory_space<vmem>>, vector<1x1x80x128xf32>,
    %105 = vector.broadcast %0 : vector<80x1xf32> to vector<80x128xf32>
    %106 = arith.mulf %101, %105 : vector<80x128xf32>
    %cst_109 = arith.constant dense<0.000000e+00> : vector<128xf32>
    %107 = vector.multi_reduction <add>, %106, %cst_109 [0] : vector<80x128xf32> to vector<128xf32>
    %108 = vector.shape_cast %107 : vector<128xf32> to vector<1x128xf32>
    %109 = arith.addf %72, %108 : vector<1x128xf32>
    %110 = arith.mulf %106, %101 : vector<80x128xf32>
    %cst_110 = arith.constant dense<0.000000e+00> : vector<128xf32>
    %111 = vector.multi_reduction <add>, %110, %cst_110 [0] : vector<80x128xf32> to vector<128xf32>
    %112 = vector.shape_cast %111 : vector<128xf32> to vector<1x128xf32>
    %113 = arith.addf %76, %112 : vector<1x128xf32>
    %cst_111 = arith.constant 0.000000e+00 : f32
    %114 = vector.broadcast %cst_111 : f32 to vector<80x128xf32>
    %c0_112 = arith.constant 0 : index
    %c11_113 = arith.constant 11 : index
    %c0_114 = arith.constant 0 : index
    %115 = vector.load %arg1[%c0_112, %c11_113, %c0_114] : memref<1x120x128xbf16, #tpu.memory_space<vmem>>, vector<1x80x128xbf16>
    %116 = vector.shape_cast %115 : vector<1x80x128xbf16> to vector<80x128xbf16>
    %c3_115 = arith.constant 3 : index
    %c0_116 = arith.constant 0 : index
    %c0_117 = arith.constant 0 : index
    %c0_118 = arith.constant 0 : index
    %117 = vector.load %arg2[%c3_115, %c0_116, %c0_117, %c0_118] : memref<4x4x128x128xbf16, #tpu.memory_space<vmem>>, vector<1x1x128x128xbf16>
    %118 = vector.shape_cast %117 : vector<1x1x128x128xbf16> to vector<128x128xbf16>
    %cst_119 = arith.constant dense<0.000000e+00> : vector<80x128xf32>
    %119 = tpu.matmul %116, %118, %cst_119 {dimension_numbers = #tpu.dot_dimension_numbers<[1], [0], [0], [1], [0, 0, 1, 1], [], []>} : vector<80x128xbf16>, vector<128x128xbf16>, vector<80x128xf32> -> vector<80x128xf32>
    %120 = arith.addf %114, %119 : vector<80x128xf32>
    %c0_120 = arith.constant 0 : index
    %c12_121 = arith.constant 12 : index
    %c0_122 = arith.constant 0 : index
    %121 = vector.load %arg1[%c0_120, %c12_121, %c0_122] : memref<1x120x128xbf16, #tpu.memory_space<vmem>>, vector<1x80x128xbf16>
    %122 = vector.shape_cast %121 : vector<1x80x128xbf16> to vector<80x128xbf16>
    %c3_123 = arith.constant 3 : index
    %c1_124 = arith.constant 1 : index
    %c0_125 = arith.constant 0 : index
    %c0_126 = arith.constant 0 : index
    %123 = vector.load %arg2[%c3_123, %c1_124, %c0_125, %c0_126] : memref<4x4x128x128xbf16, #tpu.memory_space<vmem>>, vector<1x1x128x128xbf16>
    %124 = vector.shape_cast %123 : vector<1x1x128x128xbf16> to vector<128x128xbf16>
    %cst_127 = arith.constant dense<0.000000e+00> : vector<80x128xf32>
    %125 = tpu.matmul %122, %124, %cst_127 {dimension_numbers = #tpu.dot_dimension_numbers<[1], [0], [0], [1], [0, 0, 1, 1], [], []>} : vector<80x128xbf16>, vector<128x128xbf16>, vector<80x128xf32> -> vector<80x128xf32>
    %126 = arith.addf %120, %125 : vector<80x128xf32>
    %c0_128 = arith.constant 0 : index
    %c21_129 = arith.constant 21 : index
    %c0_130 = arith.constant 0 : index
    %127 = vector.load %arg1[%c0_128, %c21_129, %c0_130] : memref<1x120x128xbf16, #tpu.memory_space<vmem>>, vector<1x80x128xbf16>
    %128 = vector.shape_cast %127 : vector<1x80x128xbf16> to vector<80x128xbf16>
    %c3_131 = arith.constant 3 : index
    %c2_132 = arith.constant 2 : index
    %c0_133 = arith.constant 0 : index
    %c0_134 = arith.constant 0 : index
    %129 = vector.load %arg2[%c3_131, %c2_132, %c0_133, %c0_134] : memref<4x4x128x128xbf16, #tpu.memory_space<vmem>>, vector<1x1x128x128xbf16>
    %130 = vector.shape_cast %129 : vector<1x1x128x128xbf16> to vector<128x128xbf16>
    %cst_135 = arith.constant dense<0.000000e+00> : vector<80x128xf32>
    %131 = tpu.matmul %128, %130, %cst_135 {dimension_numbers = #tpu.dot_dimension_numbers<[1], [0], [0], [1], [0, 0, 1, 1], [], []>} : vector<80x128xbf16>, vector<128x128xbf16>, vector<80x128xf32> -> vector<80x128xf32>
    %132 = arith.addf %126, %131 : vector<80x128xf32>
    %c0_136 = arith.constant 0 : index
    %c22 = arith.constant 22 : index
    %c0_137 = arith.constant 0 : index
    %133 = vector.load %arg1[%c0_136, %c22, %c0_137] : memref<1x120x128xbf16, #tpu.memory_space<vmem>>, vector<1x80x128xbf16>
    %134 = vector.shape_cast %133 : vector<1x80x128xbf16> to vector<80x128xbf16>
    %c3_138 = arith.constant 3 : index
    %c3_139 = arith.constant 3 : index
    %c0_140 = arith.constant 0 : index
    %c0_141 = arith.constant 0 : index
    %135 = vector.load %arg2[%c3_138, %c3_139, %c0_140, %c0_141] : memref<4x4x128x128xbf16, #tpu.memory_space<vmem>>, vector<1x1x128x128xbf16>
    %136 = vector.shape_cast %135 : vector<1x1x128x128xbf16> to vector<128x128xbf16>
    %cst_142 = arith.constant dense<0.000000e+00> : vector<80x128xf32>
    %137 = tpu.matmul %134, %136, %cst_142 {dimension_numbers = #tpu.dot_dimension_numbers<[1], [0], [0], [1], [0, 0, 1, 1], [], []>} : vector<80x128xbf16>, vector<128x128xbf16>, vector<80x128xf32> -> vector<80x128xf32>
    %138 = arith.addf %132, %137 : vector<80x128xf32>
    %c0_143 = arith.constant 0 : index
    %c3_144 = arith.constant 3 : index
    %c0_145 = arith.constant 0 : index
    %c0_146 = arith.constant 0 : index
    %139 = vector.load %arg4[%c0_143, %c3_144, %c0_145, %c0_146] : memref<1x4x80x128xf32, #tpu.memory_space<vmem>>, vector<1x1x80x128xf32>
    %140 = vector.shape_cast %139 : vector<1x1x80x128xf32> to vector<80x128xf32>
    %141 = vector.shape_cast %138 : vector<80x128xf32> to vector<1x1x80x128xf32>
    tpu.vector_store %arg4[%c0_143, %c3_144, %c0_145, %c0_146], %141 {strides = array<i32>} : memref<1x4x80x128xf32, #tpu.memory_space<vmem>>, vector<1x1x80x128xf32>,
    %142 = vector.broadcast %0 : vector<80x1xf32> to vector<80x128xf32>
    %143 = arith.mulf %138, %142 : vector<80x128xf32>
    %cst_147 = arith.constant dense<0.000000e+00> : vector<128xf32>
    %144 = vector.multi_reduction <add>, %143, %cst_147 [0] : vector<80x128xf32> to vector<128xf32>
    %145 = vector.shape_cast %144 : vector<128xf32> to vector<1x128xf32>
    %146 = arith.addf %109, %145 : vector<1x128xf32>
    %147 = arith.mulf %143, %138 : vector<80x128xf32>
    %cst_148 = arith.constant dense<0.000000e+00> : vector<128xf32>
    %148 = vector.multi_reduction <add>, %147, %cst_148 [0] : vector<80x128xf32> to vector<128xf32>
    %149 = vector.shape_cast %148 : vector<128xf32> to vector<1x128xf32>
    %150 = arith.addf %113, %149 : vector<1x128xf32>
    %151 = tpu.iota {dimensions = array<i32: 0>} : vector<2x128xi32>
    %c0_i32 = arith.constant 0 : i32
    %152 = vector.broadcast %c0_i32 : i32 to vector<2x128xi32>
    %153 = arith.cmpi eq, %151, %152 : vector<2x128xi32>
    %154 = vector.shape_cast %146 : vector<1x128xf32> to vector<1x128xf32>
    %155 = vector.broadcast %154 : vector<1x128xf32> to vector<2x128xf32>
    %156 = vector.shape_cast %150 : vector<1x128xf32> to vector<1x128xf32>
    %157 = vector.broadcast %156 : vector<1x128xf32> to vector<2x128xf32>
    %158 = arith.select %153, %155, %157 : vector<2x128xi1>, vector<2x128xf32>
    %c0_149 = arith.constant 0 : index
    %c0_150 = arith.constant 0 : index
    %c0_151 = arith.constant 0 : index
    %159 = vector.load %arg5[%c0_149, %c0_150, %c0_151] : memref<1x2x128xf32, #tpu.memory_space<vmem>>, vector<1x2x128xf32>
    %160 = vector.shape_cast %159 : vector<1x2x128xf32> to vector<2x128xf32>
    %161 = vector.shape_cast %158 : vector<2x128xf32> to vector<1x2x128xf32>
    tpu.vector_store %arg5[%c0_149, %c0_150, %c0_151], %161 {strides = array<i32>} : memref<1x2x128xf32, #tpu.memory_space<vmem>>, vector<1x2x128xf32>,
    return
  }
  func.func @transform_0(%arg0: i32) -> (i32, i32, i32) {
    %c0_i32 = arith.constant 0 : i32
    %c0_i32_0 = arith.constant 0 : i32
    %c0_i32_1 = arith.constant 0 : i32
    return %arg0, %c0_i32, %c0_i32_0 : i32, i32, i32
  }
  func.func @transform_1(%arg0: i32) -> (i32, i32, i32, i32) {
    %c0_i32 = arith.constant 0 : i32
    %c0_i32_0 = arith.constant 0 : i32
    %c0_i32_1 = arith.constant 0 : i32
    %c0_i32_2 = arith.constant 0 : i32
    %c0_i32_3 = arith.constant 0 : i32
    return %c0_i32, %c0_i32_0, %c0_i32_1, %c0_i32_2 : i32, i32, i32, i32
  }
  func.func @transform_2(%arg0: i32) -> (i32, i32) {
    %c0_i32 = arith.constant 0 : i32
    %c0_i32_0 = arith.constant 0 : i32
    %c0_i32_1 = arith.constant 0 : i32
    return %c0_i32, %c0_i32_0 : i32, i32
  }
  func.func @transform_3(%arg0: i32) -> (i32, i32, i32, i32) {
    %c0_i32 = arith.constant 0 : i32
    %c0_i32_0 = arith.constant 0 : i32
    %c0_i32_1 = arith.constant 0 : i32
    %c0_i32_2 = arith.constant 0 : i32
    return %arg0, %c0_i32, %c0_i32_0, %c0_i32_1 : i32, i32, i32, i32
  }
  func.func @transform_4(%arg0: i32) -> (i32, i32, i32) {
    %c0_i32 = arith.constant 0 : i32
    %c0_i32_0 = arith.constant 0 : i32
    %c0_i32_1 = arith.constant 0 : i32
    return %arg0, %c0_i32, %c0_i32_0 : i32, i32, i32
  }
}

module attributes {stable_mosaic.version = 11 : i64} {
  func.func @_bn_norm_kernel(%arg0: i32, %arg1: memref<640x128xf32, #tpu.memory_space<vmem>>, %arg2: memref<1x128xf32, #tpu.memory_space<vmem>>, %arg3: memref<1x128xf32, #tpu.memory_space<vmem>>, %arg4: memref<640x128xf32, #tpu.memory_space<vmem>>) attributes {dimension_semantics = [#tpu.dimension_semantics<parallel>], iteration_bounds = array<i64: 1>, scalar_prefetch = 0 : i64, scratch_operands = 0 : i64, tpu.core_type = #tpu.core_type<tc>, window_params = [{transform_indices = @transform_0, window_bounds = array<i64: 640, 128>}, {pipeline_mode = #tpu.pipeline_mode<synchronous>, transform_indices = @transform_1, window_bounds = array<i64: 1, 128>}, {pipeline_mode = #tpu.pipeline_mode<synchronous>, transform_indices = @transform_2, window_bounds = array<i64: 1, 128>}, {transform_indices = @transform_3, window_bounds = array<i64: 640, 128>}]} {
    %c0 = arith.constant 0 : index
    %c0_0 = arith.constant 0 : index
    %0 = vector.load %arg1[%c0, %c0_0] : memref<640x128xf32, #tpu.memory_space<vmem>>, vector<640x128xf32>
    %c0_1 = arith.constant 0 : index
    %c0_2 = arith.constant 0 : index
    %1 = vector.load %arg2[%c0_1, %c0_2] : memref<1x128xf32, #tpu.memory_space<vmem>>, vector<1x128xf32>
    %2 = vector.broadcast %1 : vector<1x128xf32> to vector<640x128xf32>
    %3 = arith.mulf %0, %2 : vector<640x128xf32>
    %c0_3 = arith.constant 0 : index
    %c0_4 = arith.constant 0 : index
    %4 = vector.load %arg3[%c0_3, %c0_4] : memref<1x128xf32, #tpu.memory_space<vmem>>, vector<1x128xf32>
    %5 = vector.broadcast %4 : vector<1x128xf32> to vector<640x128xf32>
    %6 = arith.addf %3, %5 : vector<640x128xf32>
    %c0_5 = arith.constant 0 : index
    %c0_6 = arith.constant 0 : index
    %7 = vector.load %arg4[%c0_5, %c0_6] : memref<640x128xf32, #tpu.memory_space<vmem>>, vector<640x128xf32>
    tpu.vector_store %arg4[%c0_5, %c0_6], %6 {strides = array<i32>} : memref<640x128xf32, #tpu.memory_space<vmem>>, vector<640x128xf32>,
    return
  }
  func.func @transform_0(%arg0: i32) -> (i32, i32) {
    %c0_i32 = arith.constant 0 : i32
    %c0_i32_0 = arith.constant 0 : i32
    return %arg0, %c0_i32 : i32, i32
  }
  func.func @transform_1(%arg0: i32) -> (i32, i32) {
    %c0_i32 = arith.constant 0 : i32
    %c0_i32_0 = arith.constant 0 : i32
    %c0_i32_1 = arith.constant 0 : i32
    return %c0_i32, %c0_i32_0 : i32, i32
  }
  func.func @transform_2(%arg0: i32) -> (i32, i32) {
    %c0_i32 = arith.constant 0 : i32
    %c0_i32_0 = arith.constant 0 : i32
    %c0_i32_1 = arith.constant 0 : i32
    return %c0_i32, %c0_i32_0 : i32, i32
  }
  func.func @transform_3(%arg0: i32) -> (i32, i32) {
    %c0_i32 = arith.constant 0 : i32
    %c0_i32_0 = arith.constant 0 : i32
    return %arg0, %c0_i32 : i32, i32
  }
}

</mosaic_0001>

<bundles_post_ra>
// kernel: unet_innermost_forward.5
= control target key start
LH: loop header
LB: loop body
LE: loop exit
PB: predicated region body
PF: predicated region fallthrough
CT: control target
= control target key end

     0   :  { %s1024_s0 = inlined_call_operand.vmem [shape: f32[640,128], index: 0, kind: input, shape index: {}]   ;;  %s1025_s1 = inlined_call_operand.vmem [shape: f32[1,128], index: 1, kind: input, shape index: {}]   ;;  %s1026_s2 = inlined_call_operand.vmem [shape: f32[1,128], index: 2, kind: input, shape index: {}]   ;;  %s1027_s3 = inlined_call_operand.vmem [shape: f32[640,128], index: 3, kind: output, shape index: {}]  }
   0x1   :  { %v14_v0 = vld [vmem:[%s1024_s0] sm:$0xff]  ;;  %v15_v4 = vld [vmem:[%s1024_s0 + $0x8] sm:$0xff]  ;;  %v16_v5 = vld [vmem:[%s1024_s0 + $0x10] sm:$0xff] }
   0x2   :  { %v380_v1 = vld [vmem:[%s1025_s1] ss:$0 sm:$0xff]  ;;  %v17_v6 = vld [vmem:[%s1024_s0 + $0x18] sm:$0xff]  ;;  %v19_v11 = vld [vmem:[%s1024_s0 + $0x28] sm:$0xff] }
   0x3   :  { %v385_v2 = vld [vmem:[%s1026_s2] ss:$0 sm:$0xff]  ;;  %v101_v3 = vmul.f32 %v380_v1, %v14_v0  ;;  %v102_v7 = vmul.f32 %v380_v1, %v15_v4  ;;  %v103_v8 = vmul.f32 %v380_v1, %v16_v5  ;;  %v104_v9 = vmul.f32 %v380_v1, %v17_v6  ;;  %v20_v12 = vld [vmem:[%s1024_s0 + $0x30] sm:$0xff]  ;;  %v21_v17 = vld [vmem:[%s1024_s0 + $0x38] sm:$0xff] }
   0x4   :  { %v18_v10 = vld [vmem:[%s1024_s0 + $0x20] sm:$0xff]  ;;  %v106_v15 = vmul.f32 %v380_v1, %v19_v11  ;;  %v107_v16 = vmul.f32 %v380_v1, %v20_v12  ;;  %v23_v19 = vld [vmem:[%s1024_s0 + $0x48] sm:$0xff]  ;;  %v108_v23 = vmul.f32 %v380_v1, %v21_v17  ;;  %v24_v24 = vld [vmem:[%s1024_s0 + $0x50] sm:$0xff] }
   0x5   :  { %v188_v13 = vadd.f32 %v385_v2, %v101_v3  ;;  %v105_v14 = vmul.f32 %v380_v1, %v18_v10  ;;  %v22_v18 = vld [vmem:[%s1024_s0 + $0x40] sm:$0xff]  ;;  %v189_v20 = vadd.f32 %v385_v2, %v102_v7  ;;  %v190_v21 = vadd.f32 %v385_v2, %v103_v8  ;;  %v25_v25 = vld [vmem:[%s1024_s0 + $0x58] sm:$0xff]  ;;  %v27_v31 = vld [vmem:[%s1024_s0 + $0x68] sm:$0xff] }
   0x6   :  { %v191_v22 = vadd.f32 %v385_v2, %v104_v9  ;;  %v26_v26 = vld [vmem:[%s1024_s0 + $0x60] sm:$0xff]  ;;  %v193_v28 = vadd.f32 %v385_v2, %v106_v15  ;;  %v194_v29 = vadd.f32 %v385_v2, %v107_v16  ;;  %v109_v30 = vmul.f32 %v380_v1, %v22_v18  ;;  %v28_v32 = vld [vmem:[%s1024_s0 + $0x70] sm:$0xff]  ;;  %v29_v33 = vld [vmem:[%s1024_s0 + $0x78] sm:$0xff] }
   0x7   :  { %268 = vst [vmem:[%s1027_s3] sm:$0xff] %v188_v13  ;;  %v192_v27 = vadd.f32 %v385_v2, %v105_v14  ;;  %269 = vst [vmem:[%s1027_s3 + $0x8] sm:$0xff] %v189_v20  ;;  %v195_v34 = vadd.f32 %v385_v2, %v108_v23  ;;  %v110_v35 = vmul.f32 %v380_v1, %v23_v19  ;;  %v30_v38 = vld [vmem:[%s1024_s0 + $0x80] sm:$0xff]  ;;  %v31_v43 = vld [vmem:[%s1024_s0 + $0x88] sm:$0xff] }
   0x8   :  { %270 = vst [vmem:[%s1027_s3 + $0x10] sm:$0xff] %v190_v21  ;;  %271 = vst [vmem:[%s1027_s3 + $0x18] sm:$0xff] %v191_v22  ;;  %v111_v36 = vmul.f32 %v380_v1, %v24_v24  ;;  %v112_v37 = vmul.f32 %v380_v1, %v25_v25  ;;  %v196_v39 = vadd.f32 %v385_v2, %v109_v30  ;;  %v32_v44 = vld [vmem:[%s1024_s0 + $0x90] sm:$0xff]  ;;  %v33_v45 = vld [vmem:[%s1024_s0 + $0x98] sm:$0xff] }
   0x9   :  { %272 = vst [vmem:[%s1027_s3 + $0x20] sm:$0xff] %v192_v27  ;;  %273 = vst [vmem:[%s1027_s3 + $0x28] sm:$0xff] %v193_v28  ;;  %v113_v40 = vmul.f32 %v380_v1, %v26_v26  ;;  %v114_v41 = vmul.f32 %v380_v1, %v27_v31  ;;  %v115_v42 = vmul.f32 %v380_v1, %v28_v32  ;;  %v34_v50 = vld [vmem:[%s1024_s0 + $0xa0] sm:$0xff]  ;;  %v35_v51 = vld [vmem:[%s1024_s0 + $0xa8] sm:$0xff] }
   0xa   :  { %274 = vst [vmem:[%s1027_s3 + $0x30] sm:$0xff] %v194_v29  ;;  %275 = vst [vmem:[%s1027_s3 + $0x38] sm:$0xff] %v195_v34  ;;  %v197_v46 = vadd.f32 %v385_v2, %v110_v35  ;;  %v198_v47 = vadd.f32 %v385_v2, %v111_v36  ;;  %v199_v48 = vadd.f32 %v385_v2, %v112_v37  ;;  %v36_v52 = vld [vmem:[%s1024_s0 + $0xb0] sm:$0xff]  ;;  %v37_v57 = vld [vmem:[%s1024_s0 + $0xb8] sm:$0xff] }
   0xb   :  { %v116_v49 = vmul.f32 %v380_v1, %v29_v33  ;;  %276 = vst [vmem:[%s1027_s3 + $0x40] sm:$0xff] %v196_v39  ;;  %v200_v53 = vadd.f32 %v385_v2, %v113_v40  ;;  %v201_v54 = vadd.f32 %v385_v2, %v114_v41  ;;  %v202_v55 = vadd.f32 %v385_v2, %v115_v42  ;;  %v38_v62 = vld [vmem:[%s1024_s0 + $0xc0] sm:$0xff]  ;;  %v39_v5 = vld [vmem:[%s1024_s0 + $0xc8] sm:$0xff]  ;;  %v40_v6 = vld [vmem:[%s1024_s0 + $0xd0] sm:$0xff] }
   0xc   :  { %v117_v56 = vmul.f32 %v380_v1, %v30_v38  ;;  %277 = vst [vmem:[%s1027_s3 + $0x48] sm:$0xff] %v197_v46  ;;  %278 = vst [vmem:[%s1027_s3 + $0x50] sm:$0xff] %v198_v47  ;;  %v118_v59 = vmul.f32 %v380_v1, %v31_v43  ;;  %v119_v60 = vmul.f32 %v380_v1, %v32_v44  ;;  %v41_v7 = vld [vmem:[%s1024_s0 + $0xd8] sm:$0xff]  ;;  %v42_v12 = vld [vmem:[%s1024_s0 + $0xe0] sm:$0xff] }
   0xd   :  { %279 = vst [vmem:[%s1027_s3 + $0x58] sm:$0xff] %v199_v48  ;;  %v203_v58 = vadd.f32 %v385_v2, %v116_v49  ;;  %v120_v61 = vmul.f32 %v380_v1, %v33_v45  ;;  %280 = vst [vmem:[%s1027_s3 + $0x60] sm:$0xff] %v200_v53  ;;  %v121_v0 = vmul.f32 %v380_v1, %v34_v50  ;;  %v43_v13 = vld [vmem:[%s1024_s0 + $0xe8] sm:$0xff]  ;;  %v44_v14 = vld [vmem:[%s1024_s0 + $0xf0] sm:$0xff] }
   0xe   :  { %281 = vst [vmem:[%s1027_s3 + $0x68] sm:$0xff] %v201_v54  ;;  %282 = vst [vmem:[%s1027_s3 + $0x70] sm:$0xff] %v202_v55  ;;  %v204_v63 = vadd.f32 %v385_v2, %v117_v56  ;;  %v122_v3 = vmul.f32 %v380_v1, %v35_v51  ;;  %v123_v4 = vmul.f32 %v380_v1, %v36_v52  ;;  %v45_v19 = vld [vmem:[%s1024_s0 + $0xf8] sm:$0xff]  ;;  %v46_v24 = vld [vmem:[%s1024_s0 + $0x100] sm:$0xff] }
   0xf   :  { %283 = vst [vmem:[%s1027_s3 + $0x78] sm:$0xff] %v203_v58  ;;  %v205_v8 = vadd.f32 %v385_v2, %v118_v59  ;;  %v206_v9 = vadd.f32 %v385_v2, %v119_v60  ;;  %v207_v10 = vadd.f32 %v385_v2, %v120_v61  ;;  %v124_v11 = vmul.f32 %v380_v1, %v37_v57  ;;  %v47_v29 = vld [vmem:[%s1024_s0 + $0x108] sm:$0xff]  ;;  %v48_v30 = vld [vmem:[%s1024_s0 + $0x110] sm:$0xff]  ;;  %v49_v31 = vld [vmem:[%s1024_s0 + $0x118] sm:$0xff] }
  0x10   :  { %284 = vst [vmem:[%s1027_s3 + $0x80] sm:$0xff] %v204_v63  ;;  %v208_v15 = vadd.f32 %v385_v2, %v121_v0  ;;  %v209_v16 = vadd.f32 %v385_v2, %v122_v3  ;;  %v210_v17 = vadd.f32 %v385_v2, %v123_v4  ;;  %v125_v18 = vmul.f32 %v380_v1, %v38_v62  ;;  %v50_v36 = vld [vmem:[%s1024_s0 + $0x120] sm:$0xff]  ;;  %v51_v37 = vld [vmem:[%s1024_s0 + $0x128] sm:$0xff]  ;;  %v52_v38 = vld [vmem:[%s1024_s0 + $0x130] sm:$0xff] }
  0x11   :  { %285 = vst [vmem:[%s1027_s3 + $0x88] sm:$0xff] %v205_v8  ;;  %286 = vst [vmem:[%s1027_s3 + $0x90] sm:$0xff] %v206_v9  ;;  %v211_v20 = vadd.f32 %v385_v2, %v124_v11  ;;  %v126_v21 = vmul.f32 %v380_v1, %v39_v5  ;;  %v127_v22 = vmul.f32 %v380_v1, %v40_v6  ;;  %v53_v43 = vld [vmem:[%s1024_s0 + $0x138] sm:$0xff]  ;;  %v54_v48 = vld [vmem:[%s1024_s0 + $0x140] sm:$0xff] }
  0x12   :  { %287 = vst [vmem:[%s1027_s3 + $0x98] sm:$0xff] %v207_v10  ;;  %v128_v23 = vmul.f32 %v380_v1, %v41_v7  ;;  %288 = vst [vmem:[%s1027_s3 + $0xa0] sm:$0xff] %v208_v15  ;;  %v212_v25 = vadd.f32 %v385_v2, %v125_v18  ;;  %v129_v26 = vmul.f32 %v380_v1, %v42_v12  ;;  %v55_v53 = vld [vmem:[%s1024_s0 + $0x148] sm:$0xff]  ;;  %v56_v54 = vld [vmem:[%s1024_s0 + $0x150] sm:$0xff] }
  0x13   :  { %289 = vst [vmem:[%s1027_s3 + $0xa8] sm:$0xff] %v209_v16  ;;  %290 = vst [vmem:[%s1027_s3 + $0xb0] sm:$0xff] %v210_v17  ;;  %v130_v27 = vmul.f32 %v380_v1, %v43_v13  ;;  %v131_v28 = vmul.f32 %v380_v1, %v44_v14  ;;  %v213_v32 = vadd.f32 %v385_v2, %v126_v21  ;;  %v57_v55 = vld [vmem:[%s1024_s0 + $0x158] sm:$0xff]  ;;  %v58_v60 = vld [vmem:[%s1024_s0 + $0x160] sm:$0xff] }
  0x14   :  { %291 = vst [vmem:[%s1027_s3 + $0xb8] sm:$0xff] %v211_v20  ;;  %v214_v33 = vadd.f32 %v385_v2, %v127_v22  ;;  %v215_v34 = vadd.f32 %v385_v2, %v128_v23  ;;  %v132_v35 = vmul.f32 %v380_v1, %v45_v19  ;;  %292 = vst [vmem:[%s1027_s3 + $0xc0] sm:$0xff] %v212_v25  ;;  %v59_v61 = vld [vmem:[%s1024_s0 + $0x168] sm:$0xff]  ;;  %v60_v62 = vld [vmem:[%s1024_s0 + $0x170] sm:$0xff] }
  0x15   :  { %v216_v39 = vadd.f32 %v385_v2, %v129_v26  ;;  %v217_v40 = vadd.f32 %v385_v2, %v130_v27  ;;  %v218_v41 = vadd.f32 %v385_v2, %v131_v28  ;;  %v133_v42 = vmul.f32 %v380_v1, %v46_v24  ;;  %293 = vst [vmem:[%s1027_s3 + $0xc8] sm:$0xff] %v213_v32  ;;  %v61_v5 = vld [vmem:[%s1024_s0 + $0x178] sm:$0xff]  ;;  %v62_v10 = vld [vmem:[%s1024_s0 + $0x180] sm:$0xff]  ;;  %v63_v15 = vld [vmem:[%s1024_s0 + $0x188] sm:$0xff] }
  0x16   :  { %294 = vst [vmem:[%s1027_s3 + $0xd0] sm:$0xff] %v214_v33  ;;  %295 = vst [vmem:[%s1027_s3 + $0xd8] sm:$0xff] %v215_v34  ;;  %v219_v44 = vadd.f32 %v385_v2, %v132_v35  ;;  %v134_v45 = vmul.f32 %v380_v1, %v47_v29  ;;  %v135_v46 = vmul.f32 %v380_v1, %v48_v30  ;;  %v64_v16 = vld [vmem:[%s1024_s0 + $0x190] sm:$0xff]  ;;  %v65_v17 = vld [vmem:[%s1024_s0 + $0x198] sm:$0xff] }
  0x17   :  { %v136_v47 = vmul.f32 %v380_v1, %v49_v31  ;;  %296 = vst [vmem:[%s1027_s3 + $0xe0] sm:$0xff] %v216_v39  ;;  %297 = vst [vmem:[%s1027_s3 + $0xe8] sm:$0xff] %v217_v40  ;;  %v220_v49 = vadd.f32 %v385_v2, %v133_v42  ;;  %v137_v50 = vmul.f32 %v380_v1, %v50_v36  ;;  %v66_v22 = vld [vmem:[%s1024_s0 + $0x1a0] sm:$0xff]  ;;  %v67_v23 = vld [vmem:[%s1024_s0 + $0x1a8] sm:$0xff] }
  0x18   :  { %298 = vst [vmem:[%s1027_s3 + $0xf0] sm:$0xff] %v218_v41  ;;  %v138_v51 = vmul.f32 %v380_v1, %v51_v37  ;;  %v139_v52 = vmul.f32 %v380_v1, %v52_v38  ;;  %299 = vst [vmem:[%s1027_s3 + $0xf8] sm:$0xff] %v219_v44  ;;  %v221_v56 = vadd.f32 %v385_v2, %v134_v45  ;;  %v68_v24 = vld [vmem:[%s1024_s0 + $0x1b0] sm:$0xff]  ;;  %v69_v29 = vld [vmem:[%s1024_s0 + $0x1b8] sm:$0xff] }
  0x19   :  { %v222_v57 = vadd.f32 %v385_v2, %v135_v46  ;;  %v223_v58 = vadd.f32 %v385_v2, %v136_v47  ;;  %v140_v59 = vmul.f32 %v380_v1, %v53_v43  ;;  %300 = vst [vmem:[%s1027_s3 + $0x100] sm:$0xff] %v220_v49  ;;  %v224_v63 = vadd.f32 %v385_v2, %v137_v50  ;;  %v70_v34 = vld [vmem:[%s1024_s0 + $0x1c0] sm:$0xff]  ;;  %v71_v39 = vld [vmem:[%s1024_s0 + $0x1c8] sm:$0xff]  ;;  %v72_v40 = vld [vmem:[%s1024_s0 + $0x1d0] sm:$0xff] }
  0x1a   :  { %v225_v0 = vadd.f32 %v385_v2, %v138_v51  ;;  %v226_v3 = vadd.f32 %v385_v2, %v139_v52  ;;  %v141_v4 = vmul.f32 %v380_v1, %v54_v48  ;;  %301 = vst [vmem:[%s1027_s3 + $0x108] sm:$0xff] %v221_v56  ;;  %v142_v7 = vmul.f32 %v380_v1, %v55_v53  ;;  %v73_v41 = vld [vmem:[%s1024_s0 + $0x1d8] sm:$0xff]  ;;  %v74_v46 = vld [vmem:[%s1024_s0 + $0x1e0] sm:$0xff]  ;;  %v75_v47 = vld [vmem:[%s1024_s0 + $0x1e8] sm:$0xff] }
  0x1b   :  { %302 = vst [vmem:[%s1027_s3 + $0x110] sm:$0xff] %v222_v57  ;;  %303 = vst [vmem:[%s1027_s3 + $0x118] sm:$0xff] %v223_v58  ;;  %v227_v6 = vadd.f32 %v385_v2, %v140_v59  ;;  %v143_v8 = vmul.f32 %v380_v1, %v56_v54  ;;  %v144_v9 = vmul.f32 %v380_v1, %v57_v55  ;;  %v76_v48 = vld [vmem:[%s1024_s0 + $0x1f0] sm:$0xff]  ;;  %v77_v53 = vld [vmem:[%s1024_s0 + $0x1f8] sm:$0xff] }
  0x1c   :  { %304 = vst [vmem:[%s1027_s3 + $0x120] sm:$0xff] %v224_v63  ;;  %305 = vst [vmem:[%s1027_s3 + $0x128] sm:$0xff] %v225_v0  ;;  %v228_v11 = vadd.f32 %v385_v2, %v141_v4  ;;  %v145_v12 = vmul.f32 %v380_v1, %v58_v60  ;;  %v146_v13 = vmul.f32 %v380_v1, %v59_v61  ;;  %v78_v58 = vld [vmem:[%s1024_s0 + $0x200] sm:$0xff]  ;;  %v79_v63 = vld [vmem:[%s1024_s0 + $0x208] sm:$0xff] }
  0x1d   :  { %306 = vst [vmem:[%s1027_s3 + $0x130] sm:$0xff] %v226_v3  ;;  %v147_v14 = vmul.f32 %v380_v1, %v60_v62  ;;  %307 = vst [vmem:[%s1027_s3 + $0x138] sm:$0xff] %v227_v6  ;;  %v229_v18 = vadd.f32 %v385_v2, %v142_v7  ;;  %v230_v19 = vadd.f32 %v385_v2, %v143_v8  ;;  %v80_v0 = vld [vmem:[%s1024_s0 + $0x210] sm:$0xff]  ;;  %v81_v3 = vld [vmem:[%s1024_s0 + $0x218] sm:$0xff] }
  0x1e   :  { %v231_v20 = vadd.f32 %v385_v2, %v144_v9  ;;  %v148_v21 = vmul.f32 %v380_v1, %v61_v5  ;;  %308 = vst [vmem:[%s1027_s3 + $0x140] sm:$0xff] %v228_v11  ;;  %v232_v25 = vadd.f32 %v385_v2, %v145_v12  ;;  %v233_v26 = vadd.f32 %v385_v2, %v146_v13  ;;  %v82_v8 = vld [vmem:[%s1024_s0 + $0x220] sm:$0xff]  ;;  %v83_v9 = vld [vmem:[%s1024_s0 + $0x228] sm:$0xff] }
  0x1f   :  { %v234_v27 = vadd.f32 %v385_v2, %v147_v14  ;;  %v149_v28 = vmul.f32 %v380_v1, %v62_v10  ;;  %309 = vst [vmem:[%s1027_s3 + $0x148] sm:$0xff] %v229_v18  ;;  %310 = vst [vmem:[%s1027_s3 + $0x150] sm:$0xff] %v230_v19  ;;  %v150_v31 = vmul.f32 %v380_v1, %v63_v15  ;;  %v84_v10 = vld [vmem:[%s1024_s0 + $0x230] sm:$0xff]  ;;  %v85_v15 = vld [vmem:[%s1024_s0 + $0x238] sm:$0xff] }
  0x20   :  { %311 = vst [vmem:[%s1027_s3 + $0x158] sm:$0xff] %v231_v20  ;;  %v235_v30 = vadd.f32 %v385_v2, %v148_v21  ;;  %v151_v32 = vmul.f32 %v380_v1, %v64_v16  ;;  %v152_v33 = vmul.f32 %v380_v1, %v65_v17  ;;  %312 = vst [vmem:[%s1027_s3 + $0x160] sm:$0xff] %v232_v25  ;;  %v86_v20 = vld [vmem:[%s1024_s0 + $0x240] sm:$0xff]  ;;  %v87_v25 = vld [vmem:[%s1024_s0 + $0x248] sm:$0xff] }
  0x21   :  { %313 = vst [vmem:[%s1027_s3 + $0x168] sm:$0xff] %v233_v26  ;;  %314 = vst [vmem:[%s1027_s3 + $0x170] sm:$0xff] %v234_v27  ;;  %v236_v35 = vadd.f32 %v385_v2, %v149_v28  ;;  %v153_v36 = vmul.f32 %v380_v1, %v66_v22  ;;  %v154_v37 = vmul.f32 %v380_v1, %v67_v23  ;;  %v88_v26 = vld [vmem:[%s1024_s0 + $0x250] sm:$0xff]  ;;  %v89_v27 = vld [vmem:[%s1024_s0 + $0x258] sm:$0xff] }
  0x22   :  { %v155_v38 = vmul.f32 %v380_v1, %v68_v24  ;;  %315 = vst [vmem:[%s1027_s3 + $0x178] sm:$0xff] %v235_v30  ;;  %v237_v42 = vadd.f32 %v385_v2, %v150_v31  ;;  %v238_v43 = vadd.f32 %v385_v2, %v151_v32  ;;  %v239_v44 = vadd.f32 %v385_v2, %v152_v33  ;;  %v90_v32 = vld [vmem:[%s1024_s0 + $0x260] sm:$0xff]  ;;  %v91_v33 = vld [vmem:[%s1024_s0 + $0x268] sm:$0xff] }
  0x23   :  { %v156_v45 = vmul.f32 %v380_v1, %v69_v29  ;;  %316 = vst [vmem:[%s1027_s3 + $0x180] sm:$0xff] %v236_v35  ;;  %v240_v49 = vadd.f32 %v385_v2, %v153_v36  ;;  %v241_v50 = vadd.f32 %v385_v2, %v154_v37  ;;  %v157_v52 = vmul.f32 %v380_v1, %v70_v34  ;;  %v92_v34 = vld [vmem:[%s1024_s0 + $0x270] sm:$0xff] }
  0x24   :  { %v242_v51 = vadd.f32 %v385_v2, %v155_v38  ;;  %317 = vst [vmem:[%s1027_s3 + $0x188] sm:$0xff] %v237_v42  ;;  %318 = vst [vmem:[%s1027_s3 + $0x190] sm:$0xff] %v238_v43  ;;  %v158_v55 = vmul.f32 %v380_v1, %v71_v39  ;;  %v159_v56 = vmul.f32 %v380_v1, %v72_v40  ;;  %v93_v39 = vld [vmem:[%s1024_s0 + $0x278] sm:$0xff] }
  0x25   :  { %319 = vst [vmem:[%s1027_s3 + $0x198] sm:$0xff] %v239_v44  ;;  %v243_v54 = vadd.f32 %v385_v2, %v156_v45  ;;  %v160_v57 = vmul.f32 %v380_v1, %v73_v41  ;;  %320 = vst [vmem:[%s1027_s3 + $0x1a0] sm:$0xff] %v240_v49  ;;  %v244_v59 = vadd.f32 %v385_v2, %v157_v52 }
  0x26   :  { %321 = vst [vmem:[%s1027_s3 + $0x1a8] sm:$0xff] %v241_v50  ;;  %322 = vst [vmem:[%s1027_s3 + $0x1b0] sm:$0xff] %v242_v51  ;;  %v161_v60 = vmul.f32 %v380_v1, %v74_v46  ;;  %v162_v61 = vmul.f32 %v380_v1, %v75_v47  ;;  %v163_v62 = vmul.f32 %v380_v1, %v76_v48 }
  0x27   :  { %323 = vst [vmem:[%s1027_s3 + $0x1b8] sm:$0xff] %v243_v54  ;;  %v245_v4 = vadd.f32 %v385_v2, %v158_v55  ;;  %v246_v5 = vadd.f32 %v385_v2, %v159_v56  ;;  %v247_v6 = vadd.f32 %v385_v2, %v160_v57  ;;  %v164_v7 = vmul.f32 %v380_v1, %v77_v53 }
  0x28   :  { %324 = vst [vmem:[%s1027_s3 + $0x1c0] sm:$0xff] %v244_v59  ;;  %v248_v11 = vadd.f32 %v385_v2, %v161_v60  ;;  %v249_v12 = vadd.f32 %v385_v2, %v162_v61  ;;  %v250_v13 = vadd.f32 %v385_v2, %v163_v62  ;;  %v165_v14 = vmul.f32 %v380_v1, %v78_v58 }
  0x29   :  { %325 = vst [vmem:[%s1027_s3 + $0x1c8] sm:$0xff] %v245_v4  ;;  %326 = vst [vmem:[%s1027_s3 + $0x1d0] sm:$0xff] %v246_v5  ;;  %v251_v16 = vadd.f32 %v385_v2, %v164_v7  ;;  %v166_v17 = vmul.f32 %v380_v1, %v79_v63  ;;  %v167_v18 = vmul.f32 %v380_v1, %v80_v0 }
  0x2a   :  { %327 = vst [vmem:[%s1027_s3 + $0x1d8] sm:$0xff] %v247_v6  ;;  %v168_v19 = vmul.f32 %v380_v1, %v81_v3  ;;  %328 = vst [vmem:[%s1027_s3 + $0x1e0] sm:$0xff] %v248_v11  ;;  %v252_v21 = vadd.f32 %v385_v2, %v165_v14  ;;  %v169_v22 = vmul.f32 %v380_v1, %v82_v8 }
  0x2b   :  { %329 = vst [vmem:[%s1027_s3 + $0x1e8] sm:$0xff] %v249_v12  ;;  %330 = vst [vmem:[%s1027_s3 + $0x1f0] sm:$0xff] %v250_v13  ;;  %v170_v23 = vmul.f32 %v380_v1, %v83_v9  ;;  %v171_v24 = vmul.f32 %v380_v1, %v84_v10  ;;  %v253_v28 = vadd.f32 %v385_v2, %v166_v17 }
  0x2c   :  { %331 = vst [vmem:[%s1027_s3 + $0x1f8] sm:$0xff] %v251_v16  ;;  %v254_v29 = vadd.f32 %v385_v2, %v167_v18  ;;  %v255_v30 = vadd.f32 %v385_v2, %v168_v19  ;;  %v172_v31 = vmul.f32 %v380_v1, %v85_v15  ;;  %332 = vst [vmem:[%s1027_s3 + $0x200] sm:$0xff] %v252_v21 }
  0x2d   :  { %v256_v35 = vadd.f32 %v385_v2, %v169_v22  ;;  %v257_v36 = vadd.f32 %v385_v2, %v170_v23  ;;  %v258_v37 = vadd.f32 %v385_v2, %v171_v24  ;;  %v173_v38 = vmul.f32 %v380_v1, %v86_v20  ;;  %333 = vst [vmem:[%s1027_s3 + $0x208] sm:$0xff] %v253_v28 }
  0x2e   :  { %334 = vst [vmem:[%s1027_s3 + $0x210] sm:$0xff] %v254_v29  ;;  %335 = vst [vmem:[%s1027_s3 + $0x218] sm:$0xff] %v255_v30  ;;  %v259_v40 = vadd.f32 %v385_v2, %v172_v31  ;;  %v174_v41 = vmul.f32 %v380_v1, %v87_v25  ;;  %v175_v42 = vmul.f32 %v380_v1, %v88_v26 }
  0x2f   :  { %v176_v43 = vmul.f32 %v380_v1, %v89_v27  ;;  %336 = vst [vmem:[%s1027_s3 + $0x220] sm:$0xff] %v256_v35  ;;  %337 = vst [vmem:[%s1027_s3 + $0x228] sm:$0xff] %v257_v36  ;;  %v260_v44 = vadd.f32 %v385_v2, %v173_v38  ;;  %v177_v45 = vmul.f32 %v380_v1, %v90_v32 }
  0x30   :  { %338 = vst [vmem:[%s1027_s3 + $0x230] sm:$0xff] %v258_v37  ;;  %v178_v46 = vmul.f32 %v380_v1, %v91_v33  ;;  %v179_v47 = vmul.f32 %v380_v1, %v92_v34  ;;  %339 = vst [vmem:[%s1027_s3 + $0x238] sm:$0xff] %v259_v40  ;;  %v261_v48 = vadd.f32 %v385_v2, %v174_v41 }
  0x31   :  { %v262_v49 = vadd.f32 %v385_v2, %v175_v42  ;;  %v263_v50 = vadd.f32 %v385_v2, %v176_v43  ;;  %v180_v51 = vmul.f32 %v380_v1, %v93_v39  ;;  %340 = vst [vmem:[%s1027_s3 + $0x240] sm:$0xff] %v260_v44  ;;  %v264_v52 = vadd.f32 %v385_v2, %v177_v45 }
  0x32   :  { %v265_v53 = vadd.f32 %v385_v2, %v178_v46  ;;  %v266_v54 = vadd.f32 %v385_v2, %v179_v47  ;;  %341 = vst [vmem:[%s1027_s3 + $0x248] sm:$0xff] %v261_v48 }
  0x33   :  { %342 = vst [vmem:[%s1027_s3 + $0x250] sm:$0xff] %v262_v49  ;;  %343 = vst [vmem:[%s1027_s3 + $0x258] sm:$0xff] %v263_v50  ;;  %v267_v1 = vadd.f32 %v385_v2, %v180_v51 }
  0x34   :  { %344 = vst [vmem:[%s1027_s3 + $0x260] sm:$0xff] %v264_v52  ;;  %345 = vst [vmem:[%s1027_s3 + $0x268] sm:$0xff] %v265_v53 }
  0x35   :  { %346 = vst [vmem:[%s1027_s3 + $0x270] sm:$0xff] %v266_v54  ;;  %347 = vst [vmem:[%s1027_s3 + $0x278] sm:$0xff] %v267_v1 }

// kernel: unet_innermost_forward.3
= control target key start
LH: loop header
LB: loop body
LE: loop exit
PB: predicated region body
PF: predicated region fallthrough
CT: control target
= control target key end

     0   :  { %s1175_s9 = smov 0   ;;  %s1366_s0 = inlined_call_operand.vmem [shape: bf16[2,90,16], index: 0, kind: input, shape index: {}]   ;;  %s1367_s1 = inlined_call_operand.vmem [shape: bf16[4,16,128], index: 1, kind: input, shape index: {}]   ;;  %s1368_s2 = inlined_call_operand.vmem [shape: bf16[2,72,128], index: 2, kind: output, shape index: {}]  }
   0x1 LB: > { %s881_s10 = sadd.s32 4294967295, %s1156_s9   ;;  %p885_p0 = scmp.ge.s32.totalorder %s1156_s9, 1  ;;  %s1156_s9 = sphi %s1175_s9, %s12_s9  }
   0x2   : > { %p112_p1 = scmp.lt.s32.totalorder %s1156_s9, 3 }
   0x4   : > { %p113_p2 = pnand %p885_p0, %p112_p1 }
   0x5   : > { %v1146_v0 = vld [vmem:[%s1367_s1 + $0x8] sm:$0xff] (!%p113_p2)   ;;  %v1158_v1 = vmov (!%p113_p2), 0.0   ;;  %v1147_v2 = vld [vmem:[%s1367_s1 + $0x10] sm:$0xff] (!%p113_p2)   ;;  %vm1159_vm0 = vmmov (!%p113_p2), 0   ;;  %p134_p3 = scmp.lt.s32.totalorder (!%p113_p2), %s881_s10, 1  ;;  %vm262_vm6 = vcmask (!%p113_p2), 130048  }
   0x6   : > { %116 = sbr.rel (%p113_p2) target bundleno = 327 (0x147), region = 28  ;;  %997 = vmatprep.subr.bf16.mxu1 (!%p113_p2), %v1158_v1  ;;  %1041 = vmatprep.subr.bf16.mxu0 (!%p113_p2), %v1158_v1  ;;  %vm216_vm5 = vsmask.f32 (!%p113_p2), 7424  ;;  %v1148_v35 = vld [vmem:[%s1367_s1] sm:$0xff] (!%p113_p2)   ;;  %v1149_v62 = vld [vmem:[%s1367_s1 + $0x18] sm:$0xff] (!%p113_p2)  }
   0x7   : > { %998 = vmatpush3.bf16.msra.mxu1 (!%p113_p2), %v1146_v0  ;;  %999 = vmatprep.mubr.msk.bf16.mxu1 (!%p113_p2), %vm1159_vm0, %v1158_v1 }
   0x8   : > { %1042 = vmatpush3.bf16.msra.mxu0 (!%p113_p2), %v1147_v2  ;;  %1019 = vmatprep.subr.bf16.mxu1 (!%p113_p2), %v1158_v1 }
   0x9   : > { %1043 = vmatprep.mubr.msk.bf16.mxu0 (!%p113_p2), %vm1159_vm0, %v1158_v1  ;;  %1063 = vmatprep.subr.bf16.mxu0 (!%p113_p2), %v1158_v1 }
   0xd   : > { %s1370_s10 = smov (!%p134_p3, %s881_s10), 1 }
   0xe   : > { %s1134_s15 = smul.u32 48, %s1370_s10 }
   0xf   : > { %s1135_s23 = smul.u32 36, %s1370_s10 }
  0x10   : > { %s1203_s18 = scalar_lea.vmem %s1366_s0, %s1134_s15 }
  0x11   : > { %v146_v3 = vld [vmem:[%s1203_s18] sm:$0xf]  ;;  %v147_v4 = vld [vmem:[%s1203_s18 + $0x4] sm:$0xf]  ;;  %v148_v5 = vld [vmem:[%s1203_s18 + $0x8] sm:$0xf]  ;;  %s1356_s26 = scalar_lea.vmem %s1368_s2, %s1135_s23 }
  0x12   : > { %v149_v6 = vld [vmem:[%s1203_s18 + $0xc] sm:$0xf]  ;;  %vm155_vm1 = vcmp.ge.bf16.partialorder %v146_v3, 0  ;;  %vm156_vm2 = vcmp.ge.bf16.partialorder %v147_v4, 0  ;;  %vm157_vm3 = vcmp.ge.bf16.partialorder %v148_v5, 0 }
  0x13   : > { %vm158_vm4 = vcmp.ge.bf16.partialorder %v149_v6, 0  ;;  %v164_v7 = vmul.bf16 1045249613, %v146_v3  ;;  %v165_v8 = vmul.bf16 1045249613, %v147_v4 }
  0x14   : > { %v166_v9 = vmul.bf16 1045249613, %v148_v5  ;;  %v167_v10 = vmul.bf16 1045249613, %v149_v6  ;;  %v440_v11 = vld [vmem:[%s1203_s18 + $0x4] sm:$0xf] }
  0x15   : > { %v173_v12 = vsel %vm155_vm1, %v146_v3, %v164_v7  ;;  %v174_v13 = vsel %vm156_vm2, %v147_v4, %v165_v8  ;;  %v441_v14 = vld [vmem:[%s1203_s18 + $0x8] sm:$0xf]  ;;  %v442_v15 = vld [vmem:[%s1203_s18 + $0xc] sm:$0xf]  ;;  %v443_v16 = vld [vmem:[%s1203_s18 + $0x10] sm:$0xf] }
  0x16   : > { %v175_v17 = vsel %vm157_vm3, %v148_v5, %v166_v9  ;;  %v176_v18 = vsel %vm158_vm4, %v149_v6, %v167_v10  ;;  %v1213_v19 = vcombine.low %v173_v12, %v174_v13  ;;  %vm450_vm7 = vcmp.ge.bf16.partialorder %v440_v11, 0  ;;  %v150_v20 = vld [vmem:[%s1203_s18 + $0x10] sm:$0xf]  ;;  %v151_v22 = vld [vmem:[%s1203_s18 + $0x14] sm:$0xf] }
  0x17   : > { %v1216_v21 = vcombine.low %v175_v17, %v176_v18  ;;  %vm451_vm8 = vcmp.ge.bf16.partialorder %v441_v14, 0  ;;  %vm452_vm9 = vcmp.ge.bf16.partialorder %v442_v15, 0  ;;  %vm453_vm10 = vcmp.ge.bf16.partialorder %v443_v16, 0  ;;  %v444_v33 = vld [vmem:[%s1203_s18 + $0x14] sm:$0xf] }
  0x18   : > { %v218_v23 = vshrl.u32 %v1213_v19, 16  ;;  %v220_v24 = vshll.u32 %v1213_v19, 16  ;;  %v460_v25 = vmul.bf16 1045249613, %v440_v11  ;;  %v461_v26 = vmul.bf16 1045249613, %v441_v14 }
  0x19   : > { %v225_v27 = vshll.u32 %v1216_v21, 16  ;;  %v462_v28 = vmul.bf16 1045249613, %v442_v15  ;;  %v463_v29 = vmul.bf16 1045249613, %v443_v16  ;;  %vm159_vm11 = vcmp.ge.bf16.partialorder %v150_v20, 0 }
  0x1a   : > { %v222_v30 = vrot.slane %v220_v24, 1  ;;  %v470_v31 = vsel %vm450_vm7, %v440_v11, %v460_v25  ;;  %v1223_v32 = vsel %vm451_vm8, %v441_v14, %v461_v26  ;;  %vm160_vm12 = vcmp.ge.bf16.partialorder %v151_v22, 0  ;;  %v445_v43 = vld [vmem:[%s1203_s18 + $0x18] sm:$0xf]  ;;  %v153_v52 = vld [vmem:[%s1203_s18 + $0x1c] sm:$0xf] }
  0x1b   : > { %v227_v34 = vrot.slane %v225_v27, 1  ;;  %v472_v36 = vsel %vm452_vm9, %v442_v15, %v462_v28  ;;  %v473_v37 = vsel %vm453_vm10, %v443_v16, %v463_v29  ;;  %v910_v38 = vcombine.low %v470_v31, %v1223_v32  ;;  %v152_v51 = vld [vmem:[%s1203_s18 + $0x18] sm:$0xf]  ;;  %v446_v56 = vld [vmem:[%s1203_s18 + $0x1c] sm:$0xf] }
  0x1c   : > { %v223_v39 = vor.u32 %v222_v30, %v218_v23  ;;  %v1232_v40 = vcombine.low %v472_v36, %v473_v37  ;;  %v168_v41 = vmul.bf16 1045249613, %v150_v20  ;;  %v169_v42 = vmul.bf16 1045249613, %v151_v22  ;;  %v447_v0 = vld [vmem:[%s1203_s18 + $0x20] sm:$0xf] }
  0x1d   : > { %v509_v44 = vshrl.u32 %v910_v38, 16  ;;  %v511_v45 = vshll.u32 %v910_v38, 16  ;;  %v229_v46 = vshrl.u32 %v1216_v21, 16  ;;  %vm454_vm13 = vcmp.ge.bf16.partialorder %v444_v33, 0  ;;  %v154_v12 = vld [vmem:[%s1203_s18 + $0x20] sm:$0xf] }
  0x1e   : > { %v228_v47 = vsel %vm216_vm5, %v223_v39, %v227_v34  ;;  %v516_v48 = vshll.u32 %v1232_v40, 16  ;;  %v177_v49 = vsel %vm159_vm11, %v150_v20, %v168_v41  ;;  %v178_v50 = vsel %vm160_vm12, %v151_v22, %v169_v42  ;;  %v184_v17 = vld [vmem:[%s1203_s18 + $0x24] sm:$0x1]  ;;  %v449_v30 = vld [vmem:[%s1203_s18 + $0x28] sm:$0x1] }
  0x1f   : > { %1000 = vmatmul.mubr.msk.bf16.vlgmr.msra.gmra.mrb[0].mxu1 %vm262_vm6, %v228_v47  ;;  %v513_v53 = vrot.slane %v511_v45, 1  ;;  %v1243_v54 = vcombine.low %v177_v49, %v178_v50  ;;  %v231_v55 = vor.u32 %v229_v46, %v227_v34  ;;  %vm455_vm14 = vcmp.ge.bf16.partialorder %v445_v43, 0  ;;  %v448_v26 = vld [vmem:[%s1203_s18 + $0x24] sm:$0xf] }
  0x20   : > { %1020 = vmatpush3.bf16.msra.mxu1 %v1148_v35  ;;  %v518_v57 = vrot.slane %v516_v48, 1  ;;  %1003 = vmatprep.mubr.msk.bf16.mxu1 %vm1159_vm0, %v1158_v1  ;;  %v464_v58 = vmul.bf16 1045249613, %v444_v33  ;;  %v465_v59 = vmul.bf16 1045249613, %v445_v43  ;;  %v520_v60 = vshrl.u32 %v1232_v40, 16 }
  0x21   : > { %v514_v61 = vor.u32 %v513_v53, %v509_v44  ;;  %v233_v63 = vshll.u32 %v1243_v54, 16  ;;  %vm161_vm15 = vcmp.ge.bf16.partialorder %v152_v51, 0  ;;  %vm162_vm1 = vcmp.ge.bf16.partialorder %v153_v52, 0 }
  0x22   : > { %v474_v2 = vsel %vm454_vm13, %v444_v33, %v464_v58  ;;  %v475_v3 = vsel %vm455_vm14, %v445_v43, %v465_v59  ;;  %v522_v4 = vor.u32 %v520_v60, %v518_v57  ;;  %v170_v5 = vmul.bf16 1045249613, %v152_v51 }
  0x23   : > { %v519_v6 = vsel %vm216_vm5, %v514_v61, %v518_v57  ;;  %v235_v7 = vrot.slane %v233_v63, 1  ;;  %v1256_v8 = vcombine.low %v474_v2, %v475_v3  ;;  %v171_v9 = vmul.bf16 1045249613, %v153_v52  ;;  %v649_v61 = vld [vmem:[%s1203_s18 + $0x4] sm:$0xe] }
  0x24   : > { %1044 = vmatmul.mubr.msk.bf16.vlgmr.msra.gmra.mrb[0].mxu0 %vm262_vm6, %v519_v6  ;;  %v179_v10 = vsel %vm161_vm15, %v152_v51, %v170_v5  ;;  %v237_v11 = vshrl.u32 %v1243_v54, 16  ;;  %vm456_vm2 = vcmp.ge.bf16.partialorder %v446_v56, 0  ;;  %vm457_vm3 = vcmp.ge.bf16.partialorder %v447_v0, 0 }
  0x25   : > { %1064 = vmatpush3.bf16.msra.mxu0 %v1149_v62  ;;  %1047 = vmatprep.mubr.msk.bf16.mxu0 %vm1159_vm0, %v1158_v1  ;;  %v236_v13 = vsel %vm216_vm5, %v231_v55, %v235_v7  ;;  %v524_v14 = vshll.u32 %v1256_v8, 16  ;;  %v180_v15 = vsel %vm162_vm1, %v153_v52, %v171_v9  ;;  %v466_v16 = vmul.bf16 1045249613, %v446_v56 }
  0x26   : > { %v1267_v18 = vcombine.low %v179_v10, %v180_v15  ;;  %v239_v20 = vor.u32 %v237_v11, %v235_v7  ;;  %v467_v22 = vmul.bf16 1045249613, %v447_v0  ;;  %vm163_vm4 = vcmp.ge.bf16.partialorder %v154_v12, 0 }
  0x27   : > { %1004 = vmatmul.mubr.msk.bf16.gmra.mrb[4].mxu1 %vm262_vm6, %v236_v13  ;;  %v526_v23 = vrot.slane %v524_v14, 1  ;;  %v476_v24 = vsel %vm456_vm2, %v446_v56, %v466_v16  ;;  %v172_v25 = vmul.bf16 1045249613, %v154_v12  ;;  %vm185_vm7 = vcmp.ge.bf16.partialorder %v184_v17, 0 }
  0x28   : > { %1007 = vmatprep.mubr.msk.bf16.mxu1 %vm1159_vm0, %v1158_v1  ;;  %v241_v27 = vshll.u32 %v1267_v18, 16  ;;  %v477_v28 = vsel %vm457_vm3, %v447_v0, %v467_v22  ;;  %v186_v29 = vmul.bf16 1045249613, %v184_v17  ;;  %v528_v34 = vshrl.u32 %v1256_v8, 16 }
  0x29   : > { %v527_v31 = vsel %vm216_vm5, %v522_v4, %v526_v23  ;;  %v1277_v33 = vcombine.low %v476_v24, %v477_v28  ;;  %v1280_v35 = vsel %vm163_vm4, %v154_v12, %v172_v25  ;;  %vm458_vm8 = vcmp.ge.bf16.partialorder %v448_v26, 0 }
  0x2a   : > { %v243_v36 = vrot.slane %v241_v27, 1  ;;  %v187_v37 = vsel %vm185_vm7, %v184_v17, %v186_v29  ;;  %vm459_vm9 = vcmp.ge.bf16.partialorder %v449_v30, 0  ;;  %v468_v41 = vmul.bf16 1045249613, %v448_v26 }
  0x2b   : > { %v532_v38 = vshll.u32 %v1277_v33, 16  ;;  %v894_v39 = vcombine.low %v1280_v35, %v187_v37  ;;  %v245_v43 = vshrl.u32 %v1267_v18, 16  ;;  %v469_v44 = vmul.bf16 1045249613, %v449_v30 }
  0x2c   : > { %1048 = vmatmul.mubr.msk.bf16.gmra.mrb[4].mxu0 %vm262_vm6, %v527_v31  ;;  %v244_v42 = vsel %vm216_vm5, %v239_v20, %v243_v36  ;;  %v530_v45 = vor.u32 %v528_v34, %v526_v23  ;;  %v478_v48 = vsel %vm458_vm8, %v448_v26, %v468_v41  ;;  %v536_v55 = vshrl.u32 %v1277_v33, 16 }
  0x2d   : > { %1051 = vmatprep.mubr.msk.bf16.mxu0 %vm1159_vm0, %v1158_v1  ;;  %v534_v46 = vrot.slane %v532_v38, 1  ;;  %v249_v47 = vshll.u32 %v894_v39, 16  ;;  %v479_v49 = vsel %vm459_vm9, %v449_v30, %v469_v44  ;;  %v247_v51 = vor.u32 %v245_v43, %v243_v36 }
  0x2e   : > { %v914_v50 = vcombine.low %v478_v48, %v479_v49  ;;  %v253_v60 = vshrl.u32 %v894_v39, 16  ;;  %v651_v63 = vmul.bf16 1045249613, %v649_v61  ;;  %vm650_vm10 = vcmp.ge.bf16.partialorder %v649_v61, 0 }
  0x2f   : > { %1008 = vmatmul.mubr.msk.bf16.gmra.mrb[8].mxu1 %vm262_vm6, %v244_v42  ;;  %v251_v52 = vrot.slane %v249_v47, 1  ;;  %v535_v53 = vsel %vm216_vm5, %v530_v45, %v534_v46  ;;  %v538_v58 = vor.u32 %v536_v55, %v534_v46  ;;  %v661_v7 = vrot.slane %v1232_v40, 1 }
  0x30   : > { %1011 = vmatprep.mubr.msk.bf16.mxu1 %vm1159_vm0, %v1158_v1  ;;  %v540_v56 = vshll.u32 %v914_v50, 16  ;;  %v544_v2 = vshrl.u32 %v914_v50, 16  ;;  %v652_v3 = vsel %vm650_vm10, %v649_v61, %v651_v63  ;;  %v665_v40 = vrot.slane %v1277_v33, 1 }
  0x31   : > { %v252_v57 = vsel %vm216_vm5, %v247_v51, %v251_v52  ;;  %v255_v0 = vor.u32 %v253_v60, %v251_v52  ;;  %v923_v5 = vcombine.low %v652_v3, %v1223_v32  ;;  %v663_v32 = vrot.slane %v1256_v8, 1 }
  0x32   : > { %v542_v59 = vrot.slane %v540_v56, 1  ;;  %v667_v8 = vrot.slane %v914_v50, 1  ;;  %v901_v10 = vcombine.low %v1280_v35, %v1280_v35 }
  0x33   : > { %v660_v6 = vrot.slane %v923_v5, 1 }
  0x34   : > { %1052 = vmatmul.mubr.msk.bf16.gmra.mrb[8].mxu0 %vm262_vm6, %v535_v53  ;;  %v543_v62 = vsel %vm216_vm5, %v538_v58, %v542_v59  ;;  %v546_v4 = vor.u32 %v544_v2, %v542_v59  ;;  %vm659_vm5 = vcmask 1046528  }
  0x35   : > { %1055 = vmatprep.mubr.msk.bf16.mxu0 %vm1159_vm0, %v1158_v1  ;;  %v662_v9 = vsel %vm659_vm5, %v660_v6, %v661_v7 }
  0x37   : > { %1012 = vmatmul.mubr.msk.bf16.gmra.mrb[12].mxu1 %vm262_vm6, %v252_v57 }
  0x38   : > { %1015 = vmatprep.mubr.msk.bf16.mxu1 %vm1159_vm0, %v1158_v1 }
  0x3c   : > { %1056 = vmatmul.mubr.msk.bf16.gmra.mrb[12].mxu0 %vm262_vm6, %v543_v62 }
  0x3d   : > { %1059 = vmatprep.mubr.msk.bf16.mxu0 %vm1159_vm0, %v1158_v1 }
  0x3f   : > { %1016 = vmatmul.mubr.msk.bf16.gmra.mrb[16].mxu1 %vm262_vm6, %v255_v0 }
  0x40   : > { %1021 = vmatprep.mubr.msk.bf16.mxu1 %vm1159_vm0, %v1158_v1 }
  0x44   : > { %1060 = vmatmul.mubr.msk.bf16.gmra.mrb[16].mxu0 %vm262_vm6, %v546_v4 }
  0x45   : > { %1065 = vmatprep.mubr.msk.bf16.mxu0 %vm1159_vm0, %v1158_v1 }
  0x47   : > { %1022 = vmatmul.mubr.msk.bf16.vlgmr.msra.gmra.mrb[0].mxu1 %vm262_vm6, %v1213_v19  ;;  %v664_v19 = vsel %vm659_vm5, %v661_v7, %v663_v32 }
  0x48   : > { %1025 = vmatprep.mubr.msk.bf16.mxu1 %vm1159_vm0, %v1158_v1 }
  0x4c   : > { %1066 = vmatmul.mubr.msk.bf16.vlgmr.msra.gmra.mrb[0].mxu0 %vm262_vm6, %v662_v9 }
  0x4d   : > { %1069 = vmatprep.mubr.msk.bf16.mxu0 %vm1159_vm0, %v1158_v1 }
  0x4f   : > { %1026 = vmatmul.mubr.msk.bf16.gmra.mrb[4].mxu1 %vm262_vm6, %v1216_v21  ;;  %v666_v21 = vsel %vm659_vm5, %v663_v32, %v665_v40 }
  0x50   : > { %1029 = vmatprep.mubr.msk.bf16.mxu1 %vm1159_vm0, %v1158_v1 }
  0x54   : > { %1070 = vmatmul.mubr.msk.bf16.gmra.mrb[4].mxu0 %vm262_vm6, %v664_v19 }
  0x55   : > { %1073 = vmatprep.mubr.msk.bf16.mxu0 %vm1159_vm0, %v1158_v1 }
  0x57   : > { %1030 = vmatmul.mubr.msk.bf16.gmra.mrb[8].mxu1 %vm262_vm6, %v1243_v54  ;;  %v668_v54 = vsel %vm659_vm5, %v665_v40, %v667_v8 }
  0x58   : > { %1033 = vmatprep.mubr.msk.bf16.mxu1 %vm1159_vm0, %v1158_v1 }
  0x5c   : > { %1074 = vmatmul.mubr.msk.bf16.gmra.mrb[8].mxu0 %vm262_vm6, %v666_v21 }
  0x5d   : > { %1077 = vmatprep.mubr.msk.bf16.mxu0 %vm1159_vm0, %v1158_v1 }
  0x5f   : > { %1034 = vmatmul.mubr.msk.bf16.gmra.mrb[12].mxu1 %vm262_vm6, %v1267_v18 }
  0x60   : > { %1037 = vmatprep.mubr.msk.bf16.mxu1 %vm1159_vm0, %v1158_v1 }
  0x64   : > { %1078 = vmatmul.mubr.msk.bf16.gmra.mrb[12].mxu0 %vm262_vm6, %v668_v54 }
  0x65   : > { %1081 = vmatprep.mubr.msk.bf16.mxu0 %vm1159_vm0, %v1158_v1 }
  0x67   : > { %1038 = vmatmul.mubr.msk.bf16.gmra.mrb[16].mxu1 %vm262_vm6, %v901_v10 }
  0x6c   : > { %1082 = vmatmul.mubr.msk.bf16.gmra.mrb[16].mxu0 %vm262_vm6, %v667_v8 }
 0x11a   : > { %v402_v11 = vpop.f32.mrb[0].mxu1 }
 0x11b   : > { %v1023_v12 = vpop.f32.mrb[1].mxu1 }
 0x11c   : > { %v405_v13 = vpop.f32.mrb[2].mxu1 }
 0x11d   : > { %v1024_v14 = vpop.f32.mrb[3].mxu1 }
 0x11f   : > { %v724_v15 = vpop.f32.mrb[0].mxu0 }
 0x120   : > { %v1085_v16 = vadd.f32 %v724_v15, %v402_v11  ;;  %v1067_v17 = vpop.f32.mrb[1].mxu0 }
 0x121   : > { %v727_v18 = vpop.f32.mrb[2].mxu0 }
 0x122   : > { %v1086_v20 = vadd.f32 %v727_v18, %v405_v13  ;;  %v1068_v22 = vpop.f32.mrb[3].mxu0  ;;  %v410_v23 = vpop.f32.mrb[4].mxu1  ;;  %v771_v25 = vmax.f32 %v1085_v16, 0.0 }
 0x123   : > { %v1027_v24 = vpop.f32.mrb[5].mxu1 }
 0x124   : > { %v772_v26 = vmax.f32 %v1086_v20, 0.0  ;;  %v413_v1 = vpop.f32.mrb[6].mxu1 }
 0x125   : > { %v1028_v27 = vpop.f32.mrb[7].mxu1 }
 0x126   : > { %v953_v28 = vpack.c.bf16 %v772_v26, %v771_v25 }
 0x127   : > { %v732_v29 = vpop.f32.mrb[4].mxu0 }
 0x128   : > { %954 = vst [vmem:[%s1356_s26] sm:$0xff] %v953_v28   ;;  %v1087_v30 = vadd.f32 %v732_v29, %v410_v23  ;;  %v1071_v31 = vpop.f32.mrb[5].mxu0 }
 0x129   : > { %v735_v33 = vpop.f32.mrb[6].mxu0 }
 0x12a   : > { %v1088_v34 = vadd.f32 %v735_v33, %v413_v1  ;;  %v1072_v35 = vpop.f32.mrb[7].mxu0  ;;  %v418_v36 = vpop.f32.mrb[8].mxu1  ;;  %v773_v38 = vmax.f32 %v1087_v30, 0.0 }
 0x12b   : > { %v1031_v37 = vpop.f32.mrb[9].mxu1 }
 0x12c   : > { %v774_v39 = vmax.f32 %v1088_v34, 0.0  ;;  %v421_v41 = vpop.f32.mrb[10].mxu1 }
 0x12d   : > { %v1032_v42 = vpop.f32.mrb[11].mxu1 }
 0x12e   : > { %v958_v43 = vpack.c.bf16 %v774_v39, %v773_v38 }
 0x12f   : > { %v740_v44 = vpop.f32.mrb[8].mxu0 }
 0x130   : > { %970 = vst [vmem:[%s1356_s26 + $0x8] sm:$0xff] %v958_v43   ;;  %v1089_v45 = vadd.f32 %v740_v44, %v418_v36  ;;  %v1075_v46 = vpop.f32.mrb[9].mxu0 }
 0x131   : > { %v743_v47 = vpop.f32.mrb[10].mxu0 }
 0x132   : > { %v1090_v48 = vadd.f32 %v743_v47, %v421_v41  ;;  %v1076_v49 = vpop.f32.mrb[11].mxu0  ;;  %v426_v50 = vpop.f32.mrb[12].mxu1  ;;  %v775_v52 = vmax.f32 %v1089_v45, 0.0 }
 0x133   : > { %v1035_v51 = vpop.f32.mrb[13].mxu1 }
 0x134   : > { %v776_v53 = vmax.f32 %v1090_v48, 0.0  ;;  %v429_v55 = vpop.f32.mrb[14].mxu1 }
 0x135   : > { %v1036_v56 = vpop.f32.mrb[15].mxu1 }
 0x136   : > { %v963_v57 = vpack.c.bf16 %v776_v53, %v775_v52 }
 0x137   : > { %v748_v58 = vpop.f32.mrb[12].mxu0 }
 0x138   : > { %971 = vst [vmem:[%s1356_s26 + $0x10] sm:$0xff] %v963_v57   ;;  %v1091_v59 = vadd.f32 %v748_v58, %v426_v50  ;;  %v1079_v60 = vpop.f32.mrb[13].mxu0 }
 0x139   : > { %v751_v61 = vpop.f32.mrb[14].mxu0 }
 0x13a   : > { %v1092_v62 = vadd.f32 %v751_v61, %v429_v55  ;;  %v1080_v63 = vpop.f32.mrb[15].mxu0  ;;  %v434_v0 = vpop.f32.mrb[16].mxu1  ;;  %v777_v3 = vmax.f32 %v1091_v59, 0.0 }
 0x13b   : > { %v1039_v2 = vpop.f32.mrb[17].mxu1 }
 0x13c   : > { %v778_v4 = vmax.f32 %v1092_v62, 0.0  ;;  %v437_v5 = vpop.f32.mrb[18].mxu1 }
 0x13d   : > { %v1040_v6 = vpop.f32.mrb[19].mxu1 }
 0x13e   : > { %v968_v7 = vpack.c.bf16 %v778_v4, %v777_v3 }
 0x13f   : > { %v756_v9 = vpop.f32.mrb[16].mxu0 }
 0x140   : > { %972 = vst [vmem:[%s1356_s26 + $0x18] sm:$0xff] %v968_v7   ;;  %v1093_v32 = vadd.f32 %v756_v9, %v434_v0  ;;  %v1083_v19 = vpop.f32.mrb[17].mxu0 }
 0x141   : > { %v759_v40 = vpop.f32.mrb[18].mxu0 }
 0x142   : > { %v779_v21 = vmax.f32 %v1093_v32, 0.0  ;;  %v1084_v8 = vpop.f32.mrb[19].mxu0 }
 0x144   : > { %v949_v54 = vpack.c.bf16 %v779_v21, %v779_v21 }
 0x146   : > { %825 = vst [vmem:[%s1356_s26 + $0x20] sm:$0xf] %v949_v54 }
 0x147 PF: > { %s12_s9 = sadd.s32 1, %s1156_s9  }
 0x148   : > { %p9_p4 = scmp.ge.s32.totalorder %s12_s9, 4  }
 0x14a   :  { %11 = sbr.rel (!%p9_p4) target bundleno = 1 (0x1), region = 61 }

// kernel: unet_innermost_forward.4
= control target key start
LH: loop header
LB: loop body
LE: loop exit
PB: predicated region body
PF: predicated region fallthrough
CT: control target
= control target key end

     0   :  { %s5529_s15 = smov 0   ;;  %s6715_s0 = inlined_call_operand.vmem [shape: bf16[2,120,128], index: 0, kind: input, shape index: {}]   ;;  %s6716_s1 = inlined_call_operand.vmem [shape: bf16[4,4,128,128], index: 1, kind: input, shape index: {}]   ;;  %s6717_s2 = inlined_call_operand.vmem [shape: f32[80,1], index: 2, kind: input, shape index: {}]   ;;  %s6718_s3 = inlined_call_operand.vmem [shape: f32[2,4,80,128], index: 3, kind: output, shape index: {0}]   ;;  %s6719_s4 = inlined_call_operand.vmem [shape: f32[2,2,128], index: 4, kind: output, shape index: {1}]  }
   0x1 LB: > { %s3808_s16 = sadd.s32 4294967295, %s5499_s15   ;;  %p3812_p0 = scmp.ge.s32.totalorder %s5499_s15, 1  ;;  %s5499_s15 = sphi %s5529_s15, %s15_s15  }
   0x2   : > { %p165_p1 = scmp.lt.s32.totalorder %s5499_s15, 3 }
   0x4   : > { %p166_p2 = pnand %p3812_p0, %p165_p1 }
   0x5   : > { %v5310_v0 = vld [vmem:[%s6716_s1 + $0x40] sm:$0xff] (!%p166_p2)   ;;  %v5501_v1 = vmov (!%p166_p2), 0.0   ;;  %v5312_v3 = vld [vmem:[%s6716_s1 + $0x48] sm:$0xff] (!%p166_p2)   ;;  %vm5502_vm0 = vmmov (!%p166_p2), 0   ;;  %p195_p3 = scmp.lt.s32.totalorder (!%p166_p2), %s3808_s16, 1  ;;  %v5314_v5 = vld [vmem:[%s6716_s1 + $0x50] sm:$0xff] (!%p166_p2)  }
   0x6   : > { %169 = sbr.rel (%p166_p2) target bundleno = 588 (0x24c), region = 32  ;;  %4479 = vmatprep.subr.bf16.mxu0 (!%p166_p2), %v5501_v1  ;;  %4623 = vmatprep.subr.bf16.mxu1 (!%p166_p2), %v5501_v1  ;;  %v5311_v2 = vld [vmem:[%s6716_s1 + $0x140] sm:$0xff] (!%p166_p2)   ;;  %v5313_v4 = vld [vmem:[%s6716_s1 + $0x148] sm:$0xff] (!%p166_p2)   ;;  %v5315_v6 = vld [vmem:[%s6716_s1 + $0x150] sm:$0xff] (!%p166_p2)   ;;  %vm292_vm1 = vsmask.f32 (!%p166_p2), 7424 }
   0x7   : > { %4480 = vmatpush3.bf16.msra.mxu0 (!%p166_p2), %v5310_v0  ;;  %4495 = vmatprep.mubr.msk.bf16.mxu0 (!%p166_p2), %vm5502_vm0, %v5501_v1  ;;  %v5316_v7 = vld [vmem:[%s6716_s1 + $0x58] sm:$0xff] (!%p166_p2)   ;;  %v5318_v9 = vld [vmem:[%s6716_s1 + $0x60] sm:$0xff] (!%p166_p2)   ;;  %v5320_v12 = vld [vmem:[%s6716_s1 + $0x68] sm:$0xff] (!%p166_p2)   ;;  %vm645_vm2 = vcmask (!%p166_p2), 1046528   ;;  %vm814_vm3 = vsmask.f32 (!%p166_p2), 6400 }
   0x8   : > { %4624 = vmatpush3.bf16.msra.mxu1 (!%p166_p2), %v5311_v2  ;;  %4481 = vmatprep.subr.bf16.mxu0 (!%p166_p2), %v5501_v1  ;;  %v5317_v8 = vld [vmem:[%s6716_s1 + $0x158] sm:$0xff] (!%p166_p2)   ;;  %v5319_v10 = vld [vmem:[%s6716_s1 + $0x160] sm:$0xff] (!%p166_p2)   ;;  %v5321_v14 = vld [vmem:[%s6716_s1 + $0x168] sm:$0xff] (!%p166_p2)   ;;  %vm1766_vm4 = vcmask (!%p166_p2), 1045504   ;;  %vm2594_vm5 = vsmask.f32 (!%p166_p2), 5376 }
   0x9   : > { %4625 = vmatprep.subr.bf16.mxu1 (!%p166_p2), %v5501_v1  ;;  %4639 = vmatprep.mubr.msk.bf16.mxu1 (!%p166_p2), %vm5502_vm0, %v5501_v1  ;;  %v5322_v18 = vld [vmem:[%s6716_s1 + $0x70] sm:$0xff] (!%p166_p2)   ;;  %v5324_v25 = vld [vmem:[%s6716_s1 + $0x78] sm:$0xff] (!%p166_p2)   ;;  %v5331_v32 = vld [vmem:[%s6716_s1] sm:$0xff] (!%p166_p2)   ;;  %vm3506_vm6 = vcmask (!%p166_p2), 1044480  }
   0xa   : > { %v5323_v19 = vld [vmem:[%s6716_s1 + $0x170] sm:$0xff] (!%p166_p2)   ;;  %v5325_v26 = vld [vmem:[%s6716_s1 + $0x178] sm:$0xff] (!%p166_p2)   ;;  %v5332_v38 = vld [vmem:[%s6716_s1 + $0x100] sm:$0xff] (!%p166_p2)  }
   0xb   : > { %4482 = vmatpush3.bf16.msra.mxu0 (!%p166_p2), %v5312_v3  ;;  %v5333_v39 = vld [vmem:[%s6716_s1 + $0x8] sm:$0xff] (!%p166_p2)   ;;  %v5337_v45 = vld [vmem:[%s6716_s1 + $0x10] sm:$0xff] (!%p166_p2)   ;;  %v5340_v55 = vld [vmem:[%s6716_s1 + $0x18] sm:$0xff] (!%p166_p2)  }
   0xc   : > { %4626 = vmatpush3.bf16.msra.mxu1 (!%p166_p2), %v5313_v4  ;;  %4483 = vmatprep.subr.bf16.mxu0 (!%p166_p2), %v5501_v1  ;;  %v5336_v43 = vld [vmem:[%s6716_s1 + $0x108] sm:$0xff] (!%p166_p2)   ;;  %v5338_v48 = vld [vmem:[%s6716_s1 + $0x110] sm:$0xff] (!%p166_p2)   ;;  %v5342_v57 = vld [vmem:[%s6716_s1 + $0x118] sm:$0xff] (!%p166_p2)  }
   0xd   : > { %s6721_s16 = smov (!%p195_p3, %s3808_s16), 1  ;;  %4627 = vmatprep.subr.bf16.mxu1 %v5501_v1  ;;  %v5343_v58 = vld [vmem:[%s6716_s1 + $0x20] sm:$0xff]  }
   0xe   : > { %s5295_s5 = smul.u32 60, %s6721_s16  ;;  %v5344_v0 = vld [vmem:[%s6716_s1 + $0x120] sm:$0xff]   ;;  %s3815_s23 = sshll.u32 %s6721_s16, 1 }
   0xf   : > { %4484 = vmatpush3.bf16.msra.mxu0 %v5314_v5  ;;  %s208_s26 = scalar_lea.vmem %s6719_s4, %s3815_s23 }
  0x10   : > { %4628 = vmatpush3.bf16.msra.mxu1 %v5315_v6  ;;  %4485 = vmatprep.subr.bf16.mxu0 %v5501_v1  ;;  %s5582_s12 = scalar_lea.vmem %s6715_s0, %s5295_s5  ;;  %v5347_v6 = vld [vmem:[%s6716_s1 + $0x28] sm:$0xff]  }
  0x11   : > { %4629 = vmatprep.subr.bf16.mxu1 %v5501_v1  ;;  %v5590_v11 = vld [vmem:[%s5582_s12] sm:$0xff]   ;;  %v5596_v13 = vld [vmem:[%s5582_s12 + $0x8] sm:$0xff]   ;;  %v5629_v29 = vld [vmem:[%s5582_s12 + $0x10] sm:$0xff]  }
  0x12   : > { %v296_v15 = vshll.u32 %v5590_v11, 16  ;;  %v5604_v16 = vld [vmem:[%s5582_s12 + $0x4] sm:$0xf]  ;;  %v1144_v17 = vld [vmem:[%s5582_s12] sm:$0xe]  ;;  %v294_v20 = vshrl.u32 %v5590_v11, 16 }
  0x13   : > { %4486 = vmatpush3.bf16.msra.mxu0 %v5316_v7  ;;  %v301_v22 = vshll.u32 %v5596_v13, 16  ;;  %v3941_v23 = vcombine.low %v1144_v17, %v5604_v16  ;;  %v5619_v24 = vld [vmem:[%s5582_s12 + $0x8] sm:$0xff]   ;;  %v305_v33 = vshrl.u32 %v5596_v13, 16  ;;  %v309_v35 = vshll.u32 %v5629_v29, 16  ;;  %v5641_v36 = vld [vmem:[%s5582_s12 + $0x10] sm:$0xff]   ;;  %v5657_v44 = vld [vmem:[%s5582_s12 + $0x18] sm:$0xff]  }
  0x14   : > { %4630 = vmatpush3.bf16.msra.mxu1 %v5317_v8  ;;  %4487 = vmatprep.subr.bf16.mxu0 %v5501_v1  ;;  %v298_v21 = vrot.slane %v296_v15, 1  ;;  %v1191_v31 = vrot.slane %v5619_v24, 1  ;;  %v1193_v42 = vrot.slane %v5641_v36, 1  ;;  %v313_v46 = vshrl.u32 %v5629_v29, 16  ;;  %v5677_v51 = vld [vmem:[%s5582_s12 + $0x18] sm:$0xff]   ;;  %v5681_v52 = vld [vmem:[%s5582_s12 + $0x20] sm:$0xff]  }
  0x15   : > { %4631 = vmatprep.subr.bf16.mxu1 %v5501_v1  ;;  %v303_v28 = vrot.slane %v301_v22, 1  ;;  %v1190_v30 = vrot.slane %v3941_v23, 1  ;;  %v311_v41 = vrot.slane %v309_v35, 1  ;;  %v317_v49 = vshll.u32 %v5657_v44, 16  ;;  %v5702_v61 = vld [vmem:[%s5582_s12 + $0x20] sm:$0xff]   ;;  %v5348_v8 = vld [vmem:[%s6716_s1 + $0x128] sm:$0xff]  }
  0x16   : > { %v299_v27 = vor.u32 %v298_v21, %v294_v20  ;;  %v1194_v50 = vsel %vm645_vm2, %v1191_v31, %v1193_v42  ;;  %v1195_v56 = vrot.slane %v5677_v51, 1  ;;  %v321_v59 = vshrl.u32 %v5657_v44, 16  ;;  %v5350_v2 = vld [vmem:[%s5582_s12 + $0x28] ss:$0 sps:$4 sm:$0x11]   ;;  %v5353_v23 = vld [vmem:[%s6716_s1 + $0x38] sm:$0xff]  }
  0x17   : > { %4488 = vmatpush3.bf16.msra.mxu0 %v5318_v9  ;;  %v1192_v37 = vsel %vm645_vm2, %v1190_v30, %v1191_v31  ;;  %v307_v40 = vor.u32 %v305_v33, %v303_v28  ;;  %v315_v53 = vor.u32 %v313_v46, %v311_v41  ;;  %v319_v54 = vrot.slane %v317_v49, 1  ;;  %v1116_v3 = vld [vmem:[%s5582_s12] sm:$0xf]  ;;  %v5727_v9 = vld [vmem:[%s5582_s12 + $0x28] ss:$0 sps:$4 sm:$0x11]  }
  0x18   : > { %4632 = vmatpush3.bf16.msra.mxu1 %v5319_v10  ;;  %4489 = vmatprep.subr.bf16.mxu0 %v5501_v1  ;;  %v304_v34 = vsel %vm292_vm1, %v299_v27, %v303_v28  ;;  %v325_v60 = vshll.u32 %v5681_v52, 16  ;;  %v1196_v63 = vsel %vm645_vm2, %v1193_v42, %v1195_v56  ;;  %v1197_v7 = vrot.slane %v5702_v61, 1 }
  0x19   : > { %4633 = vmatprep.subr.bf16.mxu1 %v5501_v1  ;;  %v312_v47 = vsel %vm292_vm1, %v307_v40, %v311_v41  ;;  %v320_v62 = vsel %vm292_vm1, %v315_v53, %v319_v54  ;;  %v323_v4 = vor.u32 %v321_v59, %v319_v54  ;;  %v3955_v10 = vcombine.low %v1116_v3, %v5604_v16  ;;  %v5357_v40 = vld [vmem:[%s6716_s1 + $0x88] sm:$0xff]   ;;  %v1500_v59 = vld [vmem:[%s5582_s12 + $0x4] sm:$0xe] }
  0x1a   : > { %v327_v5 = vrot.slane %v325_v60, 1  ;;  %v333_v15 = vshll.u32 %v5350_v2, 16  ;;  %v1198_v17 = vsel %vm645_vm2, %v1195_v56, %v1197_v7  ;;  %v1199_v22 = vrot.slane %v5727_v9, 1  ;;  %v5364_v56 = vld [vmem:[%s6716_s1 + $0x1a0] sm:$0xff]   ;;  %v5830_v60 = vld [vmem:[%s5582_s12 + $0x8] sm:$0xf] }
  0x1b   : > { %4490 = vmatpush3.bf16.msra.mxu0 %v5320_v12  ;;  %v1333_v16 = vshll.u32 %v3955_v10, 16  ;;  %v1331_v27 = vshrl.u32 %v3955_v10, 16  ;;  %v1338_v31 = vshll.u32 %v5619_v24, 16  ;;  %v1354_v46 = vshll.u32 %v5677_v51, 16  ;;  %v5370_v10 = vld [vmem:[%s6716_s1 + $0x1b8] sm:$0xff]  }
  0x1c   : > { %4634 = vmatpush3.bf16.msra.mxu1 %v5321_v14  ;;  %4491 = vmatprep.subr.bf16.mxu0 %v5501_v1  ;;  %v328_v12 = vsel %vm292_vm1, %v323_v4, %v327_v5  ;;  %v329_v14 = vshrl.u32 %v5681_v52, 16  ;;  %v335_v21 = vrot.slane %v333_v15, 1  ;;  %v1200_v30 = vsel %vm645_vm2, %v1197_v7, %v1199_v22  ;;  %v5871_v15 = vld [vmem:[%s5582_s12 + $0xc] sm:$0xff]  }
  0x1d   : > { %4635 = vmatprep.subr.bf16.mxu1 %v5501_v1  ;;  %v1335_v28 = vrot.slane %v1333_v16, 1  ;;  %v1340_v33 = vrot.slane %v1338_v31, 1  ;;  %v1356_v49 = vrot.slane %v1354_v46, 1  ;;  %v1362_v53 = vshll.u32 %v5702_v61, 16  ;;  %v5893_v31 = vld [vmem:[%s5582_s12 + $0x14] sm:$0xff]   ;;  %v5924_v46 = vld [vmem:[%s5582_s12 + $0x24] sm:$0xff]  }
  0x1e   : > { %v331_v20 = vor.u32 %v329_v14, %v327_v5  ;;  %v1370_v2 = vshll.u32 %v5727_v9, 16  ;;  %v3980_v3 = vcombine.low %v1500_v59, %v5830_v60  ;;  %v5368_v5 = vld [vmem:[%s6716_s1 + $0x1b0] sm:$0xff]   ;;  %v5369_v9 = vld [vmem:[%s6716_s1 + $0xb8] sm:$0xff]   ;;  %v5868_v14 = vld [vmem:[%s5582_s12 + $0x4] sm:$0xfe]  }
  0x1f   : > { %4492 = vmatpush3.bf16.msra.mxu0 %v5322_v18  ;;  %v5349_v18 = vld [vmem:[%s6716_s1 + $0x30] sm:$0xff]   ;;  %v646_v22 = vrot.slane %v5868_v14, 1  ;;  %v5952_v59 = vld [vmem:[%s5582_s12 + $0x24] sm:$0xff]  }
  0x20   : > { %4636 = vmatpush3.bf16.msra.mxu1 %v5323_v19  ;;  %4493 = vmatprep.subr.bf16.mxu0 %v5501_v1  ;;  %v5352_v19 = vld [vmem:[%s6716_s1 + $0x130] sm:$0xff]  }
  0x21   : > { %4637 = vmatprep.subr.bf16.mxu1 %v5501_v1 }
  0x23   : > { %4494 = vmatpush3.bf16.msra.mxu0 %v5324_v25  ;;  %v5354_v25 = vld [vmem:[%s6716_s1 + $0x138] sm:$0xff]  }
  0x24   : > { %4638 = vmatpush3.bf16.msra.mxu1 %v5325_v26  ;;  %4515 = vmatprep.subr.bf16.mxu0 %v5501_v1  ;;  %v336_v26 = vsel %vm292_vm1, %v331_v20, %v335_v21  ;;  %v5875_v21 = vld [vmem:[%s5582_s12 + $0x14] sm:$0xff]  }
  0x25   : > { %4659 = vmatprep.subr.bf16.mxu1 %v5501_v1 }
  0x26   : > { %4496 = vmatmul.mubr.bf16.vlgmr.msra.gmra.mrb[0].mxu0 %v304_v34  ;;  %v5355_v34 = vld [vmem:[%s6716_s1 + $0x80] sm:$0xff]  }
  0x27   : > { %4640 = vmatmul.mubr.bf16.vlgmr.msra.gmra.mrb[0].mxu1 %v1192_v37  ;;  %4516 = vmatpush3.bf16.msra.mxu0 %v5331_v32  ;;  %v1336_v32 = vor.u32 %v1335_v28, %v1331_v27  ;;  %v5356_v37 = vld [vmem:[%s6716_s1 + $0x180] sm:$0xff]   ;;  %v1574_v27 = vshrl.u32 %v5875_v21, 16 }
  0x28   : > { %4660 = vmatpush3.bf16.msra.mxu1 %v5332_v38  ;;  %4517 = vmatprep.subr.bf16.mxu0 %v5501_v1  ;;  %v1342_v38 = vshrl.u32 %v5619_v24, 16  ;;  %v5360_v24 = vld [vmem:[%s6716_s1 + $0x190] sm:$0xff]  }
  0x29   : > { %4499 = vmatprep.mubr.msk.bf16.mxu0 %vm5502_vm0, %v5501_v1  ;;  %4643 = vmatprep.mubr.msk.bf16.mxu1 %vm5502_vm0, %v5501_v1  ;;  %v1341_v35 = vsel %vm292_vm1, %v1336_v32, %v1340_v33 }
  0x2a   : > { %4661 = vmatprep.subr.bf16.mxu1 %v5501_v1  ;;  %v1344_v41 = vor.u32 %v1342_v38, %v1340_v33  ;;  %v5376_v33 = vld [vmem:[%s6716_s1 + $0x1c0] sm:$0xff]   ;;  %v5503_v38 = vmov 0  }
  0x2b   : > { %4518 = vmatpush3.bf16.msra.mxu0 %v5333_v39  ;;  %v1346_v39 = vshll.u32 %v5641_v36, 16  ;;  %5308 = vset.pattern.permute.xlu0 %v5503_v38 }
  0x2c   : > { %4662 = vmatpush3.bf16.msra.mxu1 %v5336_v43  ;;  %4519 = vmatprep.subr.bf16.mxu0 %v5501_v1  ;;  %v5358_v43 = vld [vmem:[%s6716_s1 + $0x188] sm:$0xff]  }
  0x2d   : > { %4663 = vmatprep.subr.bf16.mxu1 %v5501_v1  ;;  %v1348_v42 = vrot.slane %v1346_v39, 1  ;;  %5309 = vset.pattern.permute.xlu1 %v5503_v38  ;;  %v5377_v39 = vld [vmem:[%s6716_s1 + $0xc8] sm:$0xff]  }
  0x2e   : > { %4500 = vmatmul.mubr.bf16.gmra.mrb[4].mxu0 %v312_v47 }
  0x2f   : > { %4644 = vmatmul.mubr.bf16.gmra.mrb[4].mxu1 %v1194_v50  ;;  %4520 = vmatpush3.bf16.msra.mxu0 %v5337_v45  ;;  %v1350_v45 = vshrl.u32 %v5641_v36, 16  ;;  %v1349_v47 = vsel %vm292_vm1, %v1344_v41, %v1348_v42  ;;  %v5362_v50 = vld [vmem:[%s6716_s1 + $0x198] sm:$0xff]   ;;  %v5380_v41 = vld [vmem:[%s6716_s1 + $0x1c8] sm:$0xff]  }
  0x30   : > { %4664 = vmatpush3.bf16.msra.mxu1 %v5338_v48  ;;  %4503 = vmatprep.mubr.msk.bf16.mxu0 %vm5502_vm0, %v5501_v1  ;;  %v5361_v48 = vld [vmem:[%s6716_s1 + $0x98] sm:$0xff]  }
  0x31   : > { %4521 = vmatprep.subr.bf16.mxu0 %v5501_v1  ;;  %4647 = vmatprep.mubr.msk.bf16.mxu1 %vm5502_vm0, %v5501_v1  ;;  %v1352_v36 = vor.u32 %v1350_v45, %v1348_v42  ;;  %v5382_v45 = vld [vmem:[%s6716_s1 + $0x1d0] sm:$0xff]  }
  0x32   : > { %4665 = vmatprep.subr.bf16.mxu1 %v5501_v1 }
  0x33   : > { %4522 = vmatpush3.bf16.msra.mxu0 %v5340_v55  ;;  %v1357_v54 = vsel %vm292_vm1, %v1352_v36, %v1356_v49  ;;  %v1358_v55 = vshrl.u32 %v5677_v51, 16 }
  0x34   : > { %4666 = vmatpush3.bf16.msra.mxu1 %v5342_v57  ;;  %4523 = vmatprep.subr.bf16.mxu0 %v5501_v1  ;;  %v1364_v57 = vrot.slane %v1362_v53, 1 }
  0x35   : > { %4667 = vmatprep.subr.bf16.mxu1 %v5501_v1  ;;  %v1360_v51 = vor.u32 %v1358_v55, %v1356_v49 }
  0x36   : > { %4504 = vmatmul.mubr.bf16.gmra.mrb[8].mxu0 %v320_v62  ;;  %v5838_v62 = vld [vmem:[%s5582_s12 + $0xc] sm:$0xff]  }
  0x37   : > { %4648 = vmatmul.mubr.bf16.gmra.mrb[8].mxu1 %v1196_v63  ;;  %4524 = vmatpush3.bf16.msra.mxu0 %v5343_v58  ;;  %v5365_v58 = vld [vmem:[%s6716_s1 + $0xa8] sm:$0xff]   ;;  %v5367_v63 = vld [vmem:[%s6716_s1 + $0xb0] sm:$0xff]   ;;  %v1365_v4 = vsel %vm292_vm1, %v1360_v51, %v1364_v57  ;;  %v1568_v7 = vshll.u32 %v5838_v62, 16 }
  0x38   : > { %4507 = vmatprep.mubr.msk.bf16.mxu0 %vm5502_vm0, %v5501_v1  ;;  %4651 = vmatprep.mubr.msk.bf16.mxu1 %vm5502_vm0, %v5501_v1 }
  0x39   : > { %4668 = vmatpush3.bf16.msra.mxu1 %v5344_v0  ;;  %4525 = vmatprep.subr.bf16.mxu0 %v5501_v1  ;;  %v1366_v0 = vshrl.u32 %v5702_v61, 16  ;;  %v1565_v61 = vshrl.u32 %v5838_v62, 16 }
  0x3a   : > { %4669 = vmatprep.subr.bf16.mxu1 %v5501_v1 }
  0x3b   : > { %4526 = vmatpush3.bf16.msra.mxu0 %v5347_v6  ;;  %v1557_v6 = vshrl.u32 %v3980_v3, 16 }
  0x3c   : > { %4527 = vmatprep.subr.bf16.mxu0 %v5501_v1 }
  0x3d   : > { %4670 = vmatpush3.bf16.msra.mxu1 %v5348_v8  ;;  %v1368_v8 = vor.u32 %v1366_v0, %v1364_v57  ;;  %v1595_v57 = vshll.u32 %v5924_v46, 16 }
  0x3e   : > { %4508 = vmatmul.mubr.bf16.gmra.mrb[12].mxu0 %v328_v12  ;;  %4671 = vmatprep.subr.bf16.mxu1 %v5501_v1  ;;  %v1560_v12 = vshll.u32 %v3980_v3, 16  ;;  %v5388_v3 = vld [vmem:[%s6716_s1 + $0x1e0] sm:$0xff]  }
  0x3f   : > { %4652 = vmatmul.mubr.bf16.gmra.mrb[12].mxu1 %v1198_v17  ;;  %4511 = vmatprep.mubr.msk.bf16.mxu0 %vm5502_vm0, %v5501_v1  ;;  %v1567_v17 = vrot.slane %v1565_v61, 1  ;;  %v1597_v0 = vrot.slane %v1595_v57, 2  ;;  %v215_v57 = vld [vmem:[%s6717_s2 + $0x28] sm:$0xff] }
  0x40   : > { %4528 = vmatpush3.bf16.msra.mxu0 %v5349_v18  ;;  %4655 = vmatprep.mubr.msk.bf16.mxu1 %vm5502_vm0, %v5501_v1  ;;  %v1559_v18 = vrot.slane %v1557_v6, 1  ;;  %v1562_v20 = vrot.slane %v1560_v12, 2  ;;  %v5393_v12 = vld [vmem:[%s6716_s1 + $0xf0] sm:$0xff]  }
  0x41   : > { %4672 = vmatpush3.bf16.msra.mxu1 %v5352_v19  ;;  %4529 = vmatprep.subr.bf16.mxu0 %v5501_v1  ;;  %v1570_v19 = vrot.slane %v1568_v7, 2 }
  0x42   : > { %4673 = vmatprep.subr.bf16.mxu1 %v5501_v1 }
  0x44   : > { %4530 = vmatpush3.bf16.msra.mxu0 %v5353_v23  ;;  %v647_v23 = vrot.slane %v5871_v15, 1 }
  0x45   : > { %4674 = vmatpush3.bf16.msra.mxu1 %v5354_v25  ;;  %4551 = vmatprep.subr.bf16.mxu0 %v5501_v1  ;;  %v1563_v25 = vor.u32 %v1562_v20, %v1559_v18  ;;  %v819_v20 = vshll.u32 %v5868_v14, 16 }
  0x46   : > { %4512 = vmatmul.mubr.bf16.gmra.mrb[16].mxu0 %v336_v26  ;;  %4695 = vmatprep.subr.bf16.mxu1 %v5501_v1  ;;  %v1571_v26 = vor.u32 %v1570_v19, %v1567_v17  ;;  %v648_v28 = vsel %vm645_vm2, %v646_v22, %v647_v23  ;;  %v816_v19 = vshrl.u32 %v5868_v14, 16 }
  0x47   : > { %4656 = vmatmul.mubr.bf16.gmra.mrb[16].mxu1 %v1200_v30  ;;  %4531 = vmatprep.mubr.msk.bf16.mxu0 %vm5502_vm0, %v5501_v1  ;;  %v5375_v30 = vld [vmem:[%s6716_s1 + $0xc0] sm:$0xff]  }
  0x48   : > { %4675 = vmatprep.mubr.msk.bf16.mxu1 %vm5502_vm0, %v5501_v1  ;;  %v1572_v32 = vsel %vm814_vm3, %v1563_v25, %v1571_v26  ;;  %v824_v25 = vshrl.u32 %v5871_v15, 16 }
  0x4e   : > { %4532 = vmatmul.mubr.bf16.vlgmr.msra.gmra.mrb[0].mxu0 %v5590_v11  ;;  %v5359_v11 = vld [vmem:[%s6716_s1 + $0x90] sm:$0xff]  }
  0x4f   : > { %4676 = vmatmul.mubr.bf16.vlgmr.msra.gmra.mrb[0].mxu1 %v1341_v35  ;;  %4552 = vmatpush3.bf16.msra.mxu0 %v5355_v34  ;;  %v1576_v34 = vrot.slane %v1574_v27, 1  ;;  %v5398_v27 = vld [vmem:[%s6716_s1 + $0x1f8] sm:$0xff]  }
  0x50   : > { %4696 = vmatpush3.bf16.msra.mxu1 %v5356_v37  ;;  %4553 = vmatprep.subr.bf16.mxu0 %v5501_v1  ;;  %v5900_v37 = vld [vmem:[%s5582_s12 + $0x1c] sm:$0xff]  }
  0x51   : > { %4535 = vmatprep.mubr.msk.bf16.mxu0 %vm5502_vm0, %v5501_v1  ;;  %4679 = vmatprep.mubr.msk.bf16.mxu1 %vm5502_vm0, %v5501_v1 }
  0x52   : > { %4697 = vmatprep.subr.bf16.mxu1 %v5501_v1 }
  0x53   : > { %4554 = vmatpush3.bf16.msra.mxu0 %v5357_v40  ;;  %v649_v40 = vrot.slane %v5893_v31, 1 }
  0x54   : > { %4698 = vmatpush3.bf16.msra.mxu1 %v5358_v43  ;;  %4555 = vmatprep.subr.bf16.mxu0 %v5501_v1  ;;  %v1583_v43 = vshrl.u32 %v5900_v37, 16 }
  0x55   : > { %4699 = vmatprep.subr.bf16.mxu1 %v5501_v1 }
  0x56   : > { %4536 = vmatmul.mubr.bf16.gmra.mrb[4].mxu0 %v5596_v13  ;;  %v5363_v13 = vld [vmem:[%s6716_s1 + $0xa0] sm:$0xff]   ;;  %v1585_v49 = vrot.slane %v1583_v43, 1  ;;  %v836_v43 = vshll.u32 %v5893_v31, 16 }
  0x57   : > { %4680 = vmatmul.mubr.bf16.gmra.mrb[4].mxu1 %v1349_v47  ;;  %4556 = vmatpush3.bf16.msra.mxu0 %v5359_v11  ;;  %v1586_v11 = vshll.u32 %v5900_v37, 16  ;;  %v650_v47 = vsel %vm645_vm2, %v647_v23, %v649_v40  ;;  %v5397_v23 = vld [vmem:[%s6716_s1 + $0xf8] sm:$0xff]  }
  0x58   : > { %4700 = vmatpush3.bf16.msra.mxu1 %v5360_v24  ;;  %4539 = vmatprep.mubr.msk.bf16.mxu0 %vm5502_vm0, %v5501_v1  ;;  %v5381_v24 = vld [vmem:[%s6716_s1 + $0xd0] sm:$0xff]  }
  0x59   : > { %4557 = vmatprep.subr.bf16.mxu0 %v5501_v1  ;;  %4683 = vmatprep.mubr.msk.bf16.mxu1 %vm5502_vm0, %v5501_v1 }
  0x5a   : > { %4701 = vmatprep.subr.bf16.mxu1 %v5501_v1 }
  0x5b   : > { %4558 = vmatpush3.bf16.msra.mxu0 %v5361_v48  ;;  %v5928_v48 = vld [vmem:[%s5582_s12 + $0x1c] sm:$0xff]  }
  0x5c   : > { %4702 = vmatpush3.bf16.msra.mxu1 %v5362_v50  ;;  %4559 = vmatprep.subr.bf16.mxu0 %v5501_v1  ;;  %v1588_v50 = vrot.slane %v1586_v11, 2  ;;  %v651_v53 = vrot.slane %v5928_v48, 1 }
  0x5d   : > { %4703 = vmatprep.subr.bf16.mxu1 %v5501_v1 }
  0x5e   : > { %4540 = vmatmul.mubr.bf16.gmra.mrb[8].mxu0 %v5629_v29  ;;  %v5366_v29 = vld [vmem:[%s6716_s1 + $0x1a8] sm:$0xff]   ;;  %v1589_v55 = vor.u32 %v1588_v50, %v1585_v49  ;;  %v838_v50 = vrot.slane %v836_v43, 2 }
  0x5f   : > { %4684 = vmatmul.mubr.bf16.gmra.mrb[8].mxu1 %v1357_v54  ;;  %4560 = vmatpush3.bf16.msra.mxu0 %v5363_v13  ;;  %v1592_v13 = vshrl.u32 %v5924_v46, 16  ;;  %v5384_v54 = vld [vmem:[%s6716_s1 + $0xd8] sm:$0xff]   ;;  %v6153_v43 = vld [vmem:[%s5582_s12 + $0x8] sm:$0xf] }
  0x60   : > { %4543 = vmatprep.mubr.msk.bf16.mxu0 %vm5502_vm0, %v5501_v1  ;;  %4687 = vmatprep.mubr.msk.bf16.mxu1 %vm5502_vm0, %v5501_v1 }
  0x61   : > { %4704 = vmatpush3.bf16.msra.mxu1 %v5364_v56  ;;  %4561 = vmatprep.subr.bf16.mxu0 %v5501_v1  ;;  %v5386_v56 = vld [vmem:[%s6716_s1 + $0x1d8] sm:$0xff]   ;;  %v1594_v51 = vrot.slane %v1592_v13, 1  ;;  %v5401_v13 = vld [vmem:[%s6716_s1 + $0x340] sm:$0xff]  }
  0x62   : > { %4705 = vmatprep.subr.bf16.mxu1 %v5501_v1 }
  0x63   : > { %4562 = vmatpush3.bf16.msra.mxu0 %v5365_v58  ;;  %v5387_v58 = vld [vmem:[%s6716_s1 + $0xe0] sm:$0xff]   ;;  %v1598_v61 = vor.u32 %v1597_v0, %v1594_v51  ;;  %v5403_v51 = vld [vmem:[%s6716_s1 + $0x348] sm:$0xff]  }
  0x64   : > { %4563 = vmatprep.subr.bf16.mxu0 %v5501_v1 }
  0x65   : > { %4706 = vmatpush3.bf16.msra.mxu1 %v5366_v29  ;;  %v652_v29 = vsel %vm645_vm2, %v649_v40, %v651_v53  ;;  %v212_v40 = vld [vmem:[%s6717_s2 + $0x10] sm:$0xff] }
  0x66   : > { %4544 = vmatmul.mubr.bf16.gmra.mrb[12].mxu0 %v5657_v44  ;;  %4707 = vmatprep.subr.bf16.mxu1 %v5501_v1  ;;  %v1372_v44 = vrot.slane %v1370_v2, 1  ;;  %v5958_v2 = vld [vmem:[%s5582_s12 + $0x2c] ss:$0 sps:$4 sm:$0x33]  }
  0x67   : > { %4688 = vmatmul.mubr.bf16.gmra.mrb[12].mxu1 %v1365_v4  ;;  %4547 = vmatprep.mubr.msk.bf16.mxu0 %vm5502_vm0, %v5501_v1  ;;  %v653_v4 = vrot.slane %v5952_v59, 1  ;;  %v1601_v6 = vshrl.u32 %v5958_v2, 16  ;;  %v1604_v7 = vshll.u32 %v5958_v2, 16 }
  0x68   : > { %4564 = vmatpush3.bf16.msra.mxu0 %v5367_v63  ;;  %4691 = vmatprep.mubr.msk.bf16.mxu1 %vm5502_vm0, %v5501_v1  ;;  %v1373_v16 = vsel %vm292_vm1, %v1368_v8, %v1372_v44  ;;  %v5392_v8 = vld [vmem:[%s6716_s1 + $0x1e8] sm:$0xff]  }
  0x69   : > { %4708 = vmatpush3.bf16.msra.mxu1 %v5368_v5  ;;  %4565 = vmatprep.subr.bf16.mxu0 %v5501_v1  ;;  %v5391_v5 = vld [vmem:[%s6716_s1 + $0xe8] sm:$0xff]   ;;  %v1603_v17 = vrot.slane %v1601_v6, 1  ;;  %v1606_v18 = vrot.slane %v1604_v7, 2  ;;  %v851_v6 = vshrl.u32 %v5952_v59, 16 }
  0x6a   : > { %4709 = vmatprep.subr.bf16.mxu1 %v5501_v1  ;;  %v5394_v44 = vld [vmem:[%s5582_s12 + $0x2c] ss:$0 sps:$4 sm:$0x11]   ;;  %1026 = vperm.xlu1 %5309, %v212_v40  }
  0x6b   : > { %v655_v22 = vrot.slane %v5394_v44, 1  ;;  %v1607_v14 = vor.u32 %v1606_v18, %v1603_v17  ;;  %v218_v44 = vld [vmem:[%s6717_s2 + $0x40] sm:$0xff]  ;;  %v853_v18 = vrot.slane %v851_v6, 1 }
  0x6c   : > { %4566 = vmatpush3.bf16.msra.mxu0 %v5369_v9  ;;  %v654_v9 = vsel %vm645_vm2, %v651_v53, %v653_v4  ;;  %v5402_v53 = vld [vmem:[%s6716_s1 + $0x248] sm:$0xff]  }
  0x6d   : > { %4710 = vmatpush3.bf16.msra.mxu1 %v5370_v10  ;;  %4587 = vmatprep.subr.bf16.mxu0 %v5501_v1  ;;  %v1599_v10 = vsel %vm814_vm3, %v1589_v55, %v1598_v61 }
  0x6e   : > { %4548 = vmatmul.mubr.bf16.gmra.mrb[16].mxu0 %v5681_v52  ;;  %4731 = vmatprep.subr.bf16.mxu1 %v5501_v1  ;;  %v1577_v52 = vshll.u32 %v5875_v21, 16 }
  0x6f   : > { %4692 = vmatmul.mubr.bf16.gmra.mrb[16].mxu1 %v1373_v16  ;;  %4567 = vmatprep.mubr.msk.bf16.mxu0 %vm5502_vm0, %v5501_v1  ;;  %v5396_v16 = vld [vmem:[%s6716_s1 + $0x1f0] sm:$0xff]  }
  0x70   : > { %4711 = vmatprep.mubr.msk.bf16.mxu1 %vm5502_vm0, %v5501_v1  ;;  %v1579_v35 = vrot.slane %v1577_v52, 2  ;;  %v1745_v52 = vld [vmem:[%s5582_s12 + $0x4] sm:$0xc] }
  0x71   : > { %v4010_v38 = vcombine.low %v1745_v52, %v5830_v60  ;;  %v6121_v52 = vld [vmem:[%s5582_s12 + $0x4] sm:$0xfe]  }
  0x72   : > { %v1580_v42 = vor.u32 %v1579_v35, %v1576_v34  ;;  %v1608_v35 = vsel %vm814_vm3, %v1598_v61, %v1607_v14  ;;  %v5406_v61 = vld [vmem:[%s6716_s1 + $0x258] sm:$0xff]   ;;  %v1774_v14 = vrot.slane %v5924_v46, 2  ;;  %v2055_v40 = vshll.u32 %v6121_v52, 16 }
  0x73   : > { %v1767_v11 = vrot.slane %v4010_v38, 2  ;;  %v5415_v38 = vld [vmem:[%s6716_s1 + $0x278] sm:$0xff]  }
  0x74   : > { %v1581_v36 = vsel %vm814_vm3, %v1571_v26, %v1580_v42  ;;  %v1590_v63 = vsel %vm814_vm3, %v1580_v42, %v1589_v55  ;;  %v827_v26 = vshll.u32 %v5871_v15, 16  ;;  %v210_v15 = vld [vmem:[%s6717_s2] sm:$0xff]  ;;  %v833_v42 = vshrl.u32 %v5893_v31, 16 }
  0x75   : > { %1016 = vperm.xlu0 %5308, %v210_v15   ;;  %v5400_v31 = vld [vmem:[%s6716_s1 + $0x240] sm:$0xff]   ;;  %v6124_v15 = vld [vmem:[%s5582_s12 + $0xc] sm:$0xff]  }
  0x76   : > { %4568 = vmatmul.mubr.bf16.vlgmr.msra.gmra.mrb[0].mxu0 %v648_v28  ;;  %v818_v28 = vrot.slane %v816_v19, 1  ;;  %v829_v34 = vrot.slane %v827_v26, 2  ;;  %v835_v49 = vrot.slane %v833_v42, 1  ;;  %v5416_v42 = vld [vmem:[%s6716_s1 + $0x378] sm:$0xff]  }
  0x77   : > { %4712 = vmatmul.mubr.bf16.vlgmr.msra.gmra.mrb[0].mxu1 %v1572_v32  ;;  %4588 = vmatpush3.bf16.msra.mxu0 %v5375_v30  ;;  %v821_v30 = vrot.slane %v819_v20, 2  ;;  %v656_v32 = vsel %vm645_vm2, %v653_v4, %v655_v22  ;;  %v5409_v20 = vld [vmem:[%s6716_s1 + $0x360] sm:$0xff]   ;;  %v5410_v22 = vld [vmem:[%s6716_s1 + $0x268] sm:$0xff]  }
  0x78   : > { %4732 = vmatpush3.bf16.msra.mxu1 %v5376_v33  ;;  %4589 = vmatprep.subr.bf16.mxu0 %v5501_v1  ;;  %v826_v33 = vrot.slane %v824_v25, 1  ;;  %v839_v55 = vor.u32 %v838_v50, %v835_v49  ;;  %v6160_v49 = vld [vmem:[%s5582_s12 + $0x14] sm:$0xff]  }
  0x79   : > { %4571 = vmatprep.mubr.msk.bf16.mxu0 %vm5502_vm0, %v5501_v1  ;;  %4715 = vmatprep.mubr.msk.bf16.mxu1 %vm5502_vm0, %v5501_v1 }
  0x7a   : > { %4733 = vmatprep.subr.bf16.mxu1 %v5501_v1  ;;  %v830_v60 = vor.u32 %v829_v34, %v826_v33  ;;  %v5412_v33 = vld [vmem:[%s6716_s1 + $0x270] sm:$0xff]   ;;  %v1776_v34 = vrot.slane %v5958_v2, 2  ;;  %v2063_v2 = vshll.u32 %v6124_v15, 16 }
  0x7b   : > { %4590 = vmatpush3.bf16.msra.mxu0 %v5377_v39  ;;  %v211_v39 = vld [vmem:[%s6717_s2 + $0x8] sm:$0xff] }
  0x7c   : > { %4734 = vmatpush3.bf16.msra.mxu1 %v5380_v41  ;;  %4591 = vmatprep.subr.bf16.mxu0 %v5501_v1  ;;  %v822_v41 = vor.u32 %v821_v30, %v818_v28  ;;  %v1777_v50 = vsel %vm1766_vm4, %v1774_v14, %v1776_v34  ;;  %v5435_v34 = vld [vmem:[%s6716_s1 + $0x320] sm:$0xff]  }
  0x7d   : > { %4735 = vmatprep.subr.bf16.mxu1 %v5501_v1  ;;  %1021 = vperm.xlu0 %5308, %v211_v39   ;;  %v2052_v39 = vshrl.u32 %v6121_v52, 16 }
  0x7e   : > { %4572 = vmatmul.mubr.bf16.gmra.mrb[4].mxu0 %v650_v47  ;;  %v214_v47 = vld [vmem:[%s6717_s2 + $0x20] sm:$0xff] }
  0x7f   : > { %4716 = vmatmul.mubr.bf16.gmra.mrb[4].mxu1 %v1581_v36  ;;  %4592 = vmatpush3.bf16.msra.mxu0 %v5381_v24  ;;  %v1768_v24 = vrot.slane %v5838_v62, 2  ;;  %v831_v36 = vsel %vm814_vm3, %v822_v41, %v830_v60  ;;  %v2060_v41 = vshrl.u32 %v6124_v15, 16 }
  0x80   : > { %4736 = vmatpush3.bf16.msra.mxu1 %v5382_v45  ;;  %4575 = vmatprep.mubr.msk.bf16.mxu0 %vm5502_vm0, %v5501_v1  ;;  %v213_v45 = vld [vmem:[%s6717_s2 + $0x18] sm:$0xff] }
  0x81   : > { %4593 = vmatprep.subr.bf16.mxu0 %v5501_v1  ;;  %4719 = vmatprep.mubr.msk.bf16.mxu1 %vm5502_vm0, %v5501_v1  ;;  %v1769_v62 = vsel %vm1766_vm4, %v1767_v11, %v1768_v24  ;;  %v2875_v11 = vld [vmem:[%s5582_s12 + $0x4] sm:$0xc] }
  0x82   : > { %4737 = vmatprep.subr.bf16.mxu1 %v5501_v1  ;;  %1036 = vperm.xlu0 %5308, %v214_v47   ;;  %v2062_v47 = vrot.slane %v2060_v41, 1  ;;  %v2847_v41 = vld [vmem:[%s5582_s12 + $0x4] sm:$0xe] }
  0x83   : > { %4594 = vmatpush3.bf16.msra.mxu0 %v5384_v54  ;;  %1031 = vperm.xlu1 %5309, %v213_v45   ;;  %v842_v54 = vshrl.u32 %v5928_v48, 16  ;;  %v2057_v45 = vrot.slane %v2055_v40, 2 }
  0x84   : > { %4738 = vmatpush3.bf16.msra.mxu1 %v5386_v56  ;;  %4595 = vmatprep.subr.bf16.mxu0 %v5501_v1  ;;  %v845_v56 = vshll.u32 %v5928_v48, 16 }
  0x85   : > { %4739 = vmatprep.subr.bf16.mxu1 %v5501_v1  ;;  %v844_v48 = vrot.slane %v842_v54, 1 }
  0x86   : > { %4576 = vmatmul.mubr.bf16.gmra.mrb[8].mxu0 %v652_v29  ;;  %v216_v29 = vld [vmem:[%s6717_s2 + $0x30] sm:$0xff]  ;;  %v847_v0 = vrot.slane %v845_v56, 2  ;;  %v2072_v56 = vshll.u32 %v6160_v49, 16 }
  0x87   : > { %4720 = vmatmul.mubr.bf16.gmra.mrb[8].mxu1 %v1590_v63  ;;  %4596 = vmatpush3.bf16.msra.mxu0 %v5387_v58  ;;  %v1770_v58 = vrot.slane %v5875_v21, 2  ;;  %v5404_v21 = vld [vmem:[%s6716_s1 + $0x250] sm:$0xff]   ;;  %v840_v63 = vsel %vm814_vm3, %v830_v60, %v839_v55 }
  0x88   : > { %4579 = vmatprep.mubr.msk.bf16.mxu0 %vm5502_vm0, %v5501_v1  ;;  %4723 = vmatprep.mubr.msk.bf16.mxu1 %vm5502_vm0, %v5501_v1  ;;  %v848_v7 = vor.u32 %v847_v0, %v844_v48  ;;  %v2074_v48 = vrot.slane %v2072_v56, 2 }
  0x89   : > { %4740 = vmatpush3.bf16.msra.mxu1 %v5388_v3  ;;  %4597 = vmatprep.subr.bf16.mxu0 %v5501_v1  ;;  %v217_v3 = vld [vmem:[%s6717_s2 + $0x38] sm:$0xff]  ;;  %v1771_v4 = vsel %vm1766_vm4, %v1768_v24, %v1770_v58  ;;  %v2054_v24 = vrot.slane %v2052_v39, 1 }
  0x8a   : > { %4741 = vmatprep.subr.bf16.mxu1 %v5501_v1  ;;  %1041 = vperm.xlu1 %5309, %v215_v57   ;;  %v849_v17 = vsel %vm814_vm3, %v839_v55, %v848_v7  ;;  %v2069_v55 = vshrl.u32 %v6160_v49, 16 }
  0x8b   : > { %4598 = vmatpush3.bf16.msra.mxu0 %v5391_v5  ;;  %1046 = vperm.xlu0 %5308, %v216_v29   ;;  %v5405_v5 = vld [vmem:[%s6716_s1 + $0x350] sm:$0xff]   ;;  %v5422_v29 = vld [vmem:[%s6716_s1 + $0x200] sm:$0xff]  }
  0x8c   : > { %4599 = vmatprep.subr.bf16.mxu0 %v5501_v1 }
  0x8d   : > { %4742 = vmatpush3.bf16.msra.mxu1 %v5392_v8  ;;  %v854_v8 = vshll.u32 %v5952_v59, 16  ;;  %v5408_v59 = vld [vmem:[%s6716_s1 + $0x260] sm:$0xff]  }
  0x8e   : > { %4580 = vmatmul.mubr.bf16.gmra.mrb[12].mxu0 %v654_v9  ;;  %4743 = vmatprep.subr.bf16.mxu1 %v5501_v1  ;;  %v1772_v9 = vrot.slane %v5900_v37, 2  ;;  %v5413_v37 = vld [vmem:[%s5582_s12 + $0x2c] ss:$0 sps:$4 sm:$0x33]  }
  0x8f   : > { %4724 = vmatmul.mubr.bf16.gmra.mrb[12].mxu1 %v1599_v10  ;;  %4583 = vmatprep.mubr.msk.bf16.mxu0 %vm5502_vm0, %v5501_v1  ;;  %v5407_v10 = vld [vmem:[%s6716_s1 + $0x358] sm:$0xff]   ;;  %v856_v19 = vrot.slane %v854_v8, 2  ;;  %v860_v25 = vshrl.u32 %v5413_v37, 16  ;;  %v863_v26 = vshll.u32 %v5413_v37, 16  ;;  %v6210_v37 = vld [vmem:[%s5582_s12 + $0x24] sm:$0xff]  }
  0x90   : > { %4600 = vmatpush3.bf16.msra.mxu0 %v5393_v12  ;;  %4727 = vmatprep.mubr.msk.bf16.mxu1 %vm5502_vm0, %v5501_v1  ;;  %v219_v12 = vld [vmem:[%s6717_s2 + $0x48] sm:$0xff]  ;;  %v1775_v46 = vsel %vm1766_vm4, %v1772_v9, %v1774_v14 }
  0x91   : > { %4744 = vmatpush3.bf16.msra.mxu1 %v5396_v16  ;;  %4601 = vmatprep.subr.bf16.mxu0 %v5501_v1  ;;  %v1773_v16 = vsel %vm1766_vm4, %v1770_v58, %v1772_v9  ;;  %v862_v30 = vrot.slane %v860_v25, 1 }
  0x92   : > { %4745 = vmatprep.subr.bf16.mxu1 %v5501_v1  ;;  %1051 = vperm.xlu1 %5309, %v217_v3   ;;  %v5423_v3 = vld [vmem:[%s6716_s1 + $0x300] sm:$0xff]  }
  0x93   : > { %1056 = vperm.xlu0 %5308, %v218_v44   ;;  %v5427_v44 = vld [vmem:[%s6716_s1 + $0x308] sm:$0xff]  }
  0x94   : > { %4602 = vmatpush3.bf16.msra.mxu0 %v5397_v23  ;;  %v857_v23 = vor.u32 %v856_v19, %v853_v18  ;;  %v5429_v18 = vld [vmem:[%s6716_s1 + $0x310] sm:$0xff]   ;;  %v6218_v19 = vld [vmem:[%s5582_s12 + $0x1c] sm:$0xff]  }
  0x95   : > { %4746 = vmatpush3.bf16.msra.mxu1 %v5398_v27  ;;  %4767 = vmatprep.subr.bf16.mxu0 %v5501_v1  ;;  %v5411_v27 = vld [vmem:[%s6716_s1 + $0x368] sm:$0xff]   ;;  %v2926_v25 = vrot.slane %v6218_v19, 2 }
  0x96   : > { %4584 = vmatmul.mubr.bf16.gmra.mrb[16].mxu0 %v656_v32  ;;  %4911 = vmatprep.subr.bf16.mxu1 %v5501_v1  ;;  %v858_v28 = vsel %vm814_vm3, %v848_v7, %v857_v23  ;;  %v865_v32 = vrot.slane %v863_v26, 2  ;;  %v5433_v26 = vld [vmem:[%s6716_s1 + $0x318] sm:$0xff]  }
  0x97   : > { %4728 = vmatmul.mubr.bf16.gmra.mrb[16].mxu1 %v1608_v35  ;;  %4603 = vmatprep.mubr.msk.bf16.mxu0 %vm5502_vm0, %v5501_v1  ;;  %v5414_v35 = vld [vmem:[%s6716_s1 + $0x370] sm:$0xff]  }
  0x98   : > { %4747 = vmatprep.mubr.msk.bf16.mxu1 %vm5502_vm0, %v5501_v1  ;;  %1061 = vperm.xlu1 %5309, %v219_v12   ;;  %v866_v60 = vor.u32 %v865_v32, %v862_v30  ;;  %v5441_v32 = vld [vmem:[%s5582_s12 + $0x2c] ss:$0 sps:$4 sm:$0x33]  }
  0x99   : > { %v2096_v39 = vshrl.u32 %v5441_v32, 16  ;;  %v2099_v40 = vshll.u32 %v5441_v32, 16 }
  0x9e   : > { %4604 = vmatmul.mubr.bf16.vlgmr.msra.gmra.mrb[0].mxu0 %v831_v36  ;;  %v867_v36 = vsel %vm814_vm3, %v857_v23, %v866_v60  ;;  %v2090_v23 = vshll.u32 %v6210_v37, 16  ;;  %v5439_v60 = vld [vmem:[%s6716_s1 + $0x328] sm:$0xff]  }
  0x9f   : > { %4748 = vmatmul.mubr.bf16.vlgmr.msra.gmra.mrb[0].mxu1 %v1769_v62  ;;  %4768 = vmatpush3.bf16.msra.mxu0 %v5400_v31  ;;  %v2065_v31 = vrot.slane %v2063_v2, 2  ;;  %v4181_v62 = vcombine.low %v2875_v11, %v6153_v43 }
  0xa0   : > { %4912 = vmatpush3.bf16.msra.mxu1 %v5401_v13  ;;  %4769 = vmatprep.subr.bf16.mxu0 %v5501_v1  ;;  %v6165_v13 = vld [vmem:[%s5582_s12 + $0xc] sm:$0xff]   ;;  %v2092_v30 = vrot.slane %v2090_v23, 2 }
  0xa1   : > { %4607 = vmatprep.mubr.msk.bf16.mxu0 %vm5502_vm0, %v5501_v1  ;;  %4751 = vmatprep.mubr.msk.bf16.mxu1 %vm5502_vm0, %v5501_v1  ;;  %v2066_v54 = vor.u32 %v2065_v31, %v2062_v47  ;;  %v2921_v57 = vrot.slane %v4181_v62, 2  ;;  %v2922_v58 = vrot.slane %v6165_v13, 2  ;;  %v6272_v31 = vld [vmem:[%s5582_s12 + $0x2c] ss:$0 sps:$4 sm:$0x33]   ;;  %v3070_v56 = vshrl.u32 %v6165_v13, 16 }
  0xa2   : > { %4913 = vmatprep.subr.bf16.mxu1 %v5501_v1 }
  0xa3   : > { %4770 = vmatpush3.bf16.msra.mxu0 %v5402_v53  ;;  %v2058_v53 = vor.u32 %v2057_v45, %v2054_v24  ;;  %v2923_v0 = vsel %vm1766_vm4, %v2921_v57, %v2922_v58  ;;  %v2098_v24 = vrot.slane %v2096_v39, 1  ;;  %v2101_v45 = vrot.slane %v2099_v40, 2  ;;  %v5455_v39 = vld [vmem:[%s6716_s1 + $0x3a0] sm:$0xff]  }
  0xa4   : > { %4914 = vmatpush3.bf16.msra.mxu1 %v5403_v51  ;;  %4771 = vmatprep.subr.bf16.mxu0 %v5501_v1  ;;  %v3073_v57 = vshll.u32 %v6165_v13, 16  ;;  %v2233_v13 = vrot.slane %v6121_v52, 1  ;;  %v5447_v52 = vld [vmem:[%s6716_s1 + $0x380] sm:$0xff]   ;;  %v2240_v40 = vrot.slane %v6210_v37, 1 }
  0xa5   : > { %4915 = vmatprep.subr.bf16.mxu1 %v5501_v1  ;;  %v2067_v51 = vsel %vm814_vm3, %v2058_v53, %v2066_v54  ;;  %v2930_v53 = vrot.slane %v6272_v31, 2 }
  0xa6   : > { %4608 = vmatmul.mubr.bf16.gmra.mrb[4].mxu0 %v840_v63  ;;  %v6181_v63 = vld [vmem:[%s5582_s12 + $0x1c] sm:$0xff]  }
  0xa7   : > { %4752 = vmatmul.mubr.bf16.gmra.mrb[4].mxu1 %v1771_v4  ;;  %4772 = vmatpush3.bf16.msra.mxu0 %v5404_v21  ;;  %v2071_v21 = vrot.slane %v2069_v55, 1  ;;  %v6188_v4 = vld [vmem:[%s5582_s12 + $0x14] sm:$0xff]   ;;  %v2078_v6 = vshrl.u32 %v6181_v63, 16  ;;  %v2081_v7 = vshll.u32 %v6181_v63, 16 }
  0xa8   : > { %4916 = vmatpush3.bf16.msra.mxu1 %v5405_v5  ;;  %4611 = vmatprep.mubr.msk.bf16.mxu0 %vm5502_vm0, %v5501_v1  ;;  %v5424_v5 = vld [vmem:[%s6716_s1 + $0x208] sm:$0xff]   ;;  %v2924_v8 = vrot.slane %v6188_v4, 2 }
  0xa9   : > { %4755 = vmatprep.mubr.msk.bf16.mxu1 %vm5502_vm0, %v5501_v1  ;;  %4773 = vmatprep.subr.bf16.mxu0 %v5501_v1  ;;  %v2080_v12 = vrot.slane %v2078_v6, 1 }
  0xaa   : > { %4917 = vmatprep.subr.bf16.mxu1 %v5501_v1 }
  0xab   : > { %4774 = vmatpush3.bf16.msra.mxu0 %v5406_v61  ;;  %v2075_v61 = vor.u32 %v2074_v48, %v2071_v21 }
  0xac   : > { %4918 = vmatpush3.bf16.msra.mxu1 %v5407_v10  ;;  %4775 = vmatprep.subr.bf16.mxu0 %v5501_v1  ;;  %v5428_v10 = vld [vmem:[%s6716_s1 + $0x210] sm:$0xff]  }
  0xad   : > { %4919 = vmatprep.subr.bf16.mxu1 %v5501_v1  ;;  %v2076_v9 = vsel %vm814_vm3, %v2066_v54, %v2075_v61  ;;  %v5444_v54 = vld [vmem:[%s6716_s1 + $0x238] sm:$0xff]  }
  0xae   : > { %4612 = vmatmul.mubr.bf16.gmra.mrb[8].mxu0 %v849_v17  ;;  %v2925_v17 = vsel %vm1766_vm4, %v2922_v58, %v2924_v8  ;;  %v5445_v58 = vld [vmem:[%s6716_s1 + $0x338] sm:$0xff]  }
  0xaf   : > { %4756 = vmatmul.mubr.bf16.gmra.mrb[8].mxu1 %v1773_v16  ;;  %4776 = vmatpush3.bf16.msra.mxu0 %v5408_v59  ;;  %v2083_v59 = vrot.slane %v2081_v7, 2  ;;  %v3079_v7 = vshrl.u32 %v6188_v4, 16 }
  0xb0   : > { %4615 = vmatprep.mubr.msk.bf16.mxu0 %vm5502_vm0, %v5501_v1  ;;  %4759 = vmatprep.mubr.msk.bf16.mxu1 %vm5502_vm0, %v5501_v1 }
  0xb1   : > { %4920 = vmatpush3.bf16.msra.mxu1 %v5409_v20  ;;  %4777 = vmatprep.subr.bf16.mxu0 %v5501_v1  ;;  %v2084_v16 = vor.u32 %v2083_v59, %v2080_v12  ;;  %v5431_v20 = vld [vmem:[%s6716_s1 + $0x218] sm:$0xff]   ;;  %v2236_v59 = vrot.slane %v6160_v49, 1 }
  0xb2   : > { %4921 = vmatprep.subr.bf16.mxu1 %v5501_v1 }
  0xb3   : > { %4778 = vmatpush3.bf16.msra.mxu0 %v5410_v22  ;;  %v2087_v22 = vshrl.u32 %v6210_v37, 16  ;;  %v2085_v14 = vsel %vm814_vm3, %v2075_v61, %v2084_v16  ;;  %v5457_v37 = vld [vmem:[%s6716_s1 + $0x3a8] sm:$0xff]  }
  0xb4   : > { %4779 = vmatprep.subr.bf16.mxu0 %v5501_v1 }
  0xb5   : > { %4922 = vmatpush3.bf16.msra.mxu1 %v5411_v27  ;;  %v5434_v27 = vld [vmem:[%s6716_s1 + $0x220] sm:$0xff]  }
  0xb6   : > { %4616 = vmatmul.mubr.bf16.gmra.mrb[12].mxu0 %v858_v28  ;;  %4923 = vmatprep.subr.bf16.mxu1 %v5501_v1  ;;  %v2089_v28 = vrot.slane %v2087_v22, 1  ;;  %v5450_v22 = vld [vmem:[%s6716_s1 + $0x290] sm:$0xff]  }
  0xb7   : > { %4760 = vmatmul.mubr.bf16.gmra.mrb[12].mxu1 %v1775_v46  ;;  %4619 = vmatprep.mubr.msk.bf16.mxu0 %vm5502_vm0, %v5501_v1  ;;  %v2927_v46 = vsel %vm1766_vm4, %v2924_v8, %v2926_v25  ;;  %v3082_v8 = vshll.u32 %v6188_v4, 16  ;;  %v5448_v4 = vld [vmem:[%s6716_s1 + $0x288] sm:$0xff]  }
  0xb8   : > { %4763 = vmatprep.mubr.msk.bf16.mxu1 %vm5502_vm0, %v5501_v1  ;;  %4780 = vmatpush3.bf16.msra.mxu0 %v5412_v33  ;;  %v6244_v33 = vld [vmem:[%s5582_s12 + $0x24] sm:$0xff]  }
  0xb9   : > { %4924 = vmatpush3.bf16.msra.mxu1 %v5414_v35  ;;  %4781 = vmatprep.subr.bf16.mxu0 %v5501_v1  ;;  %v2093_v35 = vor.u32 %v2092_v30, %v2089_v28  ;;  %v2928_v2 = vrot.slane %v6244_v33, 2  ;;  %v3084_v12 = vrot.slane %v3082_v8, 2  ;;  %v5453_v30 = vld [vmem:[%s6716_s1 + $0x398] sm:$0xff]   ;;  %v3097_v32 = vshrl.u32 %v6244_v33, 16 }
  0xba   : > { %4925 = vmatprep.subr.bf16.mxu1 %v5501_v1 }
  0xbb   : > { %v2094_v11 = vsel %vm814_vm3, %v2084_v16, %v2093_v35  ;;  %v2929_v47 = vsel %vm1766_vm4, %v2926_v25, %v2928_v2  ;;  %v2931_v21 = vsel %vm1766_vm4, %v2928_v2, %v2930_v53  ;;  %v3088_v16 = vshrl.u32 %v6218_v19, 16  ;;  %v6391_v53 = vld [vmem:[%s5582_s12 + $0x10] sm:$0xff]  }
  0xbc   : > { %4782 = vmatpush3.bf16.msra.mxu0 %v5415_v38  ;;  %v5438_v38 = vld [vmem:[%s6716_s1 + $0x228] sm:$0xff]   ;;  %v3106_v2 = vshrl.u32 %v6272_v31, 16 }
  0xbd   : > { %4926 = vmatpush3.bf16.msra.mxu1 %v5416_v42  ;;  %4803 = vmatprep.subr.bf16.mxu0 %v5501_v1  ;;  %v4195_v42 = vcombine.low %v2847_v41, %v6153_v43  ;;  %v5443_v43 = vld [vmem:[%s6716_s1 + $0x330] sm:$0xff]   ;;  %v3090_v25 = vrot.slane %v3088_v16, 1  ;;  %v5456_v41 = vld [vmem:[%s6716_s1 + $0x2a8] sm:$0xff]  }
  0xbe   : > { %4620 = vmatmul.mubr.bf16.gmra.mrb[16].mxu0 %v867_v36  ;;  %4947 = vmatprep.subr.bf16.mxu1 %v5501_v1  ;;  %v5440_v36 = vld [vmem:[%s6716_s1 + $0x230] sm:$0xff]  }
  0xbf   : > { %4764 = vmatmul.mubr.bf16.gmra.mrb[16].mxu1 %v1777_v50  ;;  %4783 = vmatprep.mubr.msk.bf16.mxu0 %vm5502_vm0, %v5501_v1  ;;  %v2102_v50 = vor.u32 %v2101_v45, %v2098_v24  ;;  %v3062_v62 = vshrl.u32 %v4195_v42, 16  ;;  %v3065_v55 = vshll.u32 %v4195_v42, 16  ;;  %v6379_v24 = vld [vmem:[%s5582_s12 + $0xc] sm:$0xf] }
  0xc0   : > { %4927 = vmatprep.mubr.msk.bf16.mxu1 %vm5502_vm0, %v5501_v1 }
  0xc1   : > { %v3067_v48 = vrot.slane %v3065_v55, 2 }
  0xc6   : > { %4784 = vmatmul.mubr.bf16.vlgmr.msra.gmra.mrb[20].mxu0 %v2067_v51  ;;  %v2103_v51 = vsel %vm814_vm3, %v2093_v35, %v2102_v50  ;;  %v5458_v50 = vld [vmem:[%s6716_s1 + $0x2b0] sm:$0xff]  }
  0xc7   : > { %4928 = vmatmul.mubr.bf16.vlgmr.msra.gmra.mrb[20].mxu1 %v2923_v0  ;;  %4804 = vmatpush3.bf16.msra.mxu0 %v5422_v29  ;;  %v3064_v29 = vrot.slane %v3062_v62, 1  ;;  %v3072_v0 = vrot.slane %v3070_v56, 1 }
  0xc8   : > { %4948 = vmatpush3.bf16.msra.mxu1 %v5423_v3  ;;  %4805 = vmatprep.subr.bf16.mxu0 %v5501_v1  ;;  %v3075_v3 = vrot.slane %v3073_v57, 2  ;;  %v5461_v57 = vld [vmem:[%s6716_s1 + $0x2b8] sm:$0xff]  }
  0xc9   : > { %4787 = vmatprep.mubr.msk.bf16.mxu0 %vm5502_vm0, %v5501_v1  ;;  %4931 = vmatprep.mubr.msk.bf16.mxu1 %vm5502_vm0, %v5501_v1  ;;  %v3068_v61 = vor.u32 %v3067_v48, %v3064_v29  ;;  %v3305_v29 = vshrl.u32 %v6391_v53, 16  ;;  %v5462_v48 = vld [vmem:[%s6716_s1 + $0x3b8] sm:$0xff]  }
  0xca   : > { %4949 = vmatprep.subr.bf16.mxu1 %v5501_v1  ;;  %v3076_v6 = vor.u32 %v3075_v3, %v3072_v0 }
  0xcb   : > { %4806 = vmatpush3.bf16.msra.mxu0 %v5424_v5  ;;  %v2234_v5 = vrot.slane %v6124_v15, 1  ;;  %v3081_v15 = vrot.slane %v3079_v7, 1  ;;  %v3307_v7 = vrot.slane %v3305_v29, 2  ;;  %v5486_v29 = vld [vmem:[%s5582_s12 + $0x30] ss:$0 sps:$4 sm:$0x33]  }
  0xcc   : > { %4950 = vmatpush3.bf16.msra.mxu1 %v5427_v44  ;;  %4807 = vmatprep.subr.bf16.mxu0 %v5501_v1 }
  0xcd   : > { %4951 = vmatprep.subr.bf16.mxu1 %v5501_v1  ;;  %v2235_v44 = vsel %vm645_vm2, %v2233_v13, %v2234_v5  ;;  %v2237_v49 = vsel %vm645_vm2, %v2234_v5, %v2236_v59  ;;  %v6414_v13 = vld [vmem:[%s5582_s12 + $0x8] sm:$0xfc]   ;;  %v6417_v5 = vld [vmem:[%s5582_s12 + $0x10] sm:$0xff]  }
  0xce   : > { %4788 = vmatmul.mubr.bf16.gmra.mrb[24].mxu0 %v2076_v9  ;;  %v5446_v9 = vld [vmem:[%s6716_s1 + $0x280] sm:$0xff]  }
  0xcf   : > { %4932 = vmatmul.mubr.bf16.gmra.mrb[24].mxu1 %v2925_v17  ;;  %4808 = vmatpush3.bf16.msra.mxu0 %v5428_v10  ;;  %v3077_v10 = vsel %vm814_vm3, %v3068_v61, %v3076_v6  ;;  %v3085_v17 = vor.u32 %v3084_v12, %v3081_v15 }
  0xd0   : > { %4952 = vmatpush3.bf16.msra.mxu1 %v5429_v18  ;;  %4791 = vmatprep.mubr.msk.bf16.mxu0 %vm5502_vm0, %v5501_v1  ;;  %v5449_v18 = vld [vmem:[%s6716_s1 + $0x388] sm:$0xff]  }
  0xd1   : > { %4809 = vmatprep.subr.bf16.mxu0 %v5501_v1  ;;  %4935 = vmatprep.mubr.msk.bf16.mxu1 %vm5502_vm0, %v5501_v1  ;;  %v3086_v23 = vsel %vm814_vm3, %v3076_v6, %v3085_v17 }
  0xd2   : > { %4953 = vmatprep.subr.bf16.mxu1 %v5501_v1 }
  0xd3   : > { %4810 = vmatpush3.bf16.msra.mxu0 %v5431_v20  ;;  %v3091_v20 = vshll.u32 %v6218_v19, 16  ;;  %v5451_v19 = vld [vmem:[%s6716_s1 + $0x390] sm:$0xff]  }
  0xd4   : > { %4954 = vmatpush3.bf16.msra.mxu1 %v5433_v26  ;;  %4811 = vmatprep.subr.bf16.mxu0 %v5501_v1 }
  0xd5   : > { %4955 = vmatprep.subr.bf16.mxu1 %v5501_v1  ;;  %v3093_v26 = vrot.slane %v3091_v20, 2  ;;  %v5468_v20 = vld [vmem:[%s6716_s1 + $0x3c0] sm:$0xff]  }
  0xd6   : > { %4792 = vmatmul.mubr.bf16.gmra.mrb[28].mxu0 %v2085_v14  ;;  %v2238_v14 = vrot.slane %v6181_v63, 1 }
  0xd7   : > { %4936 = vmatmul.mubr.bf16.gmra.mrb[28].mxu1 %v2927_v46  ;;  %4812 = vmatpush3.bf16.msra.mxu0 %v5434_v27  ;;  %v5452_v27 = vld [vmem:[%s6716_s1 + $0x298] sm:$0xff]   ;;  %v3094_v28 = vor.u32 %v3093_v26, %v3090_v25  ;;  %v3100_v46 = vshll.u32 %v6244_v33, 16  ;;  %v3099_v33 = vrot.slane %v3097_v32, 1  ;;  %v5473_v32 = vld [vmem:[%s6716_s1 + $0x2d0] sm:$0xff]  }
  0xd8   : > { %4795 = vmatprep.mubr.msk.bf16.mxu0 %vm5502_vm0, %v5501_v1  ;;  %4939 = vmatprep.mubr.msk.bf16.mxu1 %vm5502_vm0, %v5501_v1  ;;  %v2239_v63 = vsel %vm645_vm2, %v2236_v59, %v2238_v14  ;;  %v2241_v45 = vsel %vm645_vm2, %v2238_v14, %v2240_v40  ;;  %v5472_v14 = vld [vmem:[%s6716_s1 + $0x3c8] sm:$0xff]  }
  0xd9   : > { %4956 = vmatpush3.bf16.msra.mxu1 %v5435_v34  ;;  %4813 = vmatprep.subr.bf16.mxu0 %v5501_v1  ;;  %v5454_v34 = vld [vmem:[%s6716_s1 + $0x2a0] sm:$0xff]   ;;  %v3095_v35 = vsel %vm814_vm3, %v3085_v17, %v3094_v28 }
  0xda   : > { %4957 = vmatprep.subr.bf16.mxu1 %v5501_v1  ;;  %v5467_v17 = vld [vmem:[%s6716_s1 + $0x2c0] sm:$0xff]  }
  0xdb   : > { %4814 = vmatpush3.bf16.msra.mxu0 %v5438_v38  ;;  %v3102_v38 = vrot.slane %v3100_v46, 2  ;;  %v6466_v46 = vld [vmem:[%s5582_s12 + $0x20] sm:$0xff]  }
  0xdc   : > { %4815 = vmatprep.subr.bf16.mxu0 %v5501_v1 }
  0xdd   : > { %4958 = vmatpush3.bf16.msra.mxu1 %v5439_v60  ;;  %v3109_v60 = vshll.u32 %v6272_v31, 16  ;;  %v3103_v42 = vor.u32 %v3102_v38, %v3099_v33  ;;  %v6474_v38 = vld [vmem:[%s5582_s12 + $0x28] sm:$0xff]  }
  0xde   : > { %4796 = vmatmul.mubr.bf16.gmra.mrb[32].mxu0 %v2094_v11  ;;  %4959 = vmatprep.subr.bf16.mxu1 %v5501_v1  ;;  %v3240_v11 = vld [vmem:[%s5582_s12 + $0x8] sm:$0xc] }
  0xdf   : > { %4940 = vmatmul.mubr.bf16.gmra.mrb[32].mxu1 %v2929_v47  ;;  %4799 = vmatprep.mubr.msk.bf16.mxu0 %vm5502_vm0, %v5501_v1  ;;  %v5459_v47 = vld [vmem:[%s5582_s12 + $0x2c] ss:$0 sps:$4 sm:$0x11]   ;;  %v3111_v31 = vrot.slane %v3109_v60, 2  ;;  %v4220_v62 = vcombine.low %v3240_v11, %v6379_v24  ;;  %v3332_v60 = vshrl.u32 %v6474_v38, 16  ;;  %v5479_v11 = vld [vmem:[%s6716_s1 + $0x2e0] sm:$0xff]  }
  0xe0   : > { %4816 = vmatpush3.bf16.msra.mxu0 %v5440_v36  ;;  %4943 = vmatprep.mubr.msk.bf16.mxu1 %vm5502_vm0, %v5501_v1  ;;  %v3108_v36 = vrot.slane %v3106_v2, 1  ;;  %v2242_v55 = vrot.slane %v5459_v47, 1  ;;  %v5478_v2 = vld [vmem:[%s6716_s1 + $0x3d8] sm:$0xff]  }
  0xe1   : > { %4960 = vmatpush3.bf16.msra.mxu1 %v5443_v43  ;;  %4817 = vmatprep.subr.bf16.mxu0 %v5501_v1  ;;  %v3104_v43 = vsel %vm814_vm3, %v3094_v28, %v3103_v42 }
  0xe2   : > { %4961 = vmatprep.subr.bf16.mxu1 %v5501_v1  ;;  %v3112_v56 = vor.u32 %v3111_v31, %v3108_v36  ;;  %v2243_v0 = vsel %vm645_vm2, %v2240_v40, %v2242_v55  ;;  %v5476_v40 = vld [vmem:[%s6716_s1 + $0x2d8] sm:$0xff]   ;;  %v3334_v36 = vrot.slane %v3332_v60, 2 }
  0xe4   : > { %4818 = vmatpush3.bf16.msra.mxu0 %v5444_v54  ;;  %v5460_v54 = vld [vmem:[%s6716_s1 + $0x3b0] sm:$0xff]   ;;  %v3113_v3 = vsel %vm814_vm3, %v3103_v42, %v3112_v56  ;;  %v3335_v42 = vshll.u32 %v6474_v38, 16 }
  0xe5   : > { %4962 = vmatpush3.bf16.msra.mxu1 %v5445_v58  ;;  %4839 = vmatprep.subr.bf16.mxu0 %v5501_v1  ;;  %v3297_v58 = vshrl.u32 %v4220_v62, 16 }
  0xe6   : > { %4800 = vmatmul.mubr.bf16.gmra.mrb[36].mxu0 %v2103_v51  ;;  %4983 = vmatprep.subr.bf16.mxu1 %v5501_v1  ;;  %v3300_v51 = vshll.u32 %v4220_v62, 16  ;;  %v3337_v31 = vrot.slane %v3335_v42, 3 }
  0xe7   : > { %4944 = vmatmul.mubr.bf16.gmra.mrb[36].mxu1 %v2931_v21  ;;  %4819 = vmatprep.mubr.msk.bf16.mxu0 %vm5502_vm0, %v5501_v1  ;;  %v3308_v21 = vshll.u32 %v6391_v53, 16  ;;  %v3299_v61 = vrot.slane %v3297_v58, 2  ;;  %v5484_v58 = vld [vmem:[%s6716_s1 + $0x3e8] sm:$0xff]  }
  0xe8   : > { %4963 = vmatprep.mubr.msk.bf16.mxu1 %vm5502_vm0, %v5501_v1  ;;  %v3302_v6 = vrot.slane %v3300_v51, 3  ;;  %v3338_v55 = vor.u32 %v3337_v31, %v3334_v36 }
  0xe9   : > { %v3310_v8 = vrot.slane %v3308_v21, 3 }
  0xeb   : > { %v3311_v15 = vor.u32 %v3310_v8, %v3307_v7  ;;  %v2435_v7 = vrot.slane %v5486_v29, 2  ;;  %v2599_v8 = vshll.u32 %v6414_v13, 16  ;;  %v6606_v29 = vpop.permute.xlu1 %1026 }
  0xee   : > { %4820 = vmatmul.mubr.bf16.vlgmr.msra.gmra.mrb[20].mxu0 %v2235_v44  ;;  %v6420_v44 = vld [vmem:[%s5582_s12 + $0x18] sm:$0xff]  }
  0xef   : > { %4964 = vmatmul.mubr.bf16.vlgmr.msra.gmra.mrb[20].mxu1 %v3077_v10  ;;  %4840 = vmatpush3.bf16.msra.mxu0 %v5446_v9  ;;  %v2426_v9 = vrot.slane %v6414_v13, 2  ;;  %v2427_v10 = vrot.slane %v6417_v5, 2  ;;  %v3314_v12 = vshrl.u32 %v6420_v44, 16 }
  0xf0   : > { %4984 = vmatpush3.bf16.msra.mxu1 %v5447_v52  ;;  %4841 = vmatprep.subr.bf16.mxu0 %v5501_v1  ;;  %v3303_v52 = vor.u32 %v3302_v6, %v3299_v61  ;;  %v5488_v61 = vld [vmem:[%s6716_s1 + $0x3f0] sm:$0xff]   ;;  %v2596_v6 = vshrl.u32 %v6414_v13, 16  ;;  %v5490_v13 = vld [vmem:[%s6716_s1 + $0x3f8] sm:$0xff]  }
  0xf1   : > { %4823 = vmatprep.mubr.msk.bf16.mxu0 %vm5502_vm0, %v5501_v1  ;;  %4967 = vmatprep.mubr.msk.bf16.mxu1 %vm5502_vm0, %v5501_v1  ;;  %v2428_v59 = vsel %vm1766_vm4, %v2426_v9, %v2427_v10  ;;  %v2604_v9 = vshrl.u32 %v6417_v5, 16 }
  0xf2   : > { %4985 = vmatprep.subr.bf16.mxu1 %v5501_v1  ;;  %v3312_v16 = vsel %vm2594_vm5, %v3303_v52, %v3311_v15 }
  0xf3   : > { %4842 = vmatpush3.bf16.msra.mxu0 %v5448_v4  ;;  %v3317_v4 = vshll.u32 %v6420_v44, 16 }
  0xf4   : > { %4986 = vmatpush3.bf16.msra.mxu1 %v5449_v18  ;;  %4843 = vmatprep.subr.bf16.mxu0 %v5501_v1  ;;  %v6437_v18 = vld [vmem:[%s5582_s12 + $0x18] sm:$0xff]  }
  0xf5   : > { %4987 = vmatprep.subr.bf16.mxu1 %v5501_v1  ;;  %v2429_v25 = vrot.slane %v6437_v18, 2 }
  0xf6   : > { %4824 = vmatmul.mubr.bf16.gmra.mrb[24].mxu0 %v2237_v49  ;;  %v3316_v49 = vrot.slane %v3314_v12, 2  ;;  %v3485_v12 = vld [vmem:[%s5582_s12 + $0x8] sm:$0x8] }
  0xf7   : > { %4968 = vmatmul.mubr.bf16.gmra.mrb[24].mxu1 %v3086_v23  ;;  %4844 = vmatpush3.bf16.msra.mxu0 %v5450_v22  ;;  %v3319_v22 = vrot.slane %v3317_v4, 3  ;;  %v6444_v23 = vld [vmem:[%s5582_s12 + $0x20] sm:$0xff]  }
  0xf8   : > { %4988 = vmatpush3.bf16.msra.mxu1 %v5451_v19  ;;  %4827 = vmatprep.mubr.msk.bf16.mxu0 %vm5502_vm0, %v5501_v1  ;;  %v5469_v19 = vld [vmem:[%s6716_s1 + $0x2c8] sm:$0xff]   ;;  %v3326_v28 = vshll.u32 %v6444_v23, 16 }
  0xf9   : > { %4845 = vmatprep.subr.bf16.mxu0 %v5501_v1  ;;  %4971 = vmatprep.mubr.msk.bf16.mxu1 %vm5502_vm0, %v5501_v1  ;;  %v3320_v26 = vor.u32 %v3319_v22, %v3316_v49  ;;  %v4250_v49 = vcombine.low %v3485_v12, %v6379_v24 }
  0xfa   : > { %4989 = vmatprep.subr.bf16.mxu1 %v5501_v1  ;;  %v3328_v33 = vrot.slane %v3326_v28, 3 }
  0xfb   : > { %4846 = vmatpush3.bf16.msra.mxu0 %v5452_v27  ;;  %v3323_v27 = vshrl.u32 %v6444_v23, 16 }
  0xfc   : > { %4990 = vmatpush3.bf16.msra.mxu1 %v5453_v30  ;;  %4847 = vmatprep.subr.bf16.mxu0 %v5501_v1  ;;  %v2430_v30 = vsel %vm1766_vm4, %v2427_v10, %v2429_v25  ;;  %v2607_v10 = vshll.u32 %v6417_v5, 16  ;;  %v2598_v5 = vrot.slane %v2596_v6, 2 }
  0xfd   : > { %4991 = vmatprep.subr.bf16.mxu1 %v5501_v1 }
  0xfe   : > { %4828 = vmatmul.mubr.bf16.gmra.mrb[28].mxu0 %v2239_v63  ;;  %v3321_v63 = vsel %vm2594_vm5, %v3311_v15, %v3320_v26  ;;  %v5489_v15 = vld [vmem:[%s6716_s1 + $0x2f8] sm:$0xff]  }
  0xff   : > { %4972 = vmatmul.mubr.bf16.gmra.mrb[28].mxu1 %v3095_v35  ;;  %4848 = vmatpush3.bf16.msra.mxu0 %v5454_v34  ;;  %v5474_v34 = vld [vmem:[%s6716_s1 + $0x3d0] sm:$0xff]   ;;  %v3325_v35 = vrot.slane %v3323_v27, 2  ;;  %v3508_v27 = vrot.slane %v6391_v53, 3  ;;  %v3510_v53 = vrot.slane %v6420_v44, 3  ;;  %v3512_v44 = vrot.slane %v6444_v23, 3 }
 0x100   : > { %4831 = vmatprep.mubr.msk.bf16.mxu0 %vm5502_vm0, %v5501_v1  ;;  %4975 = vmatprep.mubr.msk.bf16.mxu1 %vm5502_vm0, %v5501_v1  ;;  %v3514_v23 = vrot.slane %v6474_v38, 3 }
 0x101   : > { %4992 = vmatpush3.bf16.msra.mxu1 %v5455_v39  ;;  %4849 = vmatprep.subr.bf16.mxu0 %v5501_v1  ;;  %v2431_v39 = vrot.slane %v6466_v46, 2 }
 0x102   : > { %4993 = vmatprep.subr.bf16.mxu1 %v5501_v1 }
 0x103   : > { %4850 = vmatpush3.bf16.msra.mxu0 %v5456_v41  ;;  %v3329_v41 = vor.u32 %v3328_v33, %v3325_v35 }
 0x104   : > { %4851 = vmatprep.subr.bf16.mxu0 %v5501_v1 }
 0x105   : > { %4994 = vmatpush3.bf16.msra.mxu1 %v5457_v37  ;;  %v2432_v37 = vsel %vm1766_vm4, %v2429_v25, %v2431_v39  ;;  %v3330_v47 = vsel %vm2594_vm5, %v3320_v26, %v3329_v41  ;;  %v3339_v21 = vsel %vm2594_vm5, %v3329_v41, %v3338_v55  ;;  %v2613_v25 = vshrl.u32 %v6437_v18, 16 }
 0x106   : > { %4832 = vmatmul.mubr.bf16.gmra.mrb[32].mxu0 %v2241_v45  ;;  %4995 = vmatprep.subr.bf16.mxu1 %v5501_v1  ;;  %v6497_v45 = vld [vmem:[%s5582_s12 + $0x28] sm:$0xff]   ;;  %v2616_v26 = vshll.u32 %v6437_v18, 16  ;;  %v2622_v18 = vshrl.u32 %v6466_v46, 16 }
 0x107   : > { %4976 = vmatmul.mubr.bf16.gmra.mrb[32].mxu1 %v3104_v43  ;;  %4835 = vmatprep.mubr.msk.bf16.mxu0 %vm5502_vm0, %v5501_v1  ;;  %v6502_v43 = vld [vmem:[%s5582_s12 + $0x30] ss:$0 sps:$4 sm:$0x77]   ;;  %v2433_v62 = vrot.slane %v6497_v45, 2  ;;  %v2615_v28 = vrot.slane %v2613_v25, 2 }
 0x108   : > { %4852 = vmatpush3.bf16.msra.mxu0 %v5458_v50  ;;  %4979 = vmatprep.mubr.msk.bf16.mxu1 %vm5502_vm0, %v5501_v1  ;;  %v5480_v50 = vld [vmem:[%s6716_s1 + $0x3e0] sm:$0xff]   ;;  %v3341_v56 = vshrl.u32 %v6502_v43, 16  ;;  %v2624_v33 = vrot.slane %v2622_v18, 2 }
 0x109   : > { %4996 = vmatpush3.bf16.msra.mxu1 %v5460_v54  ;;  %4853 = vmatprep.subr.bf16.mxu0 %v5501_v1  ;;  %v5483_v54 = vld [vmem:[%s6716_s1 + $0x2e8] sm:$0xff]   ;;  %v2434_v51 = vsel %vm1766_vm4, %v2431_v39, %v2433_v62  ;;  %v2436_v4 = vsel %vm1766_vm4, %v2433_v62, %v2435_v7 }
 0x10a   : > { %4997 = vmatprep.subr.bf16.mxu1 %v5501_v1 }
 0x10c   : > { %4854 = vmatpush3.bf16.msra.mxu0 %v5461_v57  ;;  %v3344_v57 = vshll.u32 %v6502_v43, 16 }
 0x10d   : > { %4998 = vmatpush3.bf16.msra.mxu1 %v5462_v48  ;;  %4875 = vmatprep.subr.bf16.mxu0 %v5501_v1  ;;  %v5485_v48 = vld [vmem:[%s6716_s1 + $0x2f0] sm:$0xff]  }
 0x10e   : > { %4836 = vmatmul.mubr.bf16.gmra.mrb[36].mxu0 %v2243_v0  ;;  %5019 = vmatprep.subr.bf16.mxu1 %v5501_v1  ;;  %v3343_v0 = vrot.slane %v3341_v56, 2 }
 0x10f   : > { %4980 = vmatmul.mubr.bf16.gmra.mrb[36].mxu1 %v3113_v3  ;;  %4855 = vmatprep.mubr.msk.bf16.mxu0 %vm5502_vm0, %v5501_v1  ;;  %v3346_v3 = vrot.slane %v3344_v57, 3  ;;  %v3516_v57 = vrot.slane %v6502_v43, 3 }
 0x110   : > { %4999 = vmatprep.mubr.msk.bf16.mxu1 %vm5502_vm0, %v5501_v1 }
 0x111   : > { %v3347_v52 = vor.u32 %v3346_v3, %v3343_v0 }
 0x116   : > { %4856 = vmatmul.mubr.bf16.vlgmr.msra.gmra.mrb[20].mxu0 %v2428_v59  ;;  %v2601_v59 = vrot.slane %v2599_v8, 3 }
 0x117   : > { %5000 = vmatmul.mubr.bf16.vlgmr.msra.gmra.mrb[20].mxu1 %v3312_v16  ;;  %4876 = vmatpush3.bf16.msra.mxu0 %v5467_v17  ;;  %v2606_v17 = vrot.slane %v2604_v9, 2  ;;  %v2609_v16 = vrot.slane %v2607_v10, 3 }
 0x118   : > { %5020 = vmatpush3.bf16.msra.mxu1 %v5468_v20  ;;  %4877 = vmatprep.subr.bf16.mxu0 %v5501_v1  ;;  %v3348_v20 = vsel %vm2594_vm5, %v3338_v55, %v3347_v52  ;;  %v2602_v22 = vor.u32 %v2601_v59, %v2598_v5  ;;  %v3515_v55 = vsel %vm3506_vm6, %v3512_v44, %v3514_v23 }
 0x119   : > { %4859 = vmatprep.mubr.msk.bf16.mxu0 %vm5502_vm0, %v5501_v1  ;;  %5003 = vmatprep.mubr.msk.bf16.mxu1 %vm5502_vm0, %v5501_v1 }
 0x11a   : > { %5021 = vmatprep.subr.bf16.mxu1 %v5501_v1 }
 0x11b   : > { %4878 = vmatpush3.bf16.msra.mxu0 %v5469_v19  ;;  %v2610_v19 = vor.u32 %v2609_v16, %v2606_v17 }
 0x11c   : > { %5022 = vmatpush3.bf16.msra.mxu1 %v5472_v14  ;;  %4879 = vmatprep.subr.bf16.mxu0 %v5501_v1  ;;  %v3507_v14 = vrot.slane %v4250_v49, 3  ;;  %v6616_v49 = vpop.permute.xlu1 %1031 }
 0x11d   : > { %5023 = vmatprep.subr.bf16.mxu1 %v5501_v1  ;;  %v2611_v24 = vsel %vm2594_vm5, %v2602_v22, %v2610_v19 }
 0x11e   : > { %4860 = vmatmul.mubr.bf16.gmra.mrb[24].mxu0 %v2430_v30  ;;  %v2618_v30 = vrot.slane %v2616_v26, 3 }
 0x11f   : > { %5004 = vmatmul.mubr.bf16.gmra.mrb[24].mxu1 %v3321_v63  ;;  %4880 = vmatpush3.bf16.msra.mxu0 %v5473_v32  ;;  %v3509_v32 = vsel %vm3506_vm6, %v3507_v14, %v3508_v27 }
 0x120   : > { %5024 = vmatpush3.bf16.msra.mxu1 %v5474_v34  ;;  %4863 = vmatprep.mubr.msk.bf16.mxu0 %vm5502_vm0, %v5501_v1  ;;  %v2619_v63 = vor.u32 %v2618_v30, %v2615_v28  ;;  %v2625_v34 = vshll.u32 %v6466_v46, 16  ;;  %v2631_v46 = vshrl.u32 %v6497_v45, 16 }
 0x121   : > { %4881 = vmatprep.subr.bf16.mxu0 %v5501_v1  ;;  %5007 = vmatprep.mubr.msk.bf16.mxu1 %vm5502_vm0, %v5501_v1 }
 0x122   : > { %5025 = vmatprep.subr.bf16.mxu1 %v5501_v1  ;;  %v2620_v35 = vsel %vm2594_vm5, %v2610_v19, %v2619_v63  ;;  %v2627_v39 = vrot.slane %v2625_v34, 3  ;;  %v2633_v42 = vrot.slane %v2631_v46, 2 }
 0x123   : > { %4882 = vmatpush3.bf16.msra.mxu0 %v5476_v40  ;;  %v3511_v40 = vsel %vm3506_vm6, %v3508_v27, %v3510_v53 }
 0x124   : > { %5026 = vmatpush3.bf16.msra.mxu1 %v5478_v2  ;;  %4883 = vmatprep.subr.bf16.mxu0 %v5501_v1  ;;  %v2628_v41 = vor.u32 %v2627_v39, %v2624_v33  ;;  %v2634_v2 = vshll.u32 %v6497_v45, 16 }
 0x125   : > { %5027 = vmatprep.subr.bf16.mxu1 %v5501_v1 }
 0x126   : > { %4864 = vmatmul.mubr.bf16.gmra.mrb[28].mxu0 %v2432_v37  ;;  %v2629_v60 = vsel %vm2594_vm5, %v2619_v63, %v2628_v41  ;;  %v2636_v37 = vrot.slane %v2634_v2, 3 }
 0x127   : > { %5008 = vmatmul.mubr.bf16.gmra.mrb[28].mxu1 %v3330_v47  ;;  %4884 = vmatpush3.bf16.msra.mxu0 %v5479_v11  ;;  %v5492_v11 = vld [vmem:[%s5582_s12 + $0x30] ss:$0 sps:$4 sm:$0x77]   ;;  %v3513_v47 = vsel %vm3506_vm6, %v3510_v53, %v3512_v44  ;;  %s5296_s12 = smul.u32 320, %s6721_s16 }
 0x128   : > { %4867 = vmatprep.mubr.msk.bf16.mxu0 %vm5502_vm0, %v5501_v1  ;;  %5011 = vmatprep.mubr.msk.bf16.mxu1 %vm5502_vm0, %v5501_v1  ;;  %v2637_v36 = vor.u32 %v2636_v37, %v2633_v42  ;;  %v2640_v31 = vshrl.u32 %v5492_v11, 16  ;;  %v2643_v45 = vshll.u32 %v5492_v11, 16  ;;  %v6628_v11 = vpop.permute.xlu1 %1041 }
 0x129   : > { %5028 = vmatpush3.bf16.msra.mxu1 %v5480_v50  ;;  %4885 = vmatprep.subr.bf16.mxu0 %v5501_v1  ;;  %s6602_s22 = scalar_lea.vmem %s6718_s3, %s5296_s12 }
 0x12a   : > { %5029 = vmatprep.subr.bf16.mxu1 %v5501_v1  ;;  %v2638_v50 = vsel %vm2594_vm5, %v2628_v41, %v2637_v36  ;;  %v2642_v62 = vrot.slane %v2640_v31, 2 }
 0x12b   : > { %4886 = vmatpush3.bf16.msra.mxu0 %v5483_v54  ;;  %v2645_v54 = vrot.slane %v2643_v45, 3 }
 0x12c   : > { %4887 = vmatprep.subr.bf16.mxu0 %v5501_v1 }
 0x12d   : > { %5030 = vmatpush3.bf16.msra.mxu1 %v5484_v58  ;;  %v2646_v56 = vor.u32 %v2645_v54, %v2642_v62  ;;  %v3517_v58 = vsel %vm3506_vm6, %v3514_v23, %v3516_v57 }
 0x12e   : > { %4868 = vmatmul.mubr.bf16.gmra.mrb[32].mxu0 %v2434_v51  ;;  %5031 = vmatprep.subr.bf16.mxu1 %v5501_v1  ;;  %v6596_v51 = vpop.permute.xlu0 %1016 }
 0x12f   : > { %5012 = vmatmul.mubr.bf16.gmra.mrb[32].mxu1 %v3339_v21  ;;  %4871 = vmatprep.mubr.msk.bf16.mxu0 %vm5502_vm0, %v5501_v1  ;;  %v2647_v38 = vsel %vm2594_vm5, %v2637_v36, %v2646_v56 }
 0x130   : > { %4888 = vmatpush3.bf16.msra.mxu0 %v5485_v48  ;;  %5015 = vmatprep.mubr.msk.bf16.mxu1 %vm5502_vm0, %v5501_v1 }
 0x131   : > { %5032 = vmatpush3.bf16.msra.mxu1 %v5488_v61  ;;  %4889 = vmatprep.subr.bf16.mxu0 %v5501_v1 }
 0x132   : > { %5033 = vmatprep.subr.bf16.mxu1 %v5501_v1 }
 0x134   : > { %4890 = vmatpush3.bf16.msra.mxu0 %v5489_v15 }
 0x135   : > { %5034 = vmatpush3.bf16.msra.mxu1 %v5490_v13 }
 0x136   : > { %4872 = vmatmul.mubr.bf16.gmra.mrb[36].mxu0 %v2436_v4 }
 0x137   : > { %5016 = vmatmul.mubr.bf16.gmra.mrb[36].mxu1 %v3348_v20  ;;  %4891 = vmatprep.mubr.msk.bf16.mxu0 %vm5502_vm0, %v5501_v1 }
 0x138   : > { %5035 = vmatprep.mubr.msk.bf16.mxu1 %vm5502_vm0, %v5501_v1 }
 0x13e   : > { %4892 = vmatmul.mubr.bf16.vlgmr.msra.gmra.mrb[20].mxu0 %v2611_v24 }
 0x13f   : > { %5036 = vmatmul.mubr.bf16.vlgmr.msra.gmra.mrb[20].mxu1 %v3509_v32  ;;  %4895 = vmatprep.mubr.msk.bf16.mxu0 %vm5502_vm0, %v5501_v1 }
 0x140   : > { %5039 = vmatprep.mubr.msk.bf16.mxu1 %vm5502_vm0, %v5501_v1 }
 0x146   : > { %4896 = vmatmul.mubr.bf16.gmra.mrb[24].mxu0 %v2620_v35 }
 0x147   : > { %5040 = vmatmul.mubr.bf16.gmra.mrb[24].mxu1 %v3511_v40  ;;  %4899 = vmatprep.mubr.msk.bf16.mxu0 %vm5502_vm0, %v5501_v1 }
 0x148   : > { %5043 = vmatprep.mubr.msk.bf16.mxu1 %vm5502_vm0, %v5501_v1 }
 0x14e   : > { %4900 = vmatmul.mubr.bf16.gmra.mrb[28].mxu0 %v2629_v60 }
 0x14f   : > { %5044 = vmatmul.mubr.bf16.gmra.mrb[28].mxu1 %v3513_v47  ;;  %4903 = vmatprep.mubr.msk.bf16.mxu0 %vm5502_vm0, %v5501_v1 }
 0x150   : > { %5047 = vmatprep.mubr.msk.bf16.mxu1 %vm5502_vm0, %v5501_v1 }
 0x156   : > { %4904 = vmatmul.mubr.bf16.gmra.mrb[32].mxu0 %v2638_v50 }
 0x157   : > { %5048 = vmatmul.mubr.bf16.gmra.mrb[32].mxu1 %v3515_v55  ;;  %4907 = vmatprep.mubr.msk.bf16.mxu0 %vm5502_vm0, %v5501_v1 }
 0x158   : > { %5051 = vmatprep.mubr.msk.bf16.mxu1 %vm5502_vm0, %v5501_v1  ;;  %v6604_v1 = vpop.permute.xlu0 %1021 }
 0x15c   : > { %v6626_v44 = vpop.permute.xlu0 %1036 }
 0x15e   : > { %4908 = vmatmul.mubr.bf16.gmra.mrb[36].mxu0 %v2647_v38 }
 0x15f   : > { %5052 = vmatmul.mubr.bf16.gmra.mrb[36].mxu1 %v3517_v58 }
 0x171   : > { %v955_v43 = vpop.f32.mrb[0].mxu0 }
 0x172   : > { %1004 = vst [vmem:[%s6602_s22] sm:$0xff] %v955_v43  ;;  %v1064_v21 = vmul.f32 %v6596_v51, %v955_v43  ;;  %v1865_v48 = vpop.f32.mrb[0].mxu1  ;;  %v4605_v0 = vpop.f32.mrb[1].mxu0 }
 0x173   : > { %4019 = vst [vmem:[%s6602_s22 + $0x50] sm:$0xff] %v1865_v48  ;;  %v1925_v3 = vmul.f32 %v1865_v48, %v6596_v51  ;;  %v4749_v61 = vpop.f32.mrb[1].mxu1  ;;  %v958_v6 = vpop.f32.mrb[2].mxu0 }
 0x174   : > { %1005 = vst [vmem:[%s6602_s22 + $0x8] sm:$0xff] %v958_v6  ;;  %v1065_v7 = vmul.f32 %v6604_v1, %v958_v6  ;;  %v1868_v8 = vpop.f32.mrb[2].mxu1  ;;  %v4606_v9 = vpop.f32.mrb[3].mxu0  ;;  %v1090_v15 = vmul.f32 %v1064_v21, %v955_v43 }
 0x175   : > { %4020 = vst [vmem:[%s6602_s22 + $0x58] sm:$0xff] %v1868_v8  ;;  %v1926_v10 = vmul.f32 %v1868_v8, %v6604_v1  ;;  %v4750_v52 = vpop.f32.mrb[3].mxu1  ;;  %v1951_v5 = vmul.f32 %v1925_v3, %v1865_v48 }
 0x176   : > { %v1074_v13 = vadd.f32 %v1065_v7, %v1064_v21  ;;  %v1091_v12 = vmul.f32 %v1065_v7, %v958_v6 }
 0x177   : > { %v1935_v4 = vadd.f32 %v1926_v10, %v1925_v3  ;;  %v1952_v59 = vmul.f32 %v1926_v10, %v1868_v8  ;;  %v6638_v8 = vpop.permute.xlu0 %1046 }
 0x178   : > { %v1100_v17 = vadd.f32 %v1091_v12, %v1090_v15  ;;  %v6640_v15 = vpop.permute.xlu1 %1051 }
 0x179   : > { %v1961_v16 = vadd.f32 %v1952_v59, %v1951_v5  ;;  %v963_v20 = vpop.f32.mrb[4].mxu0 }
 0x17a   : > { %1006 = vst [vmem:[%s6602_s22 + $0x10] sm:$0xff] %v963_v20  ;;  %v1066_v22 = vmul.f32 %v6606_v29, %v963_v20  ;;  %v1873_v19 = vpop.f32.mrb[4].mxu1  ;;  %v4609_v25 = vpop.f32.mrb[5].mxu0 }
 0x17b   : > { %4021 = vst [vmem:[%s6602_s22 + $0x60] sm:$0xff] %v1873_v19  ;;  %v1927_v26 = vmul.f32 %v1873_v19, %v6606_v29  ;;  %v4753_v14 = vpop.f32.mrb[5].mxu1  ;;  %v966_v27 = vpop.f32.mrb[6].mxu0 }
 0x17c   : > { %v1075_v24 = vadd.f32 %v1074_v13, %v1066_v22  ;;  %v1092_v28 = vmul.f32 %v1066_v22, %v963_v20  ;;  %1007 = vst [vmem:[%s6602_s22 + $0x18] sm:$0xff] %v966_v27  ;;  %v1067_v30 = vmul.f32 %v6616_v49, %v966_v27  ;;  %v1876_v32 = vpop.f32.mrb[6].mxu1  ;;  %v4610_v63 = vpop.f32.mrb[7].mxu0 }
 0x17d   : > { %v1936_v18 = vadd.f32 %v1935_v4, %v1927_v26  ;;  %v1953_v34 = vmul.f32 %v1927_v26, %v1873_v19  ;;  %4022 = vst [vmem:[%s6602_s22 + $0x68] sm:$0xff] %v1876_v32  ;;  %v1928_v53 = vmul.f32 %v1876_v32, %v6616_v49  ;;  %v4754_v35 = vpop.f32.mrb[7].mxu1 }
 0x17e   : > { %v1101_v33 = vadd.f32 %v1100_v17, %v1092_v28  ;;  %v1076_v39 = vadd.f32 %v1075_v24, %v1067_v30  ;;  %v1093_v40 = vmul.f32 %v1067_v30, %v966_v27 }
 0x17f   : > { %v1962_v41 = vadd.f32 %v1961_v16, %v1953_v34  ;;  %v1937_v46 = vadd.f32 %v1936_v18, %v1928_v53  ;;  %v1954_v2 = vmul.f32 %v1928_v53, %v1876_v32  ;;  %v6650_v53 = vpop.permute.xlu0 %1056 }
 0x180   : > { %v1102_v60 = vadd.f32 %v1101_v33, %v1093_v40  ;;  %v6652_v40 = vpop.permute.xlu1 %1061 }
 0x181   : > { %v1963_v42 = vadd.f32 %v1962_v41, %v1954_v2  ;;  %v971_v37 = vpop.f32.mrb[8].mxu0 }
 0x182   : > { %1008 = vst [vmem:[%s6602_s22 + $0x20] sm:$0xff] %v971_v37  ;;  %v1068_v47 = vmul.f32 %v6626_v44, %v971_v37  ;;  %v1881_v36 = vpop.f32.mrb[8].mxu1  ;;  %v4613_v31 = vpop.f32.mrb[9].mxu0 }
 0x183   : > { %4023 = vst [vmem:[%s6602_s22 + $0x70] sm:$0xff] %v1881_v36  ;;  %v1929_v45 = vmul.f32 %v1881_v36, %v6626_v44  ;;  %v4757_v23 = vpop.f32.mrb[9].mxu1  ;;  %v974_v50 = vpop.f32.mrb[10].mxu0 }
 0x184   : > { %v1077_v62 = vadd.f32 %v1076_v39, %v1068_v47  ;;  %v1094_v54 = vmul.f32 %v1068_v47, %v971_v37  ;;  %1009 = vst [vmem:[%s6602_s22 + $0x28] sm:$0xff] %v974_v50  ;;  %v1069_v55 = vmul.f32 %v6628_v11, %v974_v50  ;;  %v1884_v56 = vpop.f32.mrb[10].mxu1  ;;  %v4614_v57 = vpop.f32.mrb[11].mxu0 }
 0x185   : > { %v1938_v38 = vadd.f32 %v1937_v46, %v1929_v45  ;;  %v1955_v58 = vmul.f32 %v1929_v45, %v1881_v36  ;;  %4024 = vst [vmem:[%s6602_s22 + $0x78] sm:$0xff] %v1884_v56  ;;  %v1930_v43 = vmul.f32 %v1884_v56, %v6628_v11  ;;  %v4758_v21 = vpop.f32.mrb[11].mxu1 }
 0x186   : > { %v1103_v48 = vadd.f32 %v1102_v60, %v1094_v54  ;;  %v1078_v0 = vadd.f32 %v1077_v62, %v1069_v55  ;;  %v1095_v3 = vmul.f32 %v1069_v55, %v974_v50 }
 0x187   : > { %v1964_v61 = vadd.f32 %v1963_v42, %v1955_v58  ;;  %v1939_v6 = vadd.f32 %v1938_v38, %v1930_v43  ;;  %v1956_v7 = vmul.f32 %v1930_v43, %v1884_v56 }
 0x188   : > { %v1104_v9 = vadd.f32 %v1103_v48, %v1095_v3 }
 0x189   : > { %v1965_v10 = vadd.f32 %v1964_v61, %v1956_v7  ;;  %v979_v52 = vpop.f32.mrb[12].mxu0 }
 0x18a   : > { %1010 = vst [vmem:[%s6602_s22 + $0x30] sm:$0xff] %v979_v52  ;;  %v1070_v13 = vmul.f32 %v6638_v8, %v979_v52  ;;  %v1889_v12 = vpop.f32.mrb[12].mxu1  ;;  %v4617_v5 = vpop.f32.mrb[13].mxu0 }
 0x18b   : > { %4025 = vst [vmem:[%s6602_s22 + $0x80] sm:$0xff] %v1889_v12  ;;  %v1931_v4 = vmul.f32 %v1889_v12, %v6638_v8  ;;  %v4761_v59 = vpop.f32.mrb[13].mxu1  ;;  %v982_v17 = vpop.f32.mrb[14].mxu0 }
 0x18c   : > { %v1079_v16 = vadd.f32 %v1078_v0, %v1070_v13  ;;  %v1096_v20 = vmul.f32 %v1070_v13, %v979_v52  ;;  %1011 = vst [vmem:[%s6602_s22 + $0x38] sm:$0xff] %v982_v17  ;;  %v1071_v22 = vmul.f32 %v6640_v15, %v982_v17  ;;  %v1892_v19 = vpop.f32.mrb[14].mxu1  ;;  %v4618_v25 = vpop.f32.mrb[15].mxu0 }
 0x18d   : > { %v1940_v26 = vadd.f32 %v1939_v6, %v1931_v4  ;;  %v1957_v14 = vmul.f32 %v1931_v4, %v1889_v12  ;;  %4026 = vst [vmem:[%s6602_s22 + $0x88] sm:$0xff] %v1892_v19  ;;  %v1932_v27 = vmul.f32 %v1892_v19, %v6640_v15  ;;  %v4762_v24 = vpop.f32.mrb[15].mxu1 }
 0x18e   : > { %v1105_v28 = vadd.f32 %v1104_v9, %v1096_v20  ;;  %v1080_v30 = vadd.f32 %v1079_v16, %v1071_v22  ;;  %v1097_v32 = vmul.f32 %v1071_v22, %v982_v17 }
 0x18f   : > { %v1966_v63 = vadd.f32 %v1965_v10, %v1957_v14  ;;  %v1941_v18 = vadd.f32 %v1940_v26, %v1932_v27  ;;  %v1958_v34 = vmul.f32 %v1932_v27, %v1892_v19 }
 0x190   : > { %v1106_v35 = vadd.f32 %v1105_v28, %v1097_v32 }
 0x191   : > { %v1967_v33 = vadd.f32 %v1966_v63, %v1958_v34  ;;  %v987_v39 = vpop.f32.mrb[16].mxu0 }
 0x192   : > { %1012 = vst [vmem:[%s6602_s22 + $0x40] sm:$0xff] %v987_v39  ;;  %v1072_v41 = vmul.f32 %v6650_v53, %v987_v39  ;;  %v1897_v46 = vpop.f32.mrb[16].mxu1  ;;  %v4621_v2 = vpop.f32.mrb[17].mxu0 }
 0x193   : > { %4027 = vst [vmem:[%s6602_s22 + $0x90] sm:$0xff] %v1897_v46  ;;  %v1933_v60 = vmul.f32 %v1897_v46, %v6650_v53  ;;  %v4765_v42 = vpop.f32.mrb[17].mxu1  ;;  %v990_v37 = vpop.f32.mrb[18].mxu0 }
 0x194   : > { %v1081_v47 = vadd.f32 %v1080_v30, %v1072_v41  ;;  %v1098_v36 = vmul.f32 %v1072_v41, %v987_v39  ;;  %1013 = vst [vmem:[%s6602_s22 + $0x48] sm:$0xff] %v990_v37  ;;  %v1073_v31 = vmul.f32 %v6652_v40, %v990_v37  ;;  %v1900_v45 = vpop.f32.mrb[18].mxu1  ;;  %v4622_v23 = vpop.f32.mrb[19].mxu0 }
 0x195   : > { %v1942_v50 = vadd.f32 %v1941_v18, %v1933_v60  ;;  %v1959_v62 = vmul.f32 %v1933_v60, %v1897_v46  ;;  %4028 = vst [vmem:[%s6602_s22 + $0x98] sm:$0xff] %v1900_v45  ;;  %v1934_v54 = vmul.f32 %v1900_v45, %v6652_v40  ;;  %v4766_v55 = vpop.f32.mrb[19].mxu1 }
 0x196   : > { %v1107_v56 = vadd.f32 %v1106_v35, %v1098_v36  ;;  %v1082_v57 = vadd.f32 %v1081_v47, %v1073_v31  ;;  %v1099_v38 = vmul.f32 %v1073_v31, %v990_v37 }
 0x197   : > { %v1968_v58 = vadd.f32 %v1967_v33, %v1959_v62  ;;  %v1943_v43 = vadd.f32 %v1942_v50, %v1934_v54  ;;  %v1960_v21 = vmul.f32 %v1934_v54, %v1900_v45 }
 0x198   : > { %v1083_v48 = vrot.slane %v1082_v57, 4  ;;  %v1108_v0 = vadd.f32 %v1107_v56, %v1099_v38 }
 0x199   : > { %v1944_v3 = vrot.slane %v1943_v43, 4  ;;  %v1969_v61 = vadd.f32 %v1968_v58, %v1960_v21 }
 0x19a   : > { %v1084_v6 = vadd.f32 %v1083_v48, %v1082_v57  ;;  %v1109_v7 = vrot.slane %v1108_v0, 4 }
 0x19b   : > { %v1945_v9 = vadd.f32 %v1944_v3, %v1943_v43  ;;  %v1970_v10 = vrot.slane %v1969_v61, 4 }
 0x19c   : > { %v1085_v52 = vrot.slane %v1084_v6, 2  ;;  %v1110_v13 = vadd.f32 %v1109_v7, %v1108_v0 }
 0x19d   : > { %v1946_v12 = vrot.slane %v1945_v9, 2  ;;  %v1971_v5 = vadd.f32 %v1970_v10, %v1969_v61 }
 0x19e   : > { %v1086_v4 = vadd.f32 %v1085_v52, %v1084_v6  ;;  %v1111_v59 = vrot.slane %v1110_v13, 2 }
 0x19f   : > { %v1947_v17 = vadd.f32 %v1946_v12, %v1945_v9  ;;  %v1972_v16 = vrot.slane %v1971_v5, 2 }
 0x1a0   : > { %v1087_v20 = vrot.slane %v1086_v4, 1  ;;  %v1112_v22 = vadd.f32 %v1111_v59, %v1110_v13 }
 0x1a1   : > { %v1948_v19 = vrot.slane %v1947_v17, 1  ;;  %v1973_v25 = vadd.f32 %v1972_v16, %v1971_v5 }
 0x1a2   : > { %v1088_v26 = vadd.f32 %v1087_v20, %v1086_v4  ;;  %v1113_v14 = vrot.slane %v1112_v22, 1 }
 0x1a3   : > { %v1949_v27 = vadd.f32 %v1948_v19, %v1947_v17  ;;  %v1974_v24 = vrot.slane %v1973_v25, 1 }
 0x1a4   : > { %v1114_v28 = vadd.f32 %v1113_v14, %v1112_v22 }
 0x1a5   : > { %v6662_v30 = vadd.f32 %v1949_v27, %v1088_v26  ;;  %v1975_v32 = vadd.f32 %v1974_v24, %v1973_v25 }
 0x1a7   : > { %v6664_v63 = vadd.f32 %v1975_v32, %v1114_v28 }
 0x211   : > { %v2735_v18 = vpop.f32.mrb[20].mxu0 }
 0x212   : > { %4139 = vst [vmem:[%s6602_s22 + $0xa0] sm:$0xff] %v2735_v18  ;;  %v2795_v34 = vmul.f32 %v2735_v18, %v6596_v51  ;;  %v3605_v35 = vpop.f32.mrb[20].mxu1  ;;  %v4893_v33 = vpop.f32.mrb[21].mxu0 }
 0x213   : > { %4259 = vst [vmem:[%s6602_s22 + $0xf0] sm:$0xff] %v3605_v35  ;;  %v3665_v39 = vmul.f32 %v3605_v35, %v6596_v51  ;;  %v5037_v41 = vpop.f32.mrb[21].mxu1  ;;  %v2738_v46 = vpop.f32.mrb[22].mxu0 }
 0x214   : > { %4140 = vst [vmem:[%s6602_s22 + $0xa8] sm:$0xff] %v2738_v46  ;;  %v2796_v2 = vmul.f32 %v2738_v46, %v6604_v1  ;;  %v3608_v60 = vpop.f32.mrb[22].mxu1  ;;  %v4894_v42 = vpop.f32.mrb[23].mxu0  ;;  %v2821_v36 = vmul.f32 %v2795_v34, %v2735_v18 }
 0x215   : > { %4260 = vst [vmem:[%s6602_s22 + $0xf8] sm:$0xff] %v3608_v60  ;;  %v3666_v37 = vmul.f32 %v3608_v60, %v6604_v1  ;;  %v5038_v47 = vpop.f32.mrb[23].mxu1  ;;  %v3691_v23 = vmul.f32 %v3665_v39, %v3605_v35 }
 0x216   : > { %v2805_v31 = vadd.f32 %v2796_v2, %v2795_v34  ;;  %v2822_v45 = vmul.f32 %v2796_v2, %v2738_v46 }
 0x217   : > { %v3675_v50 = vadd.f32 %v3666_v37, %v3665_v39  ;;  %v3692_v51 = vmul.f32 %v3666_v37, %v3608_v60 }
 0x218   : > { %v2831_v62 = vadd.f32 %v2822_v45, %v2821_v36 }
 0x219   : > { %v3701_v54 = vadd.f32 %v3692_v51, %v3691_v23  ;;  %v2743_v55 = vpop.f32.mrb[24].mxu0 }
 0x21a   : > { %4141 = vst [vmem:[%s6602_s22 + $0xb0] sm:$0xff] %v2743_v55  ;;  %v2797_v56 = vmul.f32 %v2743_v55, %v6606_v29  ;;  %v3613_v57 = vpop.f32.mrb[24].mxu1  ;;  %v4897_v38 = vpop.f32.mrb[25].mxu0 }
 0x21b   : > { %4261 = vst [vmem:[%s6602_s22 + $0x100] sm:$0xff] %v3613_v57  ;;  %v3667_v1 = vmul.f32 %v3613_v57, %v6606_v29  ;;  %v5041_v58 = vpop.f32.mrb[25].mxu1  ;;  %v2746_v43 = vpop.f32.mrb[26].mxu0 }
 0x21c   : > { %v2806_v21 = vadd.f32 %v2805_v31, %v2797_v56  ;;  %v2823_v48 = vmul.f32 %v2797_v56, %v2743_v55  ;;  %4142 = vst [vmem:[%s6602_s22 + $0xb8] sm:$0xff] %v2746_v43  ;;  %v2798_v0 = vmul.f32 %v2746_v43, %v6616_v49  ;;  %v3616_v3 = vpop.f32.mrb[26].mxu1  ;;  %v4898_v61 = vpop.f32.mrb[27].mxu0 }
 0x21d   : > { %v3676_v6 = vadd.f32 %v3675_v50, %v3667_v1  ;;  %v3693_v7 = vmul.f32 %v3667_v1, %v3613_v57  ;;  %4262 = vst [vmem:[%s6602_s22 + $0x108] sm:$0xff] %v3616_v3  ;;  %v3668_v9 = vmul.f32 %v3616_v3, %v6616_v49  ;;  %v5042_v10 = vpop.f32.mrb[27].mxu1 }
 0x21e   : > { %v2832_v52 = vadd.f32 %v2831_v62, %v2823_v48  ;;  %v2807_v13 = vadd.f32 %v2806_v21, %v2798_v0  ;;  %v2824_v29 = vmul.f32 %v2798_v0, %v2746_v43 }
 0x21f   : > { %v3702_v12 = vadd.f32 %v3701_v54, %v3693_v7  ;;  %v3677_v5 = vadd.f32 %v3676_v6, %v3668_v9  ;;  %v3694_v4 = vmul.f32 %v3668_v9, %v3616_v3 }
 0x220   : > { %v2833_v59 = vadd.f32 %v2832_v52, %v2824_v29 }
 0x221   : > { %v3703_v17 = vadd.f32 %v3702_v12, %v3694_v4  ;;  %v2751_v16 = vpop.f32.mrb[28].mxu0 }
 0x222   : > { %4143 = vst [vmem:[%s6602_s22 + $0xc0] sm:$0xff] %v2751_v16  ;;  %v2799_v20 = vmul.f32 %v2751_v16, %v6626_v44  ;;  %v3621_v22 = vpop.f32.mrb[28].mxu1  ;;  %v4901_v19 = vpop.f32.mrb[29].mxu0 }
 0x223   : > { %4263 = vst [vmem:[%s6602_s22 + $0x110] sm:$0xff] %v3621_v22  ;;  %v3669_v49 = vmul.f32 %v3621_v22, %v6626_v44  ;;  %v5045_v25 = vpop.f32.mrb[29].mxu1  ;;  %v2754_v26 = vpop.f32.mrb[30].mxu0 }
 0x224   : > { %v2808_v14 = vadd.f32 %v2807_v13, %v2799_v20  ;;  %v2825_v27 = vmul.f32 %v2799_v20, %v2751_v16  ;;  %4144 = vst [vmem:[%s6602_s22 + $0xc8] sm:$0xff] %v2754_v26  ;;  %v2800_v24 = vmul.f32 %v2754_v26, %v6628_v11  ;;  %v3624_v28 = vpop.f32.mrb[30].mxu1  ;;  %v4902_v32 = vpop.f32.mrb[31].mxu0 }
 0x225   : > { %v3678_v18 = vadd.f32 %v3677_v5, %v3669_v49  ;;  %v3695_v34 = vmul.f32 %v3669_v49, %v3621_v22  ;;  %4264 = vst [vmem:[%s6602_s22 + $0x118] sm:$0xff] %v3624_v28  ;;  %v3670_v35 = vmul.f32 %v3624_v28, %v6628_v11  ;;  %v5046_v33 = vpop.f32.mrb[31].mxu1 }
 0x226   : > { %v2834_v39 = vadd.f32 %v2833_v59, %v2825_v27  ;;  %v2809_v41 = vadd.f32 %v2808_v14, %v2800_v24  ;;  %v2826_v44 = vmul.f32 %v2800_v24, %v2754_v26 }
 0x227   : > { %v3704_v46 = vadd.f32 %v3703_v17, %v3695_v34  ;;  %v3679_v2 = vadd.f32 %v3678_v18, %v3670_v35  ;;  %v3696_v60 = vmul.f32 %v3670_v35, %v3624_v28 }
 0x228   : > { %v2835_v42 = vadd.f32 %v2834_v39, %v2826_v44 }
 0x229   : > { %v3705_v37 = vadd.f32 %v3704_v46, %v3696_v60  ;;  %v2759_v47 = vpop.f32.mrb[32].mxu0 }
 0x22a   : > { %4145 = vst [vmem:[%s6602_s22 + $0xd0] sm:$0xff] %v2759_v47  ;;  %v2801_v36 = vmul.f32 %v2759_v47, %v6638_v8  ;;  %v3629_v31 = vpop.f32.mrb[32].mxu1  ;;  %v4905_v45 = vpop.f32.mrb[33].mxu0 }
 0x22b   : > { %4265 = vst [vmem:[%s6602_s22 + $0x120] sm:$0xff] %v3629_v31  ;;  %v3671_v11 = vmul.f32 %v3629_v31, %v6638_v8  ;;  %v5049_v23 = vpop.f32.mrb[33].mxu1  ;;  %v2762_v50 = vpop.f32.mrb[34].mxu0 }
 0x22c   : > { %v2810_v51 = vadd.f32 %v2809_v41, %v2801_v36  ;;  %v2827_v62 = vmul.f32 %v2801_v36, %v2759_v47  ;;  %4146 = vst [vmem:[%s6602_s22 + $0xd8] sm:$0xff] %v2762_v50  ;;  %v2802_v54 = vmul.f32 %v2762_v50, %v6640_v15  ;;  %v3632_v55 = vpop.f32.mrb[34].mxu1  ;;  %v4906_v56 = vpop.f32.mrb[35].mxu0  ;;  %v3717_v47 = vlaneseq }
 0x22d   : > { %v3680_v57 = vadd.f32 %v3679_v2, %v3671_v11  ;;  %v3697_v38 = vmul.f32 %v3671_v11, %v3629_v31  ;;  %4266 = vst [vmem:[%s6602_s22 + $0x128] sm:$0xff] %v3632_v55  ;;  %v3672_v1 = vmul.f32 %v3632_v55, %v6640_v15  ;;  %v5050_v58 = vpop.f32.mrb[35].mxu1 }
 0x22e   : > { %v2836_v43 = vadd.f32 %v2835_v42, %v2827_v62  ;;  %v2811_v21 = vadd.f32 %v2810_v51, %v2802_v54  ;;  %v2828_v8 = vmul.f32 %v2802_v54, %v2762_v50  ;;  %v3718_v62 = vshrl.u32 %v3717_v47, 7 }
 0x22f   : > { %v3706_v48 = vadd.f32 %v3705_v37, %v3697_v38  ;;  %v3681_v0 = vadd.f32 %v3680_v57, %v3672_v1  ;;  %v3698_v3 = vmul.f32 %v3672_v1, %v3632_v55 }
 0x230   : > { %v2837_v61 = vadd.f32 %v2836_v43, %v2828_v8  ;;  %vm3719_vm7 = vcmp.eq.s32.totalorder %v3718_v62, 0 }
 0x231   : > { %v3707_v6 = vadd.f32 %v3706_v48, %v3698_v3  ;;  %v2767_v7 = vpop.f32.mrb[36].mxu0 }
 0x232   : > { %4147 = vst [vmem:[%s6602_s22 + $0xe0] sm:$0xff] %v2767_v7  ;;  %v2803_v9 = vmul.f32 %v2767_v7, %v6650_v53  ;;  %v3637_v10 = vpop.f32.mrb[36].mxu1  ;;  %v4909_v52 = vpop.f32.mrb[37].mxu0 }
 0x233   : > { %4267 = vst [vmem:[%s6602_s22 + $0x130] sm:$0xff] %v3637_v10  ;;  %v3673_v15 = vmul.f32 %v3637_v10, %v6650_v53  ;;  %v5053_v13 = vpop.f32.mrb[37].mxu1  ;;  %v2770_v29 = vpop.f32.mrb[38].mxu0 }
 0x234   : > { %v2812_v12 = vadd.f32 %v2811_v21, %v2803_v9  ;;  %v2829_v5 = vmul.f32 %v2803_v9, %v2767_v7  ;;  %4148 = vst [vmem:[%s6602_s22 + $0xe8] sm:$0xff] %v2770_v29  ;;  %v2804_v4 = vmul.f32 %v2770_v29, %v6652_v40  ;;  %v3640_v59 = vpop.f32.mrb[38].mxu1  ;;  %v4910_v17 = vpop.f32.mrb[39].mxu0 }
 0x235   : > { %v3682_v16 = vadd.f32 %v3681_v0, %v3673_v15  ;;  %v3699_v20 = vmul.f32 %v3673_v15, %v3637_v10  ;;  %4268 = vst [vmem:[%s6602_s22 + $0x138] sm:$0xff] %v3640_v59  ;;  %v3674_v22 = vmul.f32 %v3640_v59, %v6652_v40  ;;  %v5054_v19 = vpop.f32.mrb[39].mxu1 }
 0x236   : > { %v2838_v49 = vadd.f32 %v2837_v61, %v2829_v5  ;;  %v2813_v25 = vadd.f32 %v2812_v12, %v2804_v4  ;;  %v2830_v26 = vmul.f32 %v2804_v4, %v2770_v29 }
 0x237   : > { %v3708_v14 = vadd.f32 %v3707_v6, %v3699_v20  ;;  %v3683_v53 = vadd.f32 %v3682_v16, %v3674_v22  ;;  %v3700_v27 = vmul.f32 %v3674_v22, %v3640_v59 }
 0x238   : > { %v2814_v24 = vrot.slane %v2813_v25, 4  ;;  %v2839_v28 = vadd.f32 %v2838_v49, %v2830_v26 }
 0x239   : > { %v3684_v32 = vrot.slane %v3683_v53, 4  ;;  %v3709_v18 = vadd.f32 %v3708_v14, %v3700_v27 }
 0x23a   : > { %v2815_v34 = vadd.f32 %v2814_v24, %v2813_v25  ;;  %v2840_v35 = vrot.slane %v2839_v28, 4 }
 0x23b   : > { %v3685_v33 = vadd.f32 %v3684_v32, %v3683_v53  ;;  %v3710_v39 = vrot.slane %v3709_v18, 4 }
 0x23c   : > { %v2816_v41 = vrot.slane %v2815_v34, 2  ;;  %v2841_v44 = vadd.f32 %v2840_v35, %v2839_v28 }
 0x23d   : > { %v3686_v46 = vrot.slane %v3685_v33, 2  ;;  %v3711_v2 = vadd.f32 %v3710_v39, %v3709_v18 }
 0x23e   : > { %v2817_v40 = vadd.f32 %v2816_v41, %v2815_v34  ;;  %v2842_v60 = vrot.slane %v2841_v44, 2 }
 0x23f   : > { %v3687_v42 = vadd.f32 %v3686_v46, %v3685_v33  ;;  %v3712_v37 = vrot.slane %v3711_v2, 2 }
 0x240   : > { %v2818_v36 = vrot.slane %v2817_v40, 1  ;;  %v2843_v31 = vadd.f32 %v2842_v60, %v2841_v44 }
 0x241   : > { %v3688_v45 = vrot.slane %v3687_v42, 1  ;;  %v3713_v11 = vadd.f32 %v3712_v37, %v3711_v2 }
 0x242   : > { %v2819_v23 = vadd.f32 %v2818_v36, %v2817_v40  ;;  %v2844_v50 = vrot.slane %v2843_v31, 1 }
 0x243   : > { %v3714_v51 = vrot.slane %v3713_v11, 1  ;;  %v3689_v56 = vadd.f32 %v3688_v45, %v3687_v42 }
 0x244   : > { %v2820_v54 = vadd.f32 %v2819_v23, %v6662_v30  ;;  %v2845_v55 = vadd.f32 %v2844_v50, %v2843_v31 }
 0x245   : > { %v3715_v1 = vadd.f32 %v3714_v51, %v3713_v11 }
 0x246   : > { %v2846_v57 = vadd.f32 %v2845_v55, %v6664_v63  ;;  %v3690_v38 = vadd.f32 %v3689_v56, %v2820_v54 }
 0x248   : > { %v3716_v58 = vadd.f32 %v3715_v1, %v2846_v57 }
 0x24a   : > { %v3720_v43 = vsel %vm3719_vm7, %v3690_v38, %v3716_v58 }
 0x24b   : > { %3721 = vst [vmem:[%s208_s26] sm:$0x3] %v3720_v43 }
 0x24c PF: > { %s15_s15 = sadd.s32 1, %s5499_s15  }
 0x24d   : > { %p12_p4 = scmp.ge.s32.totalorder %s15_s15, 4  }
 0x24f   :  { %14 = sbr.rel (!%p12_p4) target bundleno = 1 (0x1), region = 92 }

</bundles_post_ra>
